<compile_context>
chip_gen: v7x
topology: tpu7x:2x2x1
jax: 0.10.0
libtpu: 0.0.40
codegen_flags: <defaults>
</compile_context>

<pallas_src>
import jax
import jax.numpy as jnp
from jax.experimental import pallas as pl
from jax.experimental.pallas import tpu as pltpu


_VMEM_LIMIT = 32 * 1024 * 1024  # explicit scoped-VMEM budget, safe on v5e/v6e/v7x


# ----------------------------------------------------------------------------
# Tile-size selection helpers
# ----------------------------------------------------------------------------
def _pick_tm(m, ncols, cap=1024):
    """Row-tile: a multiple of 16/8 dividing m, as large as possible but capped so
    the f32 accumulator stays small, preferring >=2 grid steps (v7x has 2 TCs)."""
    vmem_cap = max(8, (8 * 1024 * 1024) // max(4 * ncols, 1))
    cap = max(8, min(cap, vmem_cap))
    if m % 16 == 0:
        step = 16
    elif m % 8 == 0:
        step = 8
    else:
        return m                       # tiny / odd M: single full block
    best = m if m <= cap else None
    limit = min(m // 2, cap)
    t = step
    while t <= limit:
        if m % t == 0:
            best = t
        t += step
    return best if best is not None else m


def _pick_tk(k, max_tk=1024):
    """K-tile: full K when small/unaligned, else the largest multiple of 128
    dividing K (bounds VMEM independently of Cin)."""
    if k % 128 != 0 or k <= max_tk:
        return k, 1
    tk = 128
    t = 128
    while t <= max_tk:
        if k % t == 0:
            tk = t
        t += 128
    return tk, k // tk


# ----------------------------------------------------------------------------
# Pallas kernels
# ----------------------------------------------------------------------------
def matmul_pallas(a, b, *, activation=None, with_stats=False, out_dtype=jnp.bfloat16):
    """out = act(A @ B) with f32 MXU accumulation.  A:(M,K), B:(K,Ncols), both bf16.

    If with_stats, also returns per-row-tile partial column sums / sums-of-squares
    of the pre-activation f32 result (fused BatchNorm batch statistics).
    """
    m, k_dim = a.shape
    k2, ncols = b.shape
    assert k_dim == k2
    tm = _pick_tm(m, ncols)
    tk, n_k = _pick_tk(k_dim)
    n_m = m // tm

    def kernel(a_ref, b_ref, *rest):
        if with_stats:
            o_ref, sum_ref, sq_ref, acc_ref = rest
        else:
            o_ref, acc_ref = rest
        kk = pl.program_id(1)

        @pl.when(kk == 0)
        def _():
            acc_ref[...] = jnp.zeros_like(acc_ref)

        acc_ref[...] += jnp.dot(a_ref[...], b_ref[...],
                                preferred_element_type=jnp.float32)

        @pl.when(kk == n_k - 1)
        def _():
            acc = acc_ref[...]
            if with_stats:  # BatchNorm batch statistics fused into the epilogue
                sum_ref[...] = jnp.sum(acc, axis=0, keepdims=True)[None]
                sq_ref[...] = jnp.sum(acc * acc, axis=0, keepdims=True)[None]
            if activation == "tanh":
                acc = jnp.tanh(acc)
            o_ref[...] = acc.astype(o_ref.dtype)

    out_shape = [jax.ShapeDtypeStruct((m, ncols), out_dtype)]
    out_specs = [pl.BlockSpec((tm, ncols), lambda i, k: (i, 0))]
    if with_stats:
        out_shape += [jax.ShapeDtypeStruct((n_m, 1, ncols), jnp.float32)] * 2
        out_specs += [pl.BlockSpec((1, 1, ncols), lambda i, k: (i, 0, 0))] * 2

    res = pl.pallas_call(
        kernel,
        out_shape=tuple(out_shape),
        grid=(n_m, n_k),
        in_specs=[
            pl.BlockSpec((tm, tk), lambda i, k: (i, k)),
            pl.BlockSpec((tk, ncols), lambda i, k: (k, 0)),
        ],
        out_specs=tuple(out_specs),
        scratch_shapes=[pltpu.VMEM((tm, ncols), jnp.float32)],
        compiler_params=pltpu.CompilerParams(
            dimension_semantics=("parallel", "arbitrary"),
            vmem_limit_bytes=_VMEM_LIMIT,
        ),
    )(a, b)
    if with_stats:
        return res
    return res[0]


def _bn_relu_kernel(y_ref, scale_ref, shift_ref, o_ref):
    # Elementwise math kept in f32 (v5e has no bf16 VPU path); store bf16.
    y = y_ref[...].astype(jnp.float32) * scale_ref[...] + shift_ref[...]
    o_ref[...] = jnp.maximum(y, 0.0).astype(o_ref.dtype)


def bn_relu_pallas(y2d, scale_row, shift_row):
    r, l = y2d.shape
    tr = _pick_tm(r, l)
    return pl.pallas_call(
        _bn_relu_kernel,
        out_shape=jax.ShapeDtypeStruct((r, l), jnp.bfloat16),
        grid=(r // tr,),
        in_specs=[
            pl.BlockSpec((tr, l), lambda i: (i, 0)),
            pl.BlockSpec((1, l), lambda i: (0, 0)),
            pl.BlockSpec((1, l), lambda i: (0, 0)),
        ],
        out_specs=pl.BlockSpec((tr, l), lambda i: (i, 0)),
        compiler_params=pltpu.CompilerParams(
            dimension_semantics=("parallel",),
            vmem_limit_bytes=_VMEM_LIMIT,
        ),
    )(y2d, scale_row, shift_row)


# ----------------------------------------------------------------------------
# Layer glue (plain JAX: layout only; all heavy math is in the Pallas kernels)
# ----------------------------------------------------------------------------
def batchnorm_relu_from_stats(y2d, part_sum, part_sq, s_mult, c, gamma, beta, eps=1e-5):
    """BatchNorm2d (training-mode batch stats, biased variance) + ReLU.

    y2d      : (M, s_mult*c) bf16 conv output in matmul layout (channel fastest)
    part_sum : (n_tiles, 1, s_mult*c) f32 per-tile column sums (from the matmul)
    part_sq  : same layout, sums of squares
    """
    m, l = y2d.shape
    count = m * s_mult
    tot = jnp.sum(part_sum, axis=(0, 1)).reshape(s_mult, c).sum(axis=0)
    totsq = jnp.sum(part_sq, axis=(0, 1)).reshape(s_mult, c).sum(axis=0)
    mean = tot / count
    var = jnp.maximum(totsq / count - mean * mean, 0.0)
    scale = gamma / jnp.sqrt(var + eps)
    shift = beta - mean * scale

    # Lane-dense view: group g consecutive rows so the row length is a multiple
    # of 128 (avoids masked partial stores when s_mult*c < 128).
    g = 1
    while (g * l) % 128 != 0 and m % (2 * g) == 0:
        g *= 2
    if (g * l) % 128 != 0 or m % g != 0:
        g = 1  # fall back to masked stores (still correct)
    y_view = y2d.reshape(m // g, g * l)
    scale_row = jnp.tile(scale, g * s_mult).reshape(1, g * l).astype(jnp.float32)
    shift_row = jnp.tile(shift, g * s_mult).reshape(1, g * l).astype(jnp.float32)
    out = bn_relu_pallas(y_view, scale_row, shift_row)
    return out.reshape(m, l)


def conv_transpose_s2_matmul(x_nhwc, w_big, *, activation=None, with_stats=True,
                             out_dtype=jnp.bfloat16):
    """ConvTranspose2d(k=4, s=2, p=1, bias=False) via sub-pixel decomposition.

    x_nhwc: (N, H, W, Cin) bf16.  w_big: (9*Cin, 4*Cout) bf16 (precomputed).
    Result columns are ordered (parity_h, parity_w, Cout); pixel_shuffle()
    turns the (N*H*W, 4*Cout) matmul output into (N, 2H, 2W, Cout).
    """
    n, h, w, cin = x_nhwc.shape
    xp = jnp.pad(x_nhwc, ((0, 0), (1, 1), (1, 1), (0, 0)))
    # 3x3 im2col over the UN-upsampled input; taps ordered (dh, dw), channel fastest.
    # TODO(synk): im2col is still materialized (bf16, 9x activation) rather than fully
    # fused into the matmul via element-offset index maps / manual DMA.
    taps = [xp[:, dh:dh + h, dw:dw + w, :] for dh in range(3) for dw in range(3)]
    a = jnp.stack(taps, axis=3).reshape(n * h * w, 9 * cin)
    return matmul_pallas(a, w_big, activation=activation,
                         with_stats=with_stats, out_dtype=out_dtype)


def pixel_shuffle(y2d, n, h, w, cout):
    """(N*H*W, 4*Cout) with columns (p, q, co) -> (N, 2H, 2W, Cout)."""
    y = y2d.reshape(n, h, w, 2, 2, cout)
    return jnp.transpose(y, (0, 1, 3, 2, 4, 5)).reshape(n, 2 * h, 2 * w, cout)


# ----------------------------------------------------------------------------
# Parameters (PyTorch layout -> precomputed matmul-ready bf16 matrices at init)
# ----------------------------------------------------------------------------
def init_raw_params(key, n_ch, img_size, z_dim):
    """DCGAN-style init in the PyTorch ConvTranspose2d layout (Cin, Cout, kH, kW)."""
    ks = jax.random.split(key, 9)
    c8, c4, c2, c1 = img_size * 8, img_size * 4, img_size * 2, img_size

    def w(k, cin, cout):
        return 0.02 * jax.random.normal(k, (cin, cout, 4, 4), jnp.float32)

    def g(k, c):
        return 1.0 + 0.02 * jax.random.normal(k, (c,), jnp.float32)

    return {
        "w1": w(ks[0], z_dim, c8), "g1": g(ks[1], c8), "b1": jnp.zeros((c8,), jnp.float32),
        "w2": w(ks[2], c8, c4),    "g2": g(ks[3], c4), "b2": jnp.zeros((c4,), jnp.float32),
        "w3": w(ks[4], c4, c2),    "g3": g(ks[5], c2), "b3": jnp.zeros((c2,), jnp.float32),
        "w4": w(ks[6], c2, c1),    "g4": g(ks[7], c1), "b4": jnp.zeros((c1,), jnp.float32),
        "w5": w(ks[8], c1, n_ch),
    }


def _make_subpixel_weight(w_pt):
    """(Cin, Cout, 4, 4) ConvTranspose2d weight -> (9*Cin, 4*Cout) matrix.

    Rows: (dh, dw, ci) over the 3x3 im2col taps of the 1-padded input.
    Cols: (p, q, co) over the four output parities.  Entry is
    w[ci, co, 3+p-2*dh, 3+q-2*dw] when that kernel tap exists, else 0.
    """
    cin, cout = w_pt.shape[0], w_pt.shape[1]
    wb = jnp.zeros((3, 3, cin, 2, 2, cout), jnp.float32)
    for dh in range(3):
        for dw in range(3):
            for p in range(2):
                for q in range(2):
                    kh = 3 + p - 2 * dh
                    kw = 3 + q - 2 * dw
                    if 0 <= kh < 4 and 0 <= kw < 4:
                        wb = wb.at[dh, dw, :, p, q, :].set(w_pt[:, :, kh, kw])
    return wb.reshape(9 * cin, 4 * cout)


def convert_params(raw):
    """Precompute matmul-ready bf16 weight matrices once (not per forward call)."""
    p = {}
    w1 = jnp.transpose(raw["w1"], (0, 2, 3, 1))           # (z, kH, kW, Cout)
    p["w1"] = w1.reshape(w1.shape[0], -1).astype(jnp.bfloat16)
    for i in (2, 3, 4, 5):
        p[f"w{i}"] = _make_subpixel_weight(raw[f"w{i}"]).astype(jnp.bfloat16)
    for i in (1, 2, 3, 4):
        p[f"g{i}"] = raw[f"g{i}"].astype(jnp.float32)
        p[f"b{i}"] = raw[f"b{i}"].astype(jnp.float32)
    return p


# ----------------------------------------------------------------------------
# ConvGenerator forward
# ----------------------------------------------------------------------------
@jax.jit
def conv_generator_forward(noise_nchw, params):
    n = noise_nchw.shape[0]
    z = noise_nchw.shape[1]
    x_flat = noise_nchw.reshape(n, z).astype(jnp.bfloat16)

    # Layer 1: ConvTranspose2d(z, 8s, 4, 1, 0) on a 1x1 input == matmul vs (z, 16*8s).
    c8 = params["g1"].shape[0]
    y, s, sq = matmul_pallas(x_flat, params["w1"], with_stats=True)
    y = batchnorm_relu_from_stats(y, s, sq, 16, c8, params["g1"], params["b1"])
    x = y.reshape(n, 4, 4, c8)                             # columns were (kh, kw, co)

    # Layers 2-4: ConvTranspose2d(k=4, s=2, p=1) + BN(train stats) + ReLU.
    for wk, gk, bk in (("w2", "g2", "b2"), ("w3", "g3", "b3"), ("w4", "g4", "b4")):
        cout = params[gk].shape[0]
        _, h, w, _ = x.shape
        y, s, sq = conv_transpose_s2_matmul(x, params[wk], with_stats=True)
        y = batchnorm_relu_from_stats(y, s, sq, 4, cout, params[gk], params[bk])
        x = pixel_shuffle(y, n, h, w, cout)

    # Layer 5: ConvTranspose2d(k=4, s=2, p=1) + Tanh (fused into the matmul epilogue).
    n_ch = params["w5"].shape[1] // 4
    _, h, w, _ = x.shape
    y = conv_transpose_s2_matmul(x, params["w5"], activation="tanh",
                                 with_stats=False, out_dtype=jnp.float32)
    img = pixel_shuffle(y, n, h, w, n_ch)                  # (N, 64, 64, n_ch) f32
    return jnp.transpose(img, (0, 3, 1, 2))                # NCHW like the torch module


# ----------------------------------------------------------------------------
# Plain-JAX f32 reference (zero-insertion + flipped-kernel correlation) for checking
# ----------------------------------------------------------------------------
def _ref_conv_transpose(x_nhwc, w_pt, stride, padding):
    n, h, w, cin = x_nhwc.shape
    _, cout, kh_sz, kw_sz = w_pt.shape
    if stride > 1:
        xu = jnp.zeros((n, (h - 1) * stride + 1, (w - 1) * stride + 1, cin), x_nhwc.dtype)
        xu = xu.at[:, ::stride, ::stride, :].set(x_nhwc)
    else:
        xu = x_nhwc
    pad = kh_sz - 1 - padding
    xp = jnp.pad(xu, ((0, 0), (pad, pad), (pad, pad), (0, 0)))
    ho = xp.shape[1] - kh_sz + 1
    wo = xp.shape[2] - kw_sz + 1
    wf = w_pt[:, :, ::-1, ::-1]
    out = jnp.zeros((n, ho, wo, cout), jnp.float32)
    for kh in range(kh_sz):
        for kw in range(kw_sz):
            out = out + jnp.einsum("nhwc,cd->nhwd",
                                   xp[:, kh:kh + ho, kw:kw + wo, :], wf[:, :, kh, kw])
    return out


def _ref_bn_relu(x, gamma, beta, eps=1e-5):
    mean = jnp.mean(x, axis=(0, 1, 2))
    var = jnp.mean((x - mean) ** 2, axis=(0, 1, 2))
    y = (x - mean) / jnp.sqrt(var + eps) * gamma + beta
    return jnp.maximum(y, 0.0)


def reference_forward(noise_nchw, raw):
    x = jnp.transpose(noise_nchw, (0, 2, 3, 1)).astype(jnp.float32)
    x = _ref_bn_relu(_ref_conv_transpose(x, raw["w1"], 1, 0), raw["g1"], raw["b1"])
    x = _ref_bn_relu(_ref_conv_transpose(x, raw["w2"], 2, 1), raw["g2"], raw["b2"])
    x = _ref_bn_relu(_ref_conv_transpose(x, raw["w3"], 2, 1), raw["g3"], raw["b3"])
    x = _ref_bn_relu(_ref_conv_transpose(x, raw["w4"], 2, 1), raw["g4"], raw["b4"])
    x = jnp.tanh(_ref_conv_transpose(x, raw["w5"], 2, 1))
    return jnp.transpose(x, (0, 3, 1, 2))


if __name__ == "__main__":
    n_ch, img_size, z_dim, batch = 3, 8, 16, 2

    key = jax.random.PRNGKey(0)
    k_noise, k_params = jax.random.split(key)
    raw = init_raw_params(k_params, n_ch, img_size, z_dim)
    params = convert_params(raw)
    noise = jax.random.normal(k_noise, (batch, z_dim, 1, 1), jnp.float32)

    out = conv_generator_forward(noise, params)
    out = jax.block_until_ready(out)

    assert out.shape == (batch, n_ch, 64, 64), out.shape
    assert bool(jnp.all(jnp.isfinite(out)))
    assert bool(jnp.all(jnp.abs(out) <= 1.0 + 1e-6))       # tanh range

    # Numerical check against a plain-JAX f32 ConvTranspose2d+BN+ReLU/Tanh reference
    # (bf16 MXU inputs + bf16 inter-layer activations -> small tolerance).
    ref = reference_forward(noise, raw)
    max_err = float(jnp.max(jnp.abs(out - ref)))
    assert max_err < 8e-2, f"max abs err vs reference = {max_err}"

    print("KERNEL_OK")
</pallas_src>

<mosaic_0001>
module attributes {stable_mosaic.version = 11 : i64} {
  func.func @kernel(%arg0: i32, %arg1: i32, %arg2: memref<2x16xbf16, #tpu.memory_space<vmem>>, %arg3: memref<16x1024xbf16, #tpu.memory_space<vmem>>, %arg4: memref<2x1024xbf16, #tpu.memory_space<vmem>>, %arg5: memref<1x1x1024xf32, #tpu.memory_space<vmem>>, %arg6: memref<1x1x1024xf32, #tpu.memory_space<vmem>>, %arg7: memref<2x1024xf32, #tpu.memory_space<vmem>>) attributes {dimension_semantics = [#tpu.dimension_semantics<parallel>, #tpu.dimension_semantics<arbitrary>], iteration_bounds = array<i64: 1, 1>, scalar_prefetch = 0 : i64, scratch_operands = 1 : i64, tpu.core_type = #tpu.core_type<tc>, window_params = [{transform_indices = @transform_0, window_bounds = array<i64: 2, 16>}, {transform_indices = @transform_1, window_bounds = array<i64: 16, 1024>}, {transform_indices = @transform_2, window_bounds = array<i64: 2, 1024>}, {transform_indices = @transform_3, window_bounds = array<i64: 1, 1, 1024>}, {transform_indices = @transform_4, window_bounds = array<i64: 1, 1, 1024>}]} {
    %c0_i32 = arith.constant 0 : i32
    %0 = arith.cmpi eq, %arg1, %c0_i32 : i32
    %1 = arith.extui %0 : i1 to i32
    %c0_i32_0 = arith.constant 0 : i32
    %2 = arith.cmpi ne, %1, %c0_i32_0 : i32
    scf.if %2 {
      %cst_10 = arith.constant 0.000000e+00 : f32
      %12 = vector.broadcast %cst_10 : f32 to vector<2x1024xf32>
      %c0_11 = arith.constant 0 : index
      %c0_12 = arith.constant 0 : index
      %13 = vector.load %arg7[%c0_11, %c0_12] : memref<2x1024xf32, #tpu.memory_space<vmem>>, vector<2x1024xf32>
      tpu.vector_store %arg7[%c0_11, %c0_12], %12 {strides = array<i32>} : memref<2x1024xf32, #tpu.memory_space<vmem>>, vector<2x1024xf32>,
    } else {
    }
    %c0 = arith.constant 0 : index
    %c0_1 = arith.constant 0 : index
    %3 = vector.load %arg7[%c0, %c0_1] : memref<2x1024xf32, #tpu.memory_space<vmem>>, vector<2x1024xf32>
    %c0_2 = arith.constant 0 : index
    %c0_3 = arith.constant 0 : index
    %4 = vector.load %arg2[%c0_2, %c0_3] : memref<2x16xbf16, #tpu.memory_space<vmem>>, vector<2x16xbf16>
    %c0_4 = arith.constant 0 : index
    %c0_5 = arith.constant 0 : index
    %5 = vector.load %arg3[%c0_4, %c0_5] : memref<16x1024xbf16, #tpu.memory_space<vmem>>, vector<16x1024xbf16>
    %cst = arith.constant dense<0.000000e+00> : vector<2x1024xf32>
    %6 = tpu.matmul %4, %5, %cst {dimension_numbers = #tpu.dot_dimension_numbers<[1], [0], [0], [1], [0, 0, 1, 1], [], []>} : vector<2x16xbf16>, vector<16x1024xbf16>, vector<2x1024xf32> -> vector<2x1024xf32>
    %7 = arith.addf %3, %6 : vector<2x1024xf32>
    %c0_6 = arith.constant 0 : index
    %c0_7 = arith.constant 0 : index
    %8 = vector.load %arg7[%c0_6, %c0_7] : memref<2x1024xf32, #tpu.memory_space<vmem>>, vector<2x1024xf32>
    tpu.vector_store %arg7[%c0_6, %c0_7], %7 {strides = array<i32>} : memref<2x1024xf32, #tpu.memory_space<vmem>>, vector<2x1024xf32>,
    %c0_i32_8 = arith.constant 0 : i32
    %9 = arith.cmpi eq, %arg1, %c0_i32_8 : i32
    %10 = arith.extui %9 : i1 to i32
    %c0_i32_9 = arith.constant 0 : i32
    %11 = arith.cmpi ne, %10, %c0_i32_9 : i32
    scf.if %11 {
      %c0_10 = arith.constant 0 : index
      %c0_11 = arith.constant 0 : index
      %12 = vector.load %arg7[%c0_10, %c0_11] : memref<2x1024xf32, #tpu.memory_space<vmem>>, vector<2x1024xf32>
      %cst_12 = arith.constant dense<0.000000e+00> : vector<1024xf32>
      %13 = vector.multi_reduction <add>, %12, %cst_12 [0] : vector<2x1024xf32> to vector<1024xf32>
      %14 = vector.shape_cast %13 : vector<1024xf32> to vector<1x1024xf32>
      %15 = vector.shape_cast %14 : vector<1x1024xf32> to vector<1x1x1024xf32>
      %c0_13 = arith.constant 0 : index
      %c0_14 = arith.constant 0 : index
      %c0_15 = arith.constant 0 : index
      %16 = vector.load %arg5[%c0_13, %c0_14, %c0_15] : memref<1x1x1024xf32, #tpu.memory_space<vmem>>, vector<1x1x1024xf32>
      tpu.vector_store %arg5[%c0_13, %c0_14, %c0_15], %15 {strides = array<i32>} : memref<1x1x1024xf32, #tpu.memory_space<vmem>>, vector<1x1x1024xf32>,
      %17 = arith.mulf %12, %12 : vector<2x1024xf32>
      %cst_16 = arith.constant dense<0.000000e+00> : vector<1024xf32>
      %18 = vector.multi_reduction <add>, %17, %cst_16 [0] : vector<2x1024xf32> to vector<1024xf32>
      %19 = vector.shape_cast %18 : vector<1024xf32> to vector<1x1024xf32>
      %20 = vector.shape_cast %19 : vector<1x1024xf32> to vector<1x1x1024xf32>
      %c0_17 = arith.constant 0 : index
      %c0_18 = arith.constant 0 : index
      %c0_19 = arith.constant 0 : index
      %21 = vector.load %arg6[%c0_17, %c0_18, %c0_19] : memref<1x1x1024xf32, #tpu.memory_space<vmem>>, vector<1x1x1024xf32>
      tpu.vector_store %arg6[%c0_17, %c0_18, %c0_19], %20 {strides = array<i32>} : memref<1x1x1024xf32, #tpu.memory_space<vmem>>, vector<1x1x1024xf32>,
      %22 = arith.truncf %12 : vector<2x1024xf32> to vector<2x1024xbf16>
      %c0_20 = arith.constant 0 : index
      %c0_21 = arith.constant 0 : index
      %23 = vector.load %arg4[%c0_20, %c0_21] : memref<2x1024xbf16, #tpu.memory_space<vmem>>, vector<2x1024xbf16>
      tpu.vector_store %arg4[%c0_20, %c0_21], %22 {strides = array<i32>} : memref<2x1024xbf16, #tpu.memory_space<vmem>>, vector<2x1024xbf16>,
    } else {
    }
    return
  }
  func.func @transform_0(%arg0: i32, %arg1: i32) -> (i32, i32) {
    %c0_i32 = arith.constant 0 : i32
    return %arg0, %arg1 : i32, i32
  }
  func.func @transform_1(%arg0: i32, %arg1: i32) -> (i32, i32) {
    %c0_i32 = arith.constant 0 : i32
    %c0_i32_0 = arith.constant 0 : i32
    return %arg1, %c0_i32 : i32, i32
  }
  func.func @transform_2(%arg0: i32, %arg1: i32) -> (i32, i32) {
    %c0_i32 = arith.constant 0 : i32
    %c0_i32_0 = arith.constant 0 : i32
    return %arg0, %c0_i32 : i32, i32
  }
  func.func @transform_3(%arg0: i32, %arg1: i32) -> (i32, i32, i32) {
    %c0_i32 = arith.constant 0 : i32
    %c0_i32_0 = arith.constant 0 : i32
    %c0_i32_1 = arith.constant 0 : i32
    return %arg0, %c0_i32, %c0_i32_0 : i32, i32, i32
  }
  func.func @transform_4(%arg0: i32, %arg1: i32) -> (i32, i32, i32) {
    %c0_i32 = arith.constant 0 : i32
    %c0_i32_0 = arith.constant 0 : i32
    %c0_i32_1 = arith.constant 0 : i32
    return %arg0, %c0_i32, %c0_i32_0 : i32, i32, i32
  }
}

module attributes {stable_mosaic.version = 11 : i64} {
  func.func @_bn_relu_kernel(%arg0: i32, %arg1: memref<2x1024xbf16, #tpu.memory_space<vmem>>, %arg2: memref<1x1024xf32, #tpu.memory_space<vmem>>, %arg3: memref<1x1024xf32, #tpu.memory_space<vmem>>, %arg4: memref<2x1024xbf16, #tpu.memory_space<vmem>>) attributes {dimension_semantics = [#tpu.dimension_semantics<parallel>], iteration_bounds = array<i64: 1>, scalar_prefetch = 0 : i64, scratch_operands = 0 : i64, tpu.core_type = #tpu.core_type<tc>, window_params = [{transform_indices = @transform_0, window_bounds = array<i64: 2, 1024>}, {pipeline_mode = #tpu.pipeline_mode<synchronous>, transform_indices = @transform_1, window_bounds = array<i64: 1, 1024>}, {pipeline_mode = #tpu.pipeline_mode<synchronous>, transform_indices = @transform_2, window_bounds = array<i64: 1, 1024>}, {transform_indices = @transform_3, window_bounds = array<i64: 2, 1024>}]} {
    %c0 = arith.constant 0 : index
    %c0_0 = arith.constant 0 : index
    %0 = vector.load %arg1[%c0, %c0_0] : memref<2x1024xbf16, #tpu.memory_space<vmem>>, vector<2x1024xbf16>
    %1 = arith.extf %0 : vector<2x1024xbf16> to vector<2x1024xf32>
    %c0_1 = arith.constant 0 : index
    %c0_2 = arith.constant 0 : index
    %2 = vector.load %arg2[%c0_1, %c0_2] : memref<1x1024xf32, #tpu.memory_space<vmem>>, vector<1x1024xf32>
    %3 = vector.broadcast %2 : vector<1x1024xf32> to vector<2x1024xf32>
    %4 = arith.mulf %1, %3 : vector<2x1024xf32>
    %c0_3 = arith.constant 0 : index
    %c0_4 = arith.constant 0 : index
    %5 = vector.load %arg3[%c0_3, %c0_4] : memref<1x1024xf32, #tpu.memory_space<vmem>>, vector<1x1024xf32>
    %6 = vector.broadcast %5 : vector<1x1024xf32> to vector<2x1024xf32>
    %7 = arith.addf %4, %6 : vector<2x1024xf32>
    %cst = arith.constant 0.000000e+00 : f32
    %8 = vector.broadcast %cst : f32 to vector<2x1024xf32>
    %9 = arith.maximumf %7, %8 : vector<2x1024xf32>
    %10 = arith.truncf %9 : vector<2x1024xf32> to vector<2x1024xbf16>
    %c0_5 = arith.constant 0 : index
    %c0_6 = arith.constant 0 : index
    %11 = vector.load %arg4[%c0_5, %c0_6] : memref<2x1024xbf16, #tpu.memory_space<vmem>>, vector<2x1024xbf16>
    tpu.vector_store %arg4[%c0_5, %c0_6], %10 {strides = array<i32>} : memref<2x1024xbf16, #tpu.memory_space<vmem>>, vector<2x1024xbf16>,
    return
  }
  func.func @transform_0(%arg0: i32) -> (i32, i32) {
    %c0_i32 = arith.constant 0 : i32
    %c0_i32_0 = arith.constant 0 : i32
    return %arg0, %c0_i32 : i32, i32
  }
  func.func @transform_1(%arg0: i32) -> (i32, i32) {
    %c0_i32 = arith.constant 0 : i32
    %c0_i32_0 = arith.constant 0 : i32
    %c0_i32_1 = arith.constant 0 : i32
    return %c0_i32, %c0_i32_0 : i32, i32
  }
  func.func @transform_2(%arg0: i32) -> (i32, i32) {
    %c0_i32 = arith.constant 0 : i32
    %c0_i32_0 = arith.constant 0 : i32
    %c0_i32_1 = arith.constant 0 : i32
    return %c0_i32, %c0_i32_0 : i32, i32
  }
  func.func @transform_3(%arg0: i32) -> (i32, i32) {
    %c0_i32 = arith.constant 0 : i32
    %c0_i32_0 = arith.constant 0 : i32
    return %arg0, %c0_i32 : i32, i32
  }
}

module attributes {stable_mosaic.version = 11 : i64} {
  func.func @kernel(%arg0: i32, %arg1: i32, %arg2: memref<16x576xbf16, #tpu.memory_space<vmem>>, %arg3: memref<576x128xbf16, #tpu.memory_space<vmem>>, %arg4: memref<16x128xbf16, #tpu.memory_space<vmem>>, %arg5: memref<1x1x128xf32, #tpu.memory_space<vmem>>, %arg6: memref<1x1x128xf32, #tpu.memory_space<vmem>>, %arg7: memref<16x128xf32, #tpu.memory_space<vmem>>) attributes {dimension_semantics = [#tpu.dimension_semantics<parallel>, #tpu.dimension_semantics<arbitrary>], iteration_bounds = array<i64: 2, 1>, scalar_prefetch = 0 : i64, scratch_operands = 1 : i64, tpu.core_type = #tpu.core_type<tc>, window_params = [{transform_indices = @transform_0, window_bounds = array<i64: 16, 576>}, {transform_indices = @transform_1, window_bounds = array<i64: 576, 128>}, {transform_indices = @transform_2, window_bounds = array<i64: 16, 128>}, {transform_indices = @transform_3, window_bounds = array<i64: 1, 1, 128>}, {transform_indices = @transform_4, window_bounds = array<i64: 1, 1, 128>}]} {
    %c0_i32 = arith.constant 0 : i32
    %0 = arith.cmpi eq, %arg1, %c0_i32 : i32
    %1 = arith.extui %0 : i1 to i32
    %c0_i32_0 = arith.constant 0 : i32
    %2 = arith.cmpi ne, %1, %c0_i32_0 : i32
    scf.if %2 {
      %cst_10 = arith.constant 0.000000e+00 : f32
      %12 = vector.broadcast %cst_10 : f32 to vector<16x128xf32>
      %c0_11 = arith.constant 0 : index
      %c0_12 = arith.constant 0 : index
      %13 = vector.load %arg7[%c0_11, %c0_12] : memref<16x128xf32, #tpu.memory_space<vmem>>, vector<16x128xf32>
      tpu.vector_store %arg7[%c0_11, %c0_12], %12 {strides = array<i32>} : memref<16x128xf32, #tpu.memory_space<vmem>>, vector<16x128xf32>,
    } else {
    }
    %c0 = arith.constant 0 : index
    %c0_1 = arith.constant 0 : index
    %3 = vector.load %arg7[%c0, %c0_1] : memref<16x128xf32, #tpu.memory_space<vmem>>, vector<16x128xf32>
    %c0_2 = arith.constant 0 : index
    %c0_3 = arith.constant 0 : index
    %4 = vector.load %arg2[%c0_2, %c0_3] : memref<16x576xbf16, #tpu.memory_space<vmem>>, vector<16x576xbf16>
    %c0_4 = arith.constant 0 : index
    %c0_5 = arith.constant 0 : index
    %5 = vector.load %arg3[%c0_4, %c0_5] : memref<576x128xbf16, #tpu.memory_space<vmem>>, vector<576x128xbf16>
    %cst = arith.constant dense<0.000000e+00> : vector<16x128xf32>
    %6 = tpu.matmul %4, %5, %cst {dimension_numbers = #tpu.dot_dimension_numbers<[1], [0], [0], [1], [0, 0, 1, 1], [], []>} : vector<16x576xbf16>, vector<576x128xbf16>, vector<16x128xf32> -> vector<16x128xf32>
    %7 = arith.addf %3, %6 : vector<16x128xf32>
    %c0_6 = arith.constant 0 : index
    %c0_7 = arith.constant 0 : index
    %8 = vector.load %arg7[%c0_6, %c0_7] : memref<16x128xf32, #tpu.memory_space<vmem>>, vector<16x128xf32>
    tpu.vector_store %arg7[%c0_6, %c0_7], %7 {strides = array<i32>} : memref<16x128xf32, #tpu.memory_space<vmem>>, vector<16x128xf32>,
    %c0_i32_8 = arith.constant 0 : i32
    %9 = arith.cmpi eq, %arg1, %c0_i32_8 : i32
    %10 = arith.extui %9 : i1 to i32
    %c0_i32_9 = arith.constant 0 : i32
    %11 = arith.cmpi ne, %10, %c0_i32_9 : i32
    scf.if %11 {
      %c0_10 = arith.constant 0 : index
      %c0_11 = arith.constant 0 : index
      %12 = vector.load %arg7[%c0_10, %c0_11] : memref<16x128xf32, #tpu.memory_space<vmem>>, vector<16x128xf32>
      %cst_12 = arith.constant dense<0.000000e+00> : vector<128xf32>
      %13 = vector.multi_reduction <add>, %12, %cst_12 [0] : vector<16x128xf32> to vector<128xf32>
      %14 = vector.shape_cast %13 : vector<128xf32> to vector<1x128xf32>
      %15 = vector.shape_cast %14 : vector<1x128xf32> to vector<1x1x128xf32>
      %c0_13 = arith.constant 0 : index
      %c0_14 = arith.constant 0 : index
      %c0_15 = arith.constant 0 : index
      %16 = vector.load %arg5[%c0_13, %c0_14, %c0_15] : memref<1x1x128xf32, #tpu.memory_space<vmem>>, vector<1x1x128xf32>
      tpu.vector_store %arg5[%c0_13, %c0_14, %c0_15], %15 {strides = array<i32>} : memref<1x1x128xf32, #tpu.memory_space<vmem>>, vector<1x1x128xf32>,
      %17 = arith.mulf %12, %12 : vector<16x128xf32>
      %cst_16 = arith.constant dense<0.000000e+00> : vector<128xf32>
      %18 = vector.multi_reduction <add>, %17, %cst_16 [0] : vector<16x128xf32> to vector<128xf32>
      %19 = vector.shape_cast %18 : vector<128xf32> to vector<1x128xf32>
      %20 = vector.shape_cast %19 : vector<1x128xf32> to vector<1x1x128xf32>
      %c0_17 = arith.constant 0 : index
      %c0_18 = arith.constant 0 : index
      %c0_19 = arith.constant 0 : index
      %21 = vector.load %arg6[%c0_17, %c0_18, %c0_19] : memref<1x1x128xf32, #tpu.memory_space<vmem>>, vector<1x1x128xf32>
      tpu.vector_store %arg6[%c0_17, %c0_18, %c0_19], %20 {strides = array<i32>} : memref<1x1x128xf32, #tpu.memory_space<vmem>>, vector<1x1x128xf32>,
      %22 = arith.truncf %12 : vector<16x128xf32> to vector<16x128xbf16>
      %c0_20 = arith.constant 0 : index
      %c0_21 = arith.constant 0 : index
      %23 = vector.load %arg4[%c0_20, %c0_21] : memref<16x128xbf16, #tpu.memory_space<vmem>>, vector<16x128xbf16>
      tpu.vector_store %arg4[%c0_20, %c0_21], %22 {strides = array<i32>} : memref<16x128xbf16, #tpu.memory_space<vmem>>, vector<16x128xbf16>,
    } else {
    }
    return
  }
  func.func @transform_0(%arg0: i32, %arg1: i32) -> (i32, i32) {
    %c0_i32 = arith.constant 0 : i32
    return %arg0, %arg1 : i32, i32
  }
  func.func @transform_1(%arg0: i32, %arg1: i32) -> (i32, i32) {
    %c0_i32 = arith.constant 0 : i32
    %c0_i32_0 = arith.constant 0 : i32
    return %arg1, %c0_i32 : i32, i32
  }
  func.func @transform_2(%arg0: i32, %arg1: i32) -> (i32, i32) {
    %c0_i32 = arith.constant 0 : i32
    %c0_i32_0 = arith.constant 0 : i32
    return %arg0, %c0_i32 : i32, i32
  }
  func.func @transform_3(%arg0: i32, %arg1: i32) -> (i32, i32, i32) {
    %c0_i32 = arith.constant 0 : i32
    %c0_i32_0 = arith.constant 0 : i32
    %c0_i32_1 = arith.constant 0 : i32
    return %arg0, %c0_i32, %c0_i32_0 : i32, i32, i32
  }
  func.func @transform_4(%arg0: i32, %arg1: i32) -> (i32, i32, i32) {
    %c0_i32 = arith.constant 0 : i32
    %c0_i32_0 = arith.constant 0 : i32
    %c0_i32_1 = arith.constant 0 : i32
    return %arg0, %c0_i32, %c0_i32_0 : i32, i32, i32
  }
}

module attributes {stable_mosaic.version = 11 : i64} {
  func.func @_bn_relu_kernel(%arg0: i32, %arg1: memref<16x128xbf16, #tpu.memory_space<vmem>>, %arg2: memref<1x128xf32, #tpu.memory_space<vmem>>, %arg3: memref<1x128xf32, #tpu.memory_space<vmem>>, %arg4: memref<16x128xbf16, #tpu.memory_space<vmem>>) attributes {dimension_semantics = [#tpu.dimension_semantics<parallel>], iteration_bounds = array<i64: 2>, scalar_prefetch = 0 : i64, scratch_operands = 0 : i64, tpu.core_type = #tpu.core_type<tc>, window_params = [{transform_indices = @transform_0, window_bounds = array<i64: 16, 128>}, {pipeline_mode = #tpu.pipeline_mode<synchronous>, transform_indices = @transform_1, window_bounds = array<i64: 1, 128>}, {pipeline_mode = #tpu.pipeline_mode<synchronous>, transform_indices = @transform_2, window_bounds = array<i64: 1, 128>}, {transform_indices = @transform_3, window_bounds = array<i64: 16, 128>}]} {
    %c0 = arith.constant 0 : index
    %c0_0 = arith.constant 0 : index
    %0 = vector.load %arg1[%c0, %c0_0] : memref<16x128xbf16, #tpu.memory_space<vmem>>, vector<16x128xbf16>
    %1 = arith.extf %0 : vector<16x128xbf16> to vector<16x128xf32>
    %c0_1 = arith.constant 0 : index
    %c0_2 = arith.constant 0 : index
    %2 = vector.load %arg2[%c0_1, %c0_2] : memref<1x128xf32, #tpu.memory_space<vmem>>, vector<1x128xf32>
    %3 = vector.broadcast %2 : vector<1x128xf32> to vector<16x128xf32>
    %4 = arith.mulf %1, %3 : vector<16x128xf32>
    %c0_3 = arith.constant 0 : index
    %c0_4 = arith.constant 0 : index
    %5 = vector.load %arg3[%c0_3, %c0_4] : memref<1x128xf32, #tpu.memory_space<vmem>>, vector<1x128xf32>
    %6 = vector.broadcast %5 : vector<1x128xf32> to vector<16x128xf32>
    %7 = arith.addf %4, %6 : vector<16x128xf32>
    %cst = arith.constant 0.000000e+00 : f32
    %8 = vector.broadcast %cst : f32 to vector<16x128xf32>
    %9 = arith.maximumf %7, %8 : vector<16x128xf32>
    %10 = arith.truncf %9 : vector<16x128xf32> to vector<16x128xbf16>
    %c0_5 = arith.constant 0 : index
    %c0_6 = arith.constant 0 : index
    %11 = vector.load %arg4[%c0_5, %c0_6] : memref<16x128xbf16, #tpu.memory_space<vmem>>, vector<16x128xbf16>
    tpu.vector_store %arg4[%c0_5, %c0_6], %10 {strides = array<i32>} : memref<16x128xbf16, #tpu.memory_space<vmem>>, vector<16x128xbf16>,
    return
  }
  func.func @transform_0(%arg0: i32) -> (i32, i32) {
    %c0_i32 = arith.constant 0 : i32
    %c0_i32_0 = arith.constant 0 : i32
    return %arg0, %c0_i32 : i32, i32
  }
  func.func @transform_1(%arg0: i32) -> (i32, i32) {
    %c0_i32 = arith.constant 0 : i32
    %c0_i32_0 = arith.constant 0 : i32
    %c0_i32_1 = arith.constant 0 : i32
    return %c0_i32, %c0_i32_0 : i32, i32
  }
  func.func @transform_2(%arg0: i32) -> (i32, i32) {
    %c0_i32 = arith.constant 0 : i32
    %c0_i32_0 = arith.constant 0 : i32
    %c0_i32_1 = arith.constant 0 : i32
    return %c0_i32, %c0_i32_0 : i32, i32
  }
  func.func @transform_3(%arg0: i32) -> (i32, i32) {
    %c0_i32 = arith.constant 0 : i32
    %c0_i32_0 = arith.constant 0 : i32
    return %arg0, %c0_i32 : i32, i32
  }
}

module attributes {stable_mosaic.version = 11 : i64} {
  func.func @kernel(%arg0: i32, %arg1: i32, %arg2: memref<64x288xbf16, #tpu.memory_space<vmem>>, %arg3: memref<288x64xbf16, #tpu.memory_space<vmem>>, %arg4: memref<64x64xbf16, #tpu.memory_space<vmem>>, %arg5: memref<1x1x64xf32, #tpu.memory_space<vmem>>, %arg6: memref<1x1x64xf32, #tpu.memory_space<vmem>>, %arg7: memref<64x64xf32, #tpu.memory_space<vmem>>) attributes {dimension_semantics = [#tpu.dimension_semantics<parallel>, #tpu.dimension_semantics<arbitrary>], iteration_bounds = array<i64: 2, 1>, scalar_prefetch = 0 : i64, scratch_operands = 1 : i64, tpu.core_type = #tpu.core_type<tc>, window_params = [{transform_indices = @transform_0, window_bounds = array<i64: 64, 288>}, {transform_indices = @transform_1, window_bounds = array<i64: 288, 64>}, {transform_indices = @transform_2, window_bounds = array<i64: 64, 64>}, {transform_indices = @transform_3, window_bounds = array<i64: 1, 1, 64>}, {transform_indices = @transform_4, window_bounds = array<i64: 1, 1, 64>}]} {
    %c0_i32 = arith.constant 0 : i32
    %0 = arith.cmpi eq, %arg1, %c0_i32 : i32
    %1 = arith.extui %0 : i1 to i32
    %c0_i32_0 = arith.constant 0 : i32
    %2 = arith.cmpi ne, %1, %c0_i32_0 : i32
    scf.if %2 {
      %cst_10 = arith.constant 0.000000e+00 : f32
      %12 = vector.broadcast %cst_10 : f32 to vector<64x64xf32>
      %c0_11 = arith.constant 0 : index
      %c0_12 = arith.constant 0 : index
      %13 = vector.load %arg7[%c0_11, %c0_12] : memref<64x64xf32, #tpu.memory_space<vmem>>, vector<64x64xf32>
      tpu.vector_store %arg7[%c0_11, %c0_12], %12 {strides = array<i32>} : memref<64x64xf32, #tpu.memory_space<vmem>>, vector<64x64xf32>,
    } else {
    }
    %c0 = arith.constant 0 : index
    %c0_1 = arith.constant 0 : index
    %3 = vector.load %arg7[%c0, %c0_1] : memref<64x64xf32, #tpu.memory_space<vmem>>, vector<64x64xf32>
    %c0_2 = arith.constant 0 : index
    %c0_3 = arith.constant 0 : index
    %4 = vector.load %arg2[%c0_2, %c0_3] : memref<64x288xbf16, #tpu.memory_space<vmem>>, vector<64x288xbf16>
    %c0_4 = arith.constant 0 : index
    %c0_5 = arith.constant 0 : index
    %5 = vector.load %arg3[%c0_4, %c0_5] : memref<288x64xbf16, #tpu.memory_space<vmem>>, vector<288x64xbf16>
    %cst = arith.constant dense<0.000000e+00> : vector<64x64xf32>
    %6 = tpu.matmul %4, %5, %cst {dimension_numbers = #tpu.dot_dimension_numbers<[1], [0], [0], [1], [0, 0, 1, 1], [], []>} : vector<64x288xbf16>, vector<288x64xbf16>, vector<64x64xf32> -> vector<64x64xf32>
    %7 = arith.addf %3, %6 : vector<64x64xf32>
    %c0_6 = arith.constant 0 : index
    %c0_7 = arith.constant 0 : index
    %8 = vector.load %arg7[%c0_6, %c0_7] : memref<64x64xf32, #tpu.memory_space<vmem>>, vector<64x64xf32>
    tpu.vector_store %arg7[%c0_6, %c0_7], %7 {strides = array<i32>} : memref<64x64xf32, #tpu.memory_space<vmem>>, vector<64x64xf32>,
    %c0_i32_8 = arith.constant 0 : i32
    %9 = arith.cmpi eq, %arg1, %c0_i32_8 : i32
    %10 = arith.extui %9 : i1 to i32
    %c0_i32_9 = arith.constant 0 : i32
    %11 = arith.cmpi ne, %10, %c0_i32_9 : i32
    scf.if %11 {
      %c0_10 = arith.constant 0 : index
      %c0_11 = arith.constant 0 : index
      %12 = vector.load %arg7[%c0_10, %c0_11] : memref<64x64xf32, #tpu.memory_space<vmem>>, vector<64x64xf32>
      %cst_12 = arith.constant dense<0.000000e+00> : vector<64xf32>
      %13 = vector.multi_reduction <add>, %12, %cst_12 [0] : vector<64x64xf32> to vector<64xf32>
      %14 = vector.shape_cast %13 : vector<64xf32> to vector<1x64xf32>
      %15 = vector.shape_cast %14 : vector<1x64xf32> to vector<1x1x64xf32>
      %c0_13 = arith.constant 0 : index
      %c0_14 = arith.constant 0 : index
      %c0_15 = arith.constant 0 : index
      %16 = vector.load %arg5[%c0_13, %c0_14, %c0_15] : memref<1x1x64xf32, #tpu.memory_space<vmem>>, vector<1x1x64xf32>
      tpu.vector_store %arg5[%c0_13, %c0_14, %c0_15], %15 {strides = array<i32>} : memref<1x1x64xf32, #tpu.memory_space<vmem>>, vector<1x1x64xf32>,
      %17 = arith.mulf %12, %12 : vector<64x64xf32>
      %cst_16 = arith.constant dense<0.000000e+00> : vector<64xf32>
      %18 = vector.multi_reduction <add>, %17, %cst_16 [0] : vector<64x64xf32> to vector<64xf32>
      %19 = vector.shape_cast %18 : vector<64xf32> to vector<1x64xf32>
      %20 = vector.shape_cast %19 : vector<1x64xf32> to vector<1x1x64xf32>
      %c0_17 = arith.constant 0 : index
      %c0_18 = arith.constant 0 : index
      %c0_19 = arith.constant 0 : index
      %21 = vector.load %arg6[%c0_17, %c0_18, %c0_19] : memref<1x1x64xf32, #tpu.memory_space<vmem>>, vector<1x1x64xf32>
      tpu.vector_store %arg6[%c0_17, %c0_18, %c0_19], %20 {strides = array<i32>} : memref<1x1x64xf32, #tpu.memory_space<vmem>>, vector<1x1x64xf32>,
      %22 = arith.truncf %12 : vector<64x64xf32> to vector<64x64xbf16>
      %c0_20 = arith.constant 0 : index
      %c0_21 = arith.constant 0 : index
      %23 = vector.load %arg4[%c0_20, %c0_21] : memref<64x64xbf16, #tpu.memory_space<vmem>>, vector<64x64xbf16>
      tpu.vector_store %arg4[%c0_20, %c0_21], %22 {strides = array<i32>} : memref<64x64xbf16, #tpu.memory_space<vmem>>, vector<64x64xbf16>,
    } else {
    }
    return
  }
  func.func @transform_0(%arg0: i32, %arg1: i32) -> (i32, i32) {
    %c0_i32 = arith.constant 0 : i32
    return %arg0, %arg1 : i32, i32
  }
  func.func @transform_1(%arg0: i32, %arg1: i32) -> (i32, i32) {
    %c0_i32 = arith.constant 0 : i32
    %c0_i32_0 = arith.constant 0 : i32
    return %arg1, %c0_i32 : i32, i32
  }
  func.func @transform_2(%arg0: i32, %arg1: i32) -> (i32, i32) {
    %c0_i32 = arith.constant 0 : i32
    %c0_i32_0 = arith.constant 0 : i32
    return %arg0, %c0_i32 : i32, i32
  }
  func.func @transform_3(%arg0: i32, %arg1: i32) -> (i32, i32, i32) {
    %c0_i32 = arith.constant 0 : i32
    %c0_i32_0 = arith.constant 0 : i32
    %c0_i32_1 = arith.constant 0 : i32
    return %arg0, %c0_i32, %c0_i32_0 : i32, i32, i32
  }
  func.func @transform_4(%arg0: i32, %arg1: i32) -> (i32, i32, i32) {
    %c0_i32 = arith.constant 0 : i32
    %c0_i32_0 = arith.constant 0 : i32
    %c0_i32_1 = arith.constant 0 : i32
    return %arg0, %c0_i32, %c0_i32_0 : i32, i32, i32
  }
}

module attributes {stable_mosaic.version = 11 : i64} {
  func.func @_bn_relu_kernel(%arg0: i32, %arg1: memref<32x128xbf16, #tpu.memory_space<vmem>>, %arg2: memref<1x128xf32, #tpu.memory_space<vmem>>, %arg3: memref<1x128xf32, #tpu.memory_space<vmem>>, %arg4: memref<32x128xbf16, #tpu.memory_space<vmem>>) attributes {dimension_semantics = [#tpu.dimension_semantics<parallel>], iteration_bounds = array<i64: 2>, scalar_prefetch = 0 : i64, scratch_operands = 0 : i64, tpu.core_type = #tpu.core_type<tc>, window_params = [{transform_indices = @transform_0, window_bounds = array<i64: 32, 128>}, {pipeline_mode = #tpu.pipeline_mode<synchronous>, transform_indices = @transform_1, window_bounds = array<i64: 1, 128>}, {pipeline_mode = #tpu.pipeline_mode<synchronous>, transform_indices = @transform_2, window_bounds = array<i64: 1, 128>}, {transform_indices = @transform_3, window_bounds = array<i64: 32, 128>}]} {
    %c0 = arith.constant 0 : index
    %c0_0 = arith.constant 0 : index
    %0 = vector.load %arg1[%c0, %c0_0] : memref<32x128xbf16, #tpu.memory_space<vmem>>, vector<32x128xbf16>
    %1 = arith.extf %0 : vector<32x128xbf16> to vector<32x128xf32>
    %c0_1 = arith.constant 0 : index
    %c0_2 = arith.constant 0 : index
    %2 = vector.load %arg2[%c0_1, %c0_2] : memref<1x128xf32, #tpu.memory_space<vmem>>, vector<1x128xf32>
    %3 = vector.broadcast %2 : vector<1x128xf32> to vector<32x128xf32>
    %4 = arith.mulf %1, %3 : vector<32x128xf32>
    %c0_3 = arith.constant 0 : index
    %c0_4 = arith.constant 0 : index
    %5 = vector.load %arg3[%c0_3, %c0_4] : memref<1x128xf32, #tpu.memory_space<vmem>>, vector<1x128xf32>
    %6 = vector.broadcast %5 : vector<1x128xf32> to vector<32x128xf32>
    %7 = arith.addf %4, %6 : vector<32x128xf32>
    %cst = arith.constant 0.000000e+00 : f32
    %8 = vector.broadcast %cst : f32 to vector<32x128xf32>
    %9 = arith.maximumf %7, %8 : vector<32x128xf32>
    %10 = arith.truncf %9 : vector<32x128xf32> to vector<32x128xbf16>
    %c0_5 = arith.constant 0 : index
    %c0_6 = arith.constant 0 : index
    %11 = vector.load %arg4[%c0_5, %c0_6] : memref<32x128xbf16, #tpu.memory_space<vmem>>, vector<32x128xbf16>
    tpu.vector_store %arg4[%c0_5, %c0_6], %10 {strides = array<i32>} : memref<32x128xbf16, #tpu.memory_space<vmem>>, vector<32x128xbf16>,
    return
  }
  func.func @transform_0(%arg0: i32) -> (i32, i32) {
    %c0_i32 = arith.constant 0 : i32
    %c0_i32_0 = arith.constant 0 : i32
    return %arg0, %c0_i32 : i32, i32
  }
  func.func @transform_1(%arg0: i32) -> (i32, i32) {
    %c0_i32 = arith.constant 0 : i32
    %c0_i32_0 = arith.constant 0 : i32
    %c0_i32_1 = arith.constant 0 : i32
    return %c0_i32, %c0_i32_0 : i32, i32
  }
  func.func @transform_2(%arg0: i32) -> (i32, i32) {
    %c0_i32 = arith.constant 0 : i32
    %c0_i32_0 = arith.constant 0 : i32
    %c0_i32_1 = arith.constant 0 : i32
    return %c0_i32, %c0_i32_0 : i32, i32
  }
  func.func @transform_3(%arg0: i32) -> (i32, i32) {
    %c0_i32 = arith.constant 0 : i32
    %c0_i32_0 = arith.constant 0 : i32
    return %arg0, %c0_i32 : i32, i32
  }
}

module attributes {stable_mosaic.version = 11 : i64} {
  func.func @kernel(%arg0: i32, %arg1: i32, %arg2: memref<256x144xbf16, #tpu.memory_space<vmem>>, %arg3: memref<144x32xbf16, #tpu.memory_space<vmem>>, %arg4: memref<256x32xbf16, #tpu.memory_space<vmem>>, %arg5: memref<1x1x32xf32, #tpu.memory_space<vmem>>, %arg6: memref<1x1x32xf32, #tpu.memory_space<vmem>>, %arg7: memref<256x32xf32, #tpu.memory_space<vmem>>) attributes {dimension_semantics = [#tpu.dimension_semantics<parallel>, #tpu.dimension_semantics<arbitrary>], iteration_bounds = array<i64: 2, 1>, scalar_prefetch = 0 : i64, scratch_operands = 1 : i64, tpu.core_type = #tpu.core_type<tc>, window_params = [{transform_indices = @transform_0, window_bounds = array<i64: 256, 144>}, {transform_indices = @transform_1, window_bounds = array<i64: 144, 32>}, {transform_indices = @transform_2, window_bounds = array<i64: 256, 32>}, {transform_indices = @transform_3, window_bounds = array<i64: 1, 1, 32>}, {transform_indices = @transform_4, window_bounds = array<i64: 1, 1, 32>}]} {
    %c0_i32 = arith.constant 0 : i32
    %0 = arith.cmpi eq, %arg1, %c0_i32 : i32
    %1 = arith.extui %0 : i1 to i32
    %c0_i32_0 = arith.constant 0 : i32
    %2 = arith.cmpi ne, %1, %c0_i32_0 : i32
    scf.if %2 {
      %cst_10 = arith.constant 0.000000e+00 : f32
      %12 = vector.broadcast %cst_10 : f32 to vector<256x32xf32>
      %c0_11 = arith.constant 0 : index
      %c0_12 = arith.constant 0 : index
      %13 = vector.load %arg7[%c0_11, %c0_12] : memref<256x32xf32, #tpu.memory_space<vmem>>, vector<256x32xf32>
      tpu.vector_store %arg7[%c0_11, %c0_12], %12 {strides = array<i32>} : memref<256x32xf32, #tpu.memory_space<vmem>>, vector<256x32xf32>,
    } else {
    }
    %c0 = arith.constant 0 : index
    %c0_1 = arith.constant 0 : index
    %3 = vector.load %arg7[%c0, %c0_1] : memref<256x32xf32, #tpu.memory_space<vmem>>, vector<256x32xf32>
    %c0_2 = arith.constant 0 : index
    %c0_3 = arith.constant 0 : index
    %4 = vector.load %arg2[%c0_2, %c0_3] : memref<256x144xbf16, #tpu.memory_space<vmem>>, vector<256x144xbf16>
    %c0_4 = arith.constant 0 : index
    %c0_5 = arith.constant 0 : index
    %5 = vector.load %arg3[%c0_4, %c0_5] : memref<144x32xbf16, #tpu.memory_space<vmem>>, vector<144x32xbf16>
    %cst = arith.constant dense<0.000000e+00> : vector<256x32xf32>
    %6 = tpu.matmul %4, %5, %cst {dimension_numbers = #tpu.dot_dimension_numbers<[1], [0], [0], [1], [0, 0, 1, 1], [], []>} : vector<256x144xbf16>, vector<144x32xbf16>, vector<256x32xf32> -> vector<256x32xf32>
    %7 = arith.addf %3, %6 : vector<256x32xf32>
    %c0_6 = arith.constant 0 : index
    %c0_7 = arith.constant 0 : index
    %8 = vector.load %arg7[%c0_6, %c0_7] : memref<256x32xf32, #tpu.memory_space<vmem>>, vector<256x32xf32>
    tpu.vector_store %arg7[%c0_6, %c0_7], %7 {strides = array<i32>} : memref<256x32xf32, #tpu.memory_space<vmem>>, vector<256x32xf32>,
    %c0_i32_8 = arith.constant 0 : i32
    %9 = arith.cmpi eq, %arg1, %c0_i32_8 : i32
    %10 = arith.extui %9 : i1 to i32
    %c0_i32_9 = arith.constant 0 : i32
    %11 = arith.cmpi ne, %10, %c0_i32_9 : i32
    scf.if %11 {
      %c0_10 = arith.constant 0 : index
      %c0_11 = arith.constant 0 : index
      %12 = vector.load %arg7[%c0_10, %c0_11] : memref<256x32xf32, #tpu.memory_space<vmem>>, vector<256x32xf32>
      %cst_12 = arith.constant dense<0.000000e+00> : vector<32xf32>
      %13 = vector.multi_reduction <add>, %12, %cst_12 [0] : vector<256x32xf32> to vector<32xf32>
      %14 = vector.shape_cast %13 : vector<32xf32> to vector<1x32xf32>
      %15 = vector.shape_cast %14 : vector<1x32xf32> to vector<1x1x32xf32>
      %c0_13 = arith.constant 0 : index
      %c0_14 = arith.constant 0 : index
      %c0_15 = arith.constant 0 : index
      %16 = vector.load %arg5[%c0_13, %c0_14, %c0_15] : memref<1x1x32xf32, #tpu.memory_space<vmem>>, vector<1x1x32xf32>
      tpu.vector_store %arg5[%c0_13, %c0_14, %c0_15], %15 {strides = array<i32>} : memref<1x1x32xf32, #tpu.memory_space<vmem>>, vector<1x1x32xf32>,
      %17 = arith.mulf %12, %12 : vector<256x32xf32>
      %cst_16 = arith.constant dense<0.000000e+00> : vector<32xf32>
      %18 = vector.multi_reduction <add>, %17, %cst_16 [0] : vector<256x32xf32> to vector<32xf32>
      %19 = vector.shape_cast %18 : vector<32xf32> to vector<1x32xf32>
      %20 = vector.shape_cast %19 : vector<1x32xf32> to vector<1x1x32xf32>
      %c0_17 = arith.constant 0 : index
      %c0_18 = arith.constant 0 : index
      %c0_19 = arith.constant 0 : index
      %21 = vector.load %arg6[%c0_17, %c0_18, %c0_19] : memref<1x1x32xf32, #tpu.memory_space<vmem>>, vector<1x1x32xf32>
      tpu.vector_store %arg6[%c0_17, %c0_18, %c0_19], %20 {strides = array<i32>} : memref<1x1x32xf32, #tpu.memory_space<vmem>>, vector<1x1x32xf32>,
      %22 = arith.truncf %12 : vector<256x32xf32> to vector<256x32xbf16>
      %c0_20 = arith.constant 0 : index
      %c0_21 = arith.constant 0 : index
      %23 = vector.load %arg4[%c0_20, %c0_21] : memref<256x32xbf16, #tpu.memory_space<vmem>>, vector<256x32xbf16>
      tpu.vector_store %arg4[%c0_20, %c0_21], %22 {strides = array<i32>} : memref<256x32xbf16, #tpu.memory_space<vmem>>, vector<256x32xbf16>,
    } else {
    }
    return
  }
  func.func @transform_0(%arg0: i32, %arg1: i32) -> (i32, i32) {
    %c0_i32 = arith.constant 0 : i32
    return %arg0, %arg1 : i32, i32
  }
  func.func @transform_1(%arg0: i32, %arg1: i32) -> (i32, i32) {
    %c0_i32 = arith.constant 0 : i32
    %c0_i32_0 = arith.constant 0 : i32
    return %arg1, %c0_i32 : i32, i32
  }
  func.func @transform_2(%arg0: i32, %arg1: i32) -> (i32, i32) {
    %c0_i32 = arith.constant 0 : i32
    %c0_i32_0 = arith.constant 0 : i32
    return %arg0, %c0_i32 : i32, i32
  }
  func.func @transform_3(%arg0: i32, %arg1: i32) -> (i32, i32, i32) {
    %c0_i32 = arith.constant 0 : i32
    %c0_i32_0 = arith.constant 0 : i32
    %c0_i32_1 = arith.constant 0 : i32
    return %arg0, %c0_i32, %c0_i32_0 : i32, i32, i32
  }
  func.func @transform_4(%arg0: i32, %arg1: i32) -> (i32, i32, i32) {
    %c0_i32 = arith.constant 0 : i32
    %c0_i32_0 = arith.constant 0 : i32
    %c0_i32_1 = arith.constant 0 : i32
    return %arg0, %c0_i32, %c0_i32_0 : i32, i32, i32
  }
}

module attributes {stable_mosaic.version = 11 : i64} {
  func.func @_bn_relu_kernel(%arg0: i32, %arg1: memref<64x128xbf16, #tpu.memory_space<vmem>>, %arg2: memref<1x128xf32, #tpu.memory_space<vmem>>, %arg3: memref<1x128xf32, #tpu.memory_space<vmem>>, %arg4: memref<64x128xbf16, #tpu.memory_space<vmem>>) attributes {dimension_semantics = [#tpu.dimension_semantics<parallel>], iteration_bounds = array<i64: 2>, scalar_prefetch = 0 : i64, scratch_operands = 0 : i64, tpu.core_type = #tpu.core_type<tc>, window_params = [{transform_indices = @transform_0, window_bounds = array<i64: 64, 128>}, {pipeline_mode = #tpu.pipeline_mode<synchronous>, transform_indices = @transform_1, window_bounds = array<i64: 1, 128>}, {pipeline_mode = #tpu.pipeline_mode<synchronous>, transform_indices = @transform_2, window_bounds = array<i64: 1, 128>}, {transform_indices = @transform_3, window_bounds = array<i64: 64, 128>}]} {
    %c0 = arith.constant 0 : index
    %c0_0 = arith.constant 0 : index
    %0 = vector.load %arg1[%c0, %c0_0] : memref<64x128xbf16, #tpu.memory_space<vmem>>, vector<64x128xbf16>
    %1 = arith.extf %0 : vector<64x128xbf16> to vector<64x128xf32>
    %c0_1 = arith.constant 0 : index
    %c0_2 = arith.constant 0 : index
    %2 = vector.load %arg2[%c0_1, %c0_2] : memref<1x128xf32, #tpu.memory_space<vmem>>, vector<1x128xf32>
    %3 = vector.broadcast %2 : vector<1x128xf32> to vector<64x128xf32>
    %4 = arith.mulf %1, %3 : vector<64x128xf32>
    %c0_3 = arith.constant 0 : index
    %c0_4 = arith.constant 0 : index
    %5 = vector.load %arg3[%c0_3, %c0_4] : memref<1x128xf32, #tpu.memory_space<vmem>>, vector<1x128xf32>
    %6 = vector.broadcast %5 : vector<1x128xf32> to vector<64x128xf32>
    %7 = arith.addf %4, %6 : vector<64x128xf32>
    %cst = arith.constant 0.000000e+00 : f32
    %8 = vector.broadcast %cst : f32 to vector<64x128xf32>
    %9 = arith.maximumf %7, %8 : vector<64x128xf32>
    %10 = arith.truncf %9 : vector<64x128xf32> to vector<64x128xbf16>
    %c0_5 = arith.constant 0 : index
    %c0_6 = arith.constant 0 : index
    %11 = vector.load %arg4[%c0_5, %c0_6] : memref<64x128xbf16, #tpu.memory_space<vmem>>, vector<64x128xbf16>
    tpu.vector_store %arg4[%c0_5, %c0_6], %10 {strides = array<i32>} : memref<64x128xbf16, #tpu.memory_space<vmem>>, vector<64x128xbf16>,
    return
  }
  func.func @transform_0(%arg0: i32) -> (i32, i32) {
    %c0_i32 = arith.constant 0 : i32
    %c0_i32_0 = arith.constant 0 : i32
    return %arg0, %c0_i32 : i32, i32
  }
  func.func @transform_1(%arg0: i32) -> (i32, i32) {
    %c0_i32 = arith.constant 0 : i32
    %c0_i32_0 = arith.constant 0 : i32
    %c0_i32_1 = arith.constant 0 : i32
    return %c0_i32, %c0_i32_0 : i32, i32
  }
  func.func @transform_2(%arg0: i32) -> (i32, i32) {
    %c0_i32 = arith.constant 0 : i32
    %c0_i32_0 = arith.constant 0 : i32
    %c0_i32_1 = arith.constant 0 : i32
    return %c0_i32, %c0_i32_0 : i32, i32
  }
  func.func @transform_3(%arg0: i32) -> (i32, i32) {
    %c0_i32 = arith.constant 0 : i32
    %c0_i32_0 = arith.constant 0 : i32
    return %arg0, %c0_i32 : i32, i32
  }
}

module attributes {stable_mosaic.version = 11 : i64} {
  func.func @kernel(%arg0: i32, %arg1: i32, %arg2: memref<1024x72xbf16, #tpu.memory_space<vmem>>, %arg3: memref<72x12xbf16, #tpu.memory_space<vmem>>, %arg4: memref<1024x12xf32, #tpu.memory_space<vmem>>, %arg5: memref<1024x12xf32, #tpu.memory_space<vmem>>) attributes {dimension_semantics = [#tpu.dimension_semantics<parallel>, #tpu.dimension_semantics<arbitrary>], iteration_bounds = array<i64: 2, 1>, scalar_prefetch = 0 : i64, scratch_operands = 1 : i64, tpu.core_type = #tpu.core_type<tc>, window_params = [{transform_indices = @transform_0, window_bounds = array<i64: 1024, 72>}, {transform_indices = @transform_1, window_bounds = array<i64: 72, 12>}, {transform_indices = @transform_2, window_bounds = array<i64: 1024, 12>}]} {
    %c0_i32 = arith.constant 0 : i32
    %0 = arith.cmpi eq, %arg1, %c0_i32 : i32
    %1 = arith.extui %0 : i1 to i32
    %c0_i32_0 = arith.constant 0 : i32
    %2 = arith.cmpi ne, %1, %c0_i32_0 : i32
    scf.if %2 {
      %cst_10 = arith.constant 0.000000e+00 : f32
      %12 = vector.broadcast %cst_10 : f32 to vector<1024x12xf32>
      %c0_11 = arith.constant 0 : index
      %c0_12 = arith.constant 0 : index
      %13 = vector.load %arg5[%c0_11, %c0_12] : memref<1024x12xf32, #tpu.memory_space<vmem>>, vector<1024x12xf32>
      tpu.vector_store %arg5[%c0_11, %c0_12], %12 {strides = array<i32>} : memref<1024x12xf32, #tpu.memory_space<vmem>>, vector<1024x12xf32>,
    } else {
    }
    %c0 = arith.constant 0 : index
    %c0_1 = arith.constant 0 : index
    %3 = vector.load %arg5[%c0, %c0_1] : memref<1024x12xf32, #tpu.memory_space<vmem>>, vector<1024x12xf32>
    %c0_2 = arith.constant 0 : index
    %c0_3 = arith.constant 0 : index
    %4 = vector.load %arg2[%c0_2, %c0_3] : memref<1024x72xbf16, #tpu.memory_space<vmem>>, vector<1024x72xbf16>
    %c0_4 = arith.constant 0 : index
    %c0_5 = arith.constant 0 : index
    %5 = vector.load %arg3[%c0_4, %c0_5] : memref<72x12xbf16, #tpu.memory_space<vmem>>, vector<72x12xbf16>
    %cst = arith.constant dense<0.000000e+00> : vector<1024x12xf32>
    %6 = tpu.matmul %4, %5, %cst {dimension_numbers = #tpu.dot_dimension_numbers<[1], [0], [0], [1], [0, 0, 1, 1], [], []>} : vector<1024x72xbf16>, vector<72x12xbf16>, vector<1024x12xf32> -> vector<1024x12xf32>
    %7 = arith.addf %3, %6 : vector<1024x12xf32>
    %c0_6 = arith.constant 0 : index
    %c0_7 = arith.constant 0 : index
    %8 = vector.load %arg5[%c0_6, %c0_7] : memref<1024x12xf32, #tpu.memory_space<vmem>>, vector<1024x12xf32>
    tpu.vector_store %arg5[%c0_6, %c0_7], %7 {strides = array<i32>} : memref<1024x12xf32, #tpu.memory_space<vmem>>, vector<1024x12xf32>,
    %c0_i32_8 = arith.constant 0 : i32
    %9 = arith.cmpi eq, %arg1, %c0_i32_8 : i32
    %10 = arith.extui %9 : i1 to i32
    %c0_i32_9 = arith.constant 0 : i32
    %11 = arith.cmpi ne, %10, %c0_i32_9 : i32
    scf.if %11 {
      %c0_10 = arith.constant 0 : index
      %c0_11 = arith.constant 0 : index
      %12 = vector.load %arg5[%c0_10, %c0_11] : memref<1024x12xf32, #tpu.memory_space<vmem>>, vector<1024x12xf32>
      %13 = math.tanh %12 : vector<1024x12xf32>
      %c0_12 = arith.constant 0 : index
      %c0_13 = arith.constant 0 : index
      %14 = vector.load %arg4[%c0_12, %c0_13] : memref<1024x12xf32, #tpu.memory_space<vmem>>, vector<1024x12xf32>
      tpu.vector_store %arg4[%c0_12, %c0_13], %13 {strides = array<i32>} : memref<1024x12xf32, #tpu.memory_space<vmem>>, vector<1024x12xf32>,
    } else {
    }
    return
  }
  func.func @transform_0(%arg0: i32, %arg1: i32) -> (i32, i32) {
    %c0_i32 = arith.constant 0 : i32
    return %arg0, %arg1 : i32, i32
  }
  func.func @transform_1(%arg0: i32, %arg1: i32) -> (i32, i32) {
    %c0_i32 = arith.constant 0 : i32
    %c0_i32_0 = arith.constant 0 : i32
    return %arg1, %c0_i32 : i32, i32
  }
  func.func @transform_2(%arg0: i32, %arg1: i32) -> (i32, i32) {
    %c0_i32 = arith.constant 0 : i32
    %c0_i32_0 = arith.constant 0 : i32
    return %arg0, %c0_i32 : i32, i32
  }
}

</mosaic_0001>

<bundles_post_ra>
// kernel: tile.43
= control target key start
LH: loop header
LB: loop body
LE: loop exit
PB: predicated region body
PF: predicated region fallthrough
CT: control target
= control target key end

     0   :  { %s28_s0 = inlined_call_operand.vmem [shape: f32[64], index: 0, kind: input, shape index: {}]   ;;  %s29_s1 = inlined_call_operand.vmem [shape: f32[16,64], index: 1, kind: output, shape index: {}]  }
   0x1   :  { %v4_v0 = vld [vmem:[%s28_s0] ss:$0 sm:$0xff] }
   0x2   :  { %5 = vst [vmem:[%s29_s1] sm:$0xff] %v4_v0  ;;  %8 = vst [vmem:[%s29_s1 + $0x8] sm:$0xff] %v4_v0 }

// kernel: tile.44
= control target key start
LH: loop header
LB: loop body
LE: loop exit
PB: predicated region body
PF: predicated region fallthrough
CT: control target
= control target key end

     0   :  { %vm3_vm0 = vcmask 523264   ;;  %vm10_vm1 = vcmask 1048064   ;;  %s116_s0 = inlined_call_operand.vmem [shape: f32[16,64], index: 0, kind: input, shape index: {}]   ;;  %s117_s1 = inlined_call_operand.vmem [shape: f32[1,1024], index: 1, kind: output, shape index: {}]  }
   0x1   :  { %v66_v0 = vld [vmem:[%s116_s0 + $0x1] ss:$2 sm:$0xff]   ;;  %v2_v1 = vld [vmem:[%s116_s0] ss:$2 sm:$0xff]   ;;  %s75_s0 = smov 64  }
   0x2   :  { %8 = vrot.lane.b32.xlu0 %v66_v0, %s75_s0  ;;  %4 = vst.msk [vmem:[#allocation0] ss:$8 sm:$0xf] %vm3_vm0, %v2_v1   ;;  %5 = vst.msk [vmem:[#allocation0] ss:$8 sm:$0xf0] %vm3_vm0, %v2_v1  }
  0x74   :  { %v9_v2 = vpop.permute.xlu0 %8  }
  0x75   :  { %11 = vst.msk [vmem:[#allocation0] ss:$8 sm:$0xf] %vm10_vm1, %v9_v2   ;;  %12 = vst.msk [vmem:[#allocation0] ss:$8 sm:$0xf0] %vm10_vm1, %v9_v2  }
  0x7c   :  { %v16_v3 = vld [vmem:[#allocation0] sm:$0x1]  ;;  %v20_v4 = vld [vmem:[#allocation0 + $0x8] sm:$0x1]  ;;  %v25_v5 = vld [vmem:[#allocation0 + $0x10] sm:$0x1] }
  0x7d   :  { %18 = vst [vmem:[%s117_s1] sm:$0x1] %v16_v3  ;;  %67 = vst [vmem:[%s117_s1 + $0x1] sm:$0x1] %v20_v4  ;;  %v31_v6 = vld [vmem:[#allocation0 + $0x18] sm:$0x1] }
  0x7e   :  { %68 = vst [vmem:[%s117_s1 + $0x2] sm:$0x1] %v25_v5  ;;  %v37_v7 = vld [vmem:[#allocation0 + $0x20] sm:$0x1]  ;;  %v43_v8 = vld [vmem:[#allocation0 + $0x28] sm:$0x1] }
  0x7f   :  { %69 = vst [vmem:[%s117_s1 + $0x3] sm:$0x1] %v31_v6  ;;  %70 = vst [vmem:[%s117_s1 + $0x4] sm:$0x1] %v37_v7  ;;  %v49_v9 = vld [vmem:[#allocation0 + $0x30] sm:$0x1] }
  0x80   :  { %71 = vst [vmem:[%s117_s1 + $0x5] sm:$0x1] %v43_v8  ;;  %v55_v10 = vld [vmem:[#allocation0 + $0x38] sm:$0x1]  ;;  %72 = vst [vmem:[%s117_s1 + $0x6] sm:$0x1] %v49_v9 }
  0x81   :  { %73 = vst [vmem:[%s117_s1 + $0x7] sm:$0x1] %v55_v10 }

// kernel: conv_generator_forward.9
= control target key start
LH: loop header
LB: loop body
LE: loop exit
PB: predicated region body
PF: predicated region fallthrough
CT: control target
= control target key end

     0   :  { %10 = vsyncpa [#allocation4], 0  ;;  %s756_s15 = smov [#allocation3]   ;;  %s922_s0 = inlined_call_operand.vmem [shape: bf16[2,16], index: 0, kind: input, shape index: {}]   ;;  %s923_s1 = inlined_call_operand.hbm [shape: bf16[16,1024], index: 1, kind: input, shape index: {}]   ;;  %s924_s2 = inlined_call_operand.vmem [shape: bf16[2,1024], index: 2, kind: output, shape index: {0}]   ;;  %s925_s3 = inlined_call_operand.vmem [shape: f32[1,1,1024], index: 3, kind: output, shape index: {1}]   ;;  %s926_s4 = inlined_call_operand.vmem [shape: f32[1,1,1024], index: 4, kind: output, shape index: {2}]  }
   0x1   :  { %s18_s16 = sshll.u32 %s756_s15, 4  ;;  %s732_s19 = scalar_lea.hbm %s923_s1, 1024  ;;  %s19_s16 = int_to_ptr.vmem [resolvable:$true] %s18_s16 }
   0x2   :  { %p733_p0 = scmp.ne.s32.totalorder %s923_s1, %s732_s19  ;;  %p736_p1 = scmp.lt.u32.totalorder %s732_s19, %s923_s1 }
   0x4   :  { %p738_p2 = pnand %p736_p1, %p733_p0 }
   0x6   :  { %741 = shalt.err (!%p738_p2)
}
   0x7   :  { %s742_s24 = scalar_lea.vmem %s19_s16, 1024  ;;  %p747_p4 = scmp.lt.s32.totalorder %s19_s16, %s19_s16 }
   0x8   :  { %p743_p3 = scmp.ne.s32.totalorder %s19_s16, %s742_s24  ;;  %p748_p5 = scmp.lt.s32.totalorder %s742_s24, %s742_s24 }
   0xa   :  { %p749_p6 = por %p748_p5, %p747_p4 }
   0xc   :  { %p750_p7 = pnand %p749_p6, %p743_p3 }
   0xe   :  { %753 = shalt.err (!%p750_p7)
}
   0xf   :  { %s757_s25 = smov 512   ;;  %s758_s26 = smov 32  }
  0x10   :  { %24 = dma.hbm_to_vmem [thread:$0]  %s923_s1, 1024, %s19_s16, [#allocation4], %s757_s25, %s757_s25, %s758_s26  }
  0x11   :  { %754 = dma.done.wait [#allocation4], 1024  }
  0x12   :  { %755 = vsyncadd [#allocation4], 4294966272  ;;  %v759_v0 = vmov 0   ;;  %v38_v1 = vld [vmem:[#allocation3] sm:$0xff]  ;;  %v39_v3 = vld [vmem:[#allocation3 + $0x8] sm:$0xff]  ;;  %vm86_vm0 = vcmask 130048   ;;  %v267_v20 = vlaneseq }
  0x13   :  { %122 = vmatprep.mubr.bf16.mxu0 %v759_v0  ;;  %163 = vmatprep.mubr.bf16.mxu1 %v759_v0  ;;  %v42_v2 = vld [vmem:[#allocation3 + $0x20] sm:$0xff]  ;;  %v43_v5 = vld [vmem:[#allocation3 + $0x28] sm:$0xff]  ;;  %v40_v7 = vld [vmem:[#allocation3 + $0x10] sm:$0xff]  ;;  %v760_v18 = vmov 1983009808   ;;  %vm351_vm1 = vcmask 1041408  }
  0x14   :  { %v709_v4 = vcombine.high %v38_v1, %v42_v2  ;;  %v708_v6 = vcombine.low %v38_v1, %v42_v2  ;;  %v711_v8 = vcombine.high %v39_v3, %v43_v5  ;;  %v710_v9 = vcombine.low %v39_v3, %v43_v5  ;;  %v44_v10 = vld [vmem:[#allocation3 + $0x30] sm:$0xff]  ;;  %v41_v11 = vld [vmem:[#allocation3 + $0x18] sm:$0xff]  ;;  %v37_v15 = vld [vmem:[%s922_s0] sm:$0x1] }
  0x15   :  { %v45_v12 = vld [vmem:[#allocation3 + $0x38] sm:$0xff]  ;;  %v713_v13 = vcombine.high %v40_v7, %v44_v10  ;;  %v712_v16 = vcombine.low %v40_v7, %v44_v10  ;;  %v265_v19 = vunpack.c.l.s4 %v760_v18  ;;  %v268_v22 = vshrl.u32 %v267_v20, 7 }
  0x16   :  { %90 = vmatprep.subr.bf16.mxu0 %v709_v4  ;;  %v715_v14 = vcombine.high %v41_v11, %v45_v12  ;;  %131 = vmatprep.subr.bf16.mxu1 %v711_v8  ;;  %v714_v17 = vcombine.low %v41_v11, %v45_v12  ;;  %v761_v35 = vmov 1966171168  }
  0x17   :  { %91 = vmatpush1.bf16.msra.mxu0 %v708_v6  ;;  %132 = vmatpush1.bf16.msra.mxu1 %v710_v9  ;;  %v266_v21 = vunpack.c.0.s8 %v265_v19  ;;  %v421_v36 = vunpack.c.l.s4 %v761_v35 }
  0x18   :  { %172 = vmatprep.subr.bf16.mxu0 %v713_v13  ;;  %213 = vmatprep.subr.bf16.mxu1 %v715_v14 }
  0x19   :  { %v802_v24 = vsub.s32 %v266_v21, %v268_v22  ;;  %v422_v41 = vunpack.c.0.s8 %v421_v36 }
  0x1a   :  { %716 = vmatmul.mubr.msk.bf16.vlgmr.msra.gmra.mrb[0].mxu0 %vm86_vm0, %v37_v15  ;;  %717 = vmatmul.mubr.msk.bf16.vlgmr.msra.gmra.mrb[0].mxu1 %vm86_vm0, %v37_v15 }
  0x1b   :  { %173 = vmatpush1.bf16.msra.mxu0 %v712_v16  ;;  %214 = vmatpush1.bf16.msra.mxu1 %v714_v17  ;;  %v826_v61 = vsub.s32 %v422_v41, %v268_v22 }
  0x1c   :  { %204 = vmatprep.mubr.bf16.mxu0 %v759_v0  ;;  %245 = vmatprep.mubr.bf16.mxu1 %v759_v0 }
  0x22   :  { %718 = vmatmul.mubr.msk.bf16.vlgmr.msra.gmra.mrb[4].mxu0 %vm86_vm0, %v37_v15  ;;  %719 = vmatmul.mubr.msk.bf16.vlgmr.msra.gmra.mrb[4].mxu1 %vm86_vm0, %v37_v15 }
  0xed   :  { %v124_v23 = vpop.f32.mrb[0].mxu0  ;;  %v165_v25 = vpop.f32.mrb[0].mxu1 }
  0xee   :  { %v126_v26 = vpop.f32.mrb[1].mxu0  ;;  %v167_v28 = vpop.f32.mrb[1].mxu1 }
  0xef   :  { %v262_v27 = vcombine.low %v124_v23, %v126_v26  ;;  %v128_v29 = vpop.f32.mrb[2].mxu0  ;;  %v263_v30 = vcombine.low %v165_v25, %v167_v28  ;;  %v169_v31 = vpop.f32.mrb[2].mxu1 }
  0xf0   :  { %v129_v32 = vpop.f32.mrb[3].mxu0  ;;  %v170_v34 = vpop.f32.mrb[3].mxu1 }
  0xf1   :  { %v270_v33 = vrot.slane %v262_v27, %v802_v24  ;;  %v277_v37 = vrot.slane %v263_v30, %v802_v24 }
  0xf3   :  { %v278_v38 = vcombine.low %v270_v33, %v277_v37  ;;  %v724_v39 = vcombine.low %v277_v37, %v277_v37 }
  0xf5   :  { %v806_v40 = vpop.f32.mrb[4].mxu0  ;;  %v316_v42 = vrot.slane %v278_v38, %v802_v24  ;;  %v810_v43 = vrot.slane %v724_v39, %v802_v24  ;;  %v467_v44 = vmul.f32 %v278_v38, %v278_v38  ;;  %v812_v45 = vpop.f32.mrb[4].mxu1 }
  0xf6   :  { %v814_v46 = vpop.f32.mrb[5].mxu0  ;;  %v818_v48 = vpop.f32.mrb[5].mxu1 }
  0xf7   :  { %v279_v47 = vcombine.low %v806_v40, %v814_v46  ;;  %v210_v49 = vpop.f32.mrb[6].mxu0  ;;  %v324_v50 = vcombine.high %v316_v42, %v316_v42  ;;  %v325_v51 = vcombine.high %v810_v43, %v810_v43  ;;  %v352_v52 = vsel %vm351_vm1, %v316_v42, 0.0  ;;  %v251_v54 = vpop.f32.mrb[6].mxu1 }
  0xf8   :  { %v366_v53 = vsel %vm351_vm1, %v810_v43, 0.0  ;;  %v211_v55 = vpop.f32.mrb[7].mxu0  ;;  %v353_v56 = vrot.slane %v352_v52, 4  ;;  %v471_v58 = vcombine.high %v467_v44, %v467_v44  ;;  %v478_v59 = vrot.slane %v467_v44, %v802_v24  ;;  %v252_v60 = vpop.f32.mrb[7].mxu1 }
  0xf9   :  { %v367_v57 = vrot.slane %v366_v53, 4  ;;  %v359_v62 = vsel %vm351_vm1, %v324_v50, 0.0  ;;  %v373_v63 = vsel %vm351_vm1, %v325_v51, 0.0  ;;  %v720_v0 = vpack.c.bf16 %v324_v50, %v316_v42 }
  0xfa   :  { %v354_v1 = vadd.f32 %v353_v56, %v352_v52  ;;  %v360_v2 = vrot.slane %v359_v62, 4  ;;  %v374_v4 = vrot.slane %v373_v63, 4  ;;  %v485_v5 = vrot.slane %v471_v58, %v802_v24 }
  0xfb   :  { %v368_v3 = vadd.f32 %v367_v57, %v366_v53  ;;  %v486_v6 = vcombine.high %v478_v59, %v478_v59  ;;  %v513_v7 = vsel %vm351_vm1, %v478_v59, 0.0  ;;  %v721_v8 = vpack.c.bf16 %v325_v51, %v810_v43 }
  0xfc   :  { %v355_v9 = vrot.slane %v354_v1, 2  ;;  %v361_v10 = vadd.f32 %v360_v2, %v359_v62  ;;  %v375_v12 = vadd.f32 %v374_v4, %v373_v63  ;;  %v487_v13 = vcombine.high %v485_v5, %v485_v5 }
  0xfd   :  { %v369_v11 = vrot.slane %v368_v3, 2  ;;  %v514_v14 = vrot.slane %v513_v7, 4  ;;  %v520_v15 = vsel %vm351_vm1, %v486_v6, 0.0  ;;  %v527_v16 = vsel %vm351_vm1, %v485_v5, 0.0 }
  0xfe   :  { %v356_v17 = vadd.f32 %v355_v9, %v354_v1  ;;  %v362_v18 = vrot.slane %v361_v10, 2  ;;  %v376_v20 = vrot.slane %v375_v12, 2  ;;  %v521_v22 = vrot.slane %v520_v15, 4 }
  0xff   :  { %v370_v19 = vadd.f32 %v369_v11, %v368_v3  ;;  %v515_v21 = vadd.f32 %v514_v14, %v513_v7  ;;  %v528_v23 = vrot.slane %v527_v16, 4  ;;  %v534_v25 = vsel %vm351_vm1, %v487_v13, 0.0 }
 0x100   :  { %v357_v26 = vrot.slane %v356_v17, 1  ;;  %v363_v27 = vadd.f32 %v362_v18, %v361_v10  ;;  %v377_v29 = vadd.f32 %v376_v20, %v375_v12  ;;  %v522_v31 = vadd.f32 %v521_v22, %v520_v15 }
 0x101   :  { %v371_v28 = vrot.slane %v370_v19, 1  ;;  %v516_v30 = vrot.slane %v515_v21, 2  ;;  %v529_v32 = vadd.f32 %v528_v23, %v527_v16  ;;  %v535_v33 = vrot.slane %v534_v25, 4 }
 0x102   :  { %v364_v34 = vrot.slane %v363_v27, 1  ;;  %v378_v35 = vrot.slane %v377_v29, 1  ;;  %v837_v36 = vrot.slane %v720_v0, %v826_v61  ;;  %v358_v37 = vadd.f32 %v357_v26, %v356_v17 }
 0x103   :  { %v372_v38 = vadd.f32 %v371_v28, %v370_v19  ;;  %v523_v39 = vrot.slane %v522_v31, 2  ;;  %v536_v41 = vadd.f32 %v535_v33, %v534_v25  ;;  %v530_v44 = vrot.slane %v529_v32, 2 }
 0x104   :  { %v365_v42 = vadd.f32 %v364_v34, %v363_v27  ;;  %v379_v43 = vadd.f32 %v378_v35, %v377_v29  ;;  %v840_v49 = vrot.slane %v721_v8, %v826_v61  ;;  %v517_v50 = vadd.f32 %v516_v30, %v515_v21 }
 0x105   :  { %v537_v51 = vrot.slane %v536_v41, 2  ;;  %v287_v52 = vrot.slane %v279_v47, %v802_v24  ;;  %v280_v56 = vcombine.low %v812_v45, %v818_v48  ;;  %v524_v57 = vadd.f32 %v523_v39, %v522_v31 }
 0x106   :  { %v416_v53 = vcombine.low %v358_v37, %v365_v42  ;;  %v417_v54 = vcombine.low %v372_v38, %v379_v43  ;;  %v676_v55 = vcombine.low %v837_v36, %v840_v49  ;;  %v531_v60 = vadd.f32 %v530_v44, %v529_v32 }
 0x107   :  { %v294_v62 = vrot.slane %v280_v56, %v802_v24  ;;  %v518_v40 = vrot.slane %v517_v50, 1  ;;  %v538_v46 = vadd.f32 %v537_v51, %v536_v41  ;;  %v525_v1 = vrot.slane %v524_v57, 1 }
 0x108   :  { %v851_v58 = vrot.slane %v416_v53, %v826_v61  ;;  %v854_v59 = vrot.slane %v417_v54, %v826_v61  ;;  %v532_v2 = vrot.slane %v531_v60, 1 }
 0x109   :  { %v295_v63 = vcombine.low %v287_v52, %v294_v62  ;;  %v725_v0 = vcombine.low %v294_v62, %v294_v62  ;;  %v863_v4 = vadd.f32 %v518_v40, %v517_v50  ;;  %v539_v5 = vrot.slane %v538_v46, 1 }
 0x10a   :  { %v448_v47 = vcombine.low %v851_v58, %v854_v59  ;;  %v872_v10 = vadd.f32 %v525_v1, %v524_v57  ;;  %v874_v14 = vadd.f32 %v532_v2, %v531_v60 }
 0x10b   :  { %v333_v45 = vrot.slane %v295_v63, %v802_v24  ;;  %v861_v48 = vrot.slane %v725_v0, %v802_v24  ;;  %v468_v3 = vmul.f32 %v295_v63, %v295_v63  ;;  %v880_v18 = vadd.f32 %v539_v5, %v538_v46 }
 0x10d   :  { %v341_v6 = vcombine.high %v333_v45, %v333_v45  ;;  %v867_v7 = vcombine.high %v861_v48, %v861_v48  ;;  %v380_v8 = vsel %vm351_vm1, %v333_v45, 0.0  ;;  %v394_v9 = vsel %vm351_vm1, %v861_v48, 0.0 }
 0x10e   :  { %v381_v11 = vrot.slane %v380_v8, 4  ;;  %v395_v12 = vrot.slane %v394_v9, 4  ;;  %v488_v13 = vcombine.high %v468_v3, %v468_v3  ;;  %v495_v17 = vrot.slane %v468_v3, %v802_v24 }
 0x10f   :  { %v387_v15 = vsel %vm351_vm1, %v341_v6, 0.0  ;;  %v401_v16 = vsel %vm351_vm1, %v867_v7, 0.0  ;;  %v722_v30 = vpack.c.bf16 %v341_v6, %v333_v45  ;;  %v723_v5 = vpack.c.bf16 %v867_v7, %v861_v48 }
 0x110   :  { %v382_v19 = vadd.f32 %v381_v11, %v380_v8  ;;  %v388_v20 = vrot.slane %v387_v15, 4  ;;  %v396_v21 = vadd.f32 %v395_v12, %v394_v9  ;;  %v402_v22 = vrot.slane %v401_v16, 4 }
 0x111   :  { %v502_v23 = vrot.slane %v488_v13, %v802_v24  ;;  %v503_v25 = vcombine.high %v495_v17, %v495_v17  ;;  %v541_v26 = vsel %vm351_vm1, %v495_v17, 0.0  ;;  %v668_v6 = vrot.slane %v722_v30, %v826_v61 }
 0x112   :  { %v383_v27 = vrot.slane %v382_v19, 2  ;;  %v389_v28 = vadd.f32 %v388_v20, %v387_v15  ;;  %v397_v29 = vrot.slane %v396_v21, 2  ;;  %v403_v31 = vadd.f32 %v402_v22, %v401_v16 }
 0x113   :  { %v504_v32 = vcombine.high %v502_v23, %v502_v23  ;;  %v542_v33 = vrot.slane %v541_v26, 4  ;;  %v548_v34 = vsel %vm351_vm1, %v503_v25, 0.0  ;;  %v555_v24 = vsel %vm351_vm1, %v502_v23, 0.0 }
 0x114   :  { %v384_v35 = vadd.f32 %v383_v27, %v382_v19  ;;  %v390_v37 = vrot.slane %v389_v28, 2  ;;  %v398_v38 = vadd.f32 %v397_v29, %v396_v21  ;;  %v549_v39 = vrot.slane %v548_v34, 4 }
 0x115   :  { %v404_v41 = vrot.slane %v403_v31, 2  ;;  %v543_v42 = vadd.f32 %v542_v33, %v541_v26  ;;  %v562_v43 = vsel %vm351_vm1, %v504_v32, 0.0  ;;  %v556_v56 = vrot.slane %v555_v24, 4 }
 0x116   :  { %v385_v44 = vrot.slane %v384_v35, 1  ;;  %v391_v50 = vadd.f32 %v390_v37, %v389_v28  ;;  %v399_v51 = vrot.slane %v398_v38, 1  ;;  %v550_v52 = vadd.f32 %v549_v39, %v548_v34 }
 0x117   :  { %v405_v53 = vadd.f32 %v404_v41, %v403_v31  ;;  %v544_v54 = vrot.slane %v543_v42, 2  ;;  %v563_v57 = vrot.slane %v562_v43, 4  ;;  %v557_v1 = vadd.f32 %v556_v56, %v555_v24 }
 0x118   :  { %v386_v60 = vadd.f32 %v385_v44, %v384_v35  ;;  %v392_v62 = vrot.slane %v391_v50, 1  ;;  %v400_v40 = vadd.f32 %v399_v51, %v398_v38  ;;  %v551_v46 = vrot.slane %v550_v52, 2 }
 0x119   :  { %v406_v63 = vrot.slane %v405_v53, 1  ;;  %v545_v0 = vadd.f32 %v544_v54, %v543_v42  ;;  %v564_v2 = vadd.f32 %v563_v57, %v562_v43  ;;  %v558_v11 = vrot.slane %v557_v1, 2 }
 0x11a   :  { %v393_v45 = vadd.f32 %v392_v62, %v391_v50  ;;  %v552_v3 = vadd.f32 %v551_v46, %v550_v52  ;;  %v578_v13 = vcombine.low %v874_v14, %v880_v18  ;;  %v675_v17 = vrot.slane %v723_v5, %v826_v61 }
 0x11b   :  { %v407_v8 = vadd.f32 %v406_v63, %v405_v53  ;;  %v546_v9 = vrot.slane %v545_v0, 1  ;;  %v565_v12 = vrot.slane %v564_v2, 2  ;;  %v559_v20 = vadd.f32 %v558_v11, %v557_v1 }
 0x11c   :  { %v418_v15 = vcombine.low %v386_v60, %v393_v45  ;;  %v553_v16 = vrot.slane %v552_v3, 1  ;;  %v577_v22 = vcombine.low %v863_v4, %v872_v10  ;;  %v677_v23 = vcombine.low %v668_v6, %v675_v17 }
 0x11d   :  { %v419_v19 = vcombine.low %v400_v40, %v407_v8  ;;  %v566_v21 = vadd.f32 %v565_v12, %v564_v2  ;;  %v547_v26 = vadd.f32 %v546_v9, %v545_v0  ;;  %v560_v27 = vrot.slane %v559_v20, 1 }
 0x11e   :  { %v440_v48 = vrot.slane %v418_v15, %v826_v61  ;;  %v554_v7 = vadd.f32 %v553_v16, %v552_v3  ;;  %v594_v14 = vrot.slane %v578_v13, %v826_v61  ;;  %v684_v18 = vrot.slane %v676_v55, %v826_v61 }
 0x11f   :  { %v447_v25 = vrot.slane %v419_v19, %v826_v61  ;;  %v567_v28 = vrot.slane %v566_v21, 1  ;;  %v691_v29 = vrot.slane %v677_v23, %v826_v61  ;;  %v561_v4 = vadd.f32 %v560_v27, %v559_v20 }
 0x120   :  { %v579_v31 = vcombine.low %v547_v26, %v554_v7  ;;  %v456_v33 = vrot.slane %v448_v47, %v826_v61  ;;  %v587_v34 = vrot.slane %v577_v22, %v826_v61 }
 0x121   :  { %v449_v30 = vcombine.low %v440_v48, %v447_v25  ;;  %v568_v10 = vadd.f32 %v567_v28, %v566_v21  ;;  %v692_v32 = vcombine.low %v684_v18, %v691_v29 }
 0x122   :  { %v609_v36 = vcombine.low %v587_v34, %v594_v14  ;;  %v601_v55 = vrot.slane %v579_v31, %v826_v61 }
 0x123   :  { %v463_v35 = vrot.slane %v449_v30, %v826_v61  ;;  %v580_v37 = vcombine.low %v561_v4, %v568_v10  ;;  %694 = vst [vmem:[%s924_s2] sm:$0xff] %v692_v32 }
 0x124   :  { %v617_v59 = vrot.slane %v609_v36, %v826_v61 }
 0x125   :  { %v464_v49 = vcombine.low %v456_v33, %v463_v35  ;;  %v608_v38 = vrot.slane %v580_v37, %v826_v61 }
 0x127   :  { %466 = vst [vmem:[%s925_s3] sm:$0xff] %v464_v49  ;;  %v610_v58 = vcombine.low %v601_v55, %v608_v38 }
 0x129   :  { %v624_v47 = vrot.slane %v610_v58, %v826_v61 }
 0x12b   :  { %v625_v39 = vcombine.low %v617_v59, %v624_v47 }
 0x12d   :  { %627 = vst [vmem:[%s926_s4] sm:$0xff] %v625_v39 }
 0x12e   :  { %707 = vsyncpa [#allocation4], 1 }

// kernel: conv_generator_forward.10
= control target key start
LH: loop header
LB: loop body
LE: loop exit
PB: predicated region body
PF: predicated region fallthrough
CT: control target
= control target key end

     0   :  { %v19_v0 = vlaneseq  ;;  %v284_v2 = vmov 1983009808   ;;  %v285_v53 = vmov 1966171168   ;;  %s318_s0 = inlined_call_operand.vmem [shape: bf16[2,1024], index: 0, kind: input, shape index: {}]   ;;  %s319_s1 = inlined_call_operand.vmem [shape: f32[1,1024], index: 1, kind: input, shape index: {}]   ;;  %s320_s2 = inlined_call_operand.vmem [shape: f32[1,1024], index: 2, kind: input, shape index: {}]   ;;  %s321_s3 = inlined_call_operand.vmem [shape: bf16[2,1024], index: 3, kind: output, shape index: {}]  }
   0x1   :  { %v14_v1 = vld [vmem:[%s318_s0] sm:$0xff]  ;;  %v54_v3 = vunpack.c.l.s4 %v284_v2  ;;  %v228_v54 = vunpack.c.l.s4 %v285_v53 }
   0x2   :  { %v20_v4 = vshrl.u32 %v19_v0, 7  ;;  %v15_v5 = vunpack.c.l.bf16 %v14_v1  ;;  %v16_v6 = vunpack.c.h.bf16 %v14_v1  ;;  %v17_v7 = vld [vmem:[%s319_s1] sm:$0xff] }
   0x3   :  { %v55_v8 = vunpack.c.0.s8 %v54_v3  ;;  %v89_v17 = vld [vmem:[%s320_s2] sm:$0xff]  ;;  %v229_v60 = vunpack.c.0.s8 %v228_v54 }
   0x4   :  { %v21_v9 = vsub.s32 0, %v20_v4  ;;  %v25_v10 = vsub.s32 1, %v20_v4  ;;  %v29_v11 = vsub.s32 2, %v20_v4  ;;  %v33_v12 = vsub.s32 3, %v20_v4 }
   0x5   :  { %v37_v13 = vsub.s32 4, %v20_v4  ;;  %v41_v14 = vsub.s32 5, %v20_v4  ;;  %v45_v15 = vsub.s32 6, %v20_v4  ;;  %v49_v16 = vsub.s32 7, %v20_v4 }
   0x6   :  { %v22_v18 = vrot.slane %v17_v7, %v21_v9  ;;  %v26_v19 = vrot.slane %v17_v7, %v25_v10  ;;  %v30_v20 = vrot.slane %v17_v7, %v29_v11  ;;  %v34_v21 = vrot.slane %v17_v7, %v33_v12 }
   0x7   :  { %v38_v22 = vrot.slane %v17_v7, %v37_v13  ;;  %v42_v23 = vrot.slane %v17_v7, %v41_v14  ;;  %v46_v24 = vrot.slane %v17_v7, %v45_v15  ;;  %v50_v25 = vrot.slane %v17_v7, %v49_v16 }
   0x8   :  { %v51_v26 = vcombine.low %v22_v18, %v26_v19  ;;  %v52_v27 = vcombine.low %v30_v20, %v34_v21  ;;  %v58_v28 = vsub.s32 %v55_v8, %v20_v4  ;;  %v94_v29 = vrot.slane %v89_v17, %v21_v9 }
   0x9   :  { %v68_v30 = vcombine.low %v38_v22, %v42_v23  ;;  %v69_v31 = vcombine.low %v46_v24, %v50_v25  ;;  %v98_v32 = vrot.slane %v89_v17, %v25_v10  ;;  %v102_v33 = vrot.slane %v89_v17, %v29_v11 }
   0xa   :  { %v59_v34 = vrot.slane %v51_v26, %v58_v28  ;;  %v66_v35 = vrot.slane %v52_v27, %v58_v28  ;;  %v106_v36 = vrot.slane %v89_v17, %v33_v12  ;;  %v110_v37 = vrot.slane %v89_v17, %v37_v13 }
   0xb   :  { %v76_v38 = vrot.slane %v68_v30, %v58_v28  ;;  %v83_v39 = vrot.slane %v69_v31, %v58_v28  ;;  %v114_v40 = vrot.slane %v89_v17, %v41_v14  ;;  %v118_v41 = vrot.slane %v89_v17, %v45_v15 }
   0xc   :  { %v67_v42 = vcombine.low %v59_v34, %v66_v35  ;;  %v122_v43 = vrot.slane %v89_v17, %v49_v16  ;;  %v123_v44 = vcombine.low %v94_v29, %v98_v32  ;;  %v124_v45 = vcombine.low %v102_v33, %v106_v36 }
   0xd   :  { %v84_v46 = vcombine.low %v76_v38, %v83_v39  ;;  %v140_v47 = vcombine.low %v110_v37, %v114_v40  ;;  %v232_v2 = vsub.s32 %v229_v60, %v20_v4 }
   0xe   :  { %v87_v48 = vmul.f32 %v67_v42, %v15_v5  ;;  %v131_v49 = vrot.slane %v123_v44, %v58_v28  ;;  %v138_v50 = vrot.slane %v124_v45, %v58_v28  ;;  %v141_v51 = vcombine.low %v118_v41, %v122_v43 }
   0xf   :  { %v148_v52 = vrot.slane %v140_v47, %v58_v28  ;;  %v88_v55 = vmul.f32 %v84_v46, %v16_v6 }
  0x10   :  { %v139_v56 = vcombine.low %v131_v49, %v138_v50  ;;  %v155_v57 = vrot.slane %v141_v51, %v58_v28 }
  0x12   :  { %v156_v58 = vcombine.low %v148_v52, %v155_v57  ;;  %v159_v59 = vadd.f32 %v139_v56, %v87_v48 }
  0x14   :  { %v160_v61 = vadd.f32 %v156_v58, %v88_v55  ;;  %v161_v62 = vmax.f32 %v159_v59, 0.0 }
  0x16   :  { %v162_v63 = vmax.f32 %v160_v61, 0.0  ;;  %v165_v0 = vcombine.high %v161_v62, %v161_v62  ;;  %v172_v1 = vrot.slane %v161_v62, %v58_v28 }
  0x18   :  { %v179_v3 = vrot.slane %v165_v0, %v58_v28  ;;  %v180_v5 = vcombine.high %v172_v1, %v172_v1  ;;  %v182_v7 = vcombine.high %v162_v63, %v162_v63  ;;  %v189_v8 = vrot.slane %v162_v63, %v58_v28 }
  0x1a   :  { %v181_v9 = vcombine.high %v179_v3, %v179_v3  ;;  %v196_v10 = vrot.slane %v182_v7, %v58_v28  ;;  %v197_v11 = vcombine.high %v189_v8, %v189_v8  ;;  %v278_v12 = vpack.c.bf16 %v180_v5, %v172_v1 }
  0x1c   :  { %v198_v6 = vcombine.high %v196_v10, %v196_v10  ;;  %v279_v13 = vpack.c.bf16 %v181_v9, %v179_v3  ;;  %v280_v14 = vpack.c.bf16 %v197_v11, %v189_v8  ;;  %v233_v15 = vrot.slane %v278_v12, %v232_v2 }
  0x1e   :  { %v281_v16 = vpack.c.bf16 %v198_v6, %v196_v10  ;;  %v240_v17 = vrot.slane %v279_v13, %v232_v2  ;;  %v247_v18 = vrot.slane %v280_v14, %v232_v2 }
  0x20   :  { %v254_v19 = vrot.slane %v281_v16, %v232_v2  ;;  %v255_v20 = vcombine.low %v233_v15, %v240_v17 }
  0x22   :  { %v256_v21 = vcombine.low %v247_v18, %v254_v19  ;;  %v263_v22 = vrot.slane %v255_v20, %v232_v2 }
  0x24   :  { %v270_v4 = vrot.slane %v256_v21, %v232_v2 }
  0x26   :  { %v271_v23 = vcombine.low %v263_v22, %v270_v4 }
  0x28   :  { %273 = vst [vmem:[%s321_s3] sm:$0xff] %v271_v23 }

// kernel: tile.53
= control target key start
LH: loop header
LB: loop body
LE: loop exit
PB: predicated region body
PF: predicated region fallthrough
CT: control target
= control target key end

     0   :  { %s22_s0 = inlined_call_operand.vmem [shape: f32[32], index: 0, kind: input, shape index: {}]   ;;  %s23_s1 = inlined_call_operand.vmem [shape: f32[4,32], index: 1, kind: output, shape index: {}]  }
   0x1   :  { %v4_v0 = vld [vmem:[%s22_s0] ss:$0 sm:$0xff] }
   0x2   :  { %5 = vst [vmem:[%s23_s1] sm:$0xf] %v4_v0 }

// kernel: tile.54
= control target key start
LH: loop header
LB: loop body
LE: loop exit
PB: predicated region body
PF: predicated region fallthrough
CT: control target
= control target key end

     0   :  { %vm7_vm0 = vcmask 261120   ;;  %s37_s8 = smov 32   ;;  %s38_s9 = smov 64   ;;  %vm13_vm1 = vcmask 1048320   ;;  %vm19_vm2 = vcmask 785920   ;;  %vm25_vm3 = vcmask 523520   ;;  %s55_s0 = inlined_call_operand.vmem [shape: f32[4,32], index: 0, kind: input, shape index: {}]   ;;  %s56_s1 = inlined_call_operand.vmem [shape: f32[1,128], index: 1, kind: output, shape index: {}]  }
   0x1   :  { %v4_v0 = vld [vmem:[%s55_s0] sm:$0xf]  ;;  %s36_s0 = smov 96  }
   0x2   :  { %5 = vst [vmem:[#allocation1] sm:$0xf] %v4_v0 }
   0x9   :  { %v10_v1 = vld [vmem:[#allocation1 + $0x3] sm:$0x1]   ;;  %v22_v2 = vld [vmem:[#allocation1 + $0x1] sm:$0x1]   ;;  %v6_v3 = vld [vmem:[#allocation1] sm:$0x1]  }
   0xa   :  { %11 = vrot.lane.b32.xlu0 %v10_v1, %s36_s0  ;;  %23 = vrot.lane.b32.xlu1 %v22_v2, %s37_s8  ;;  %v16_v4 = vld [vmem:[#allocation1 + $0x2] sm:$0x1]   ;;  %8 = vst.msk [vmem:[#allocation0] sm:$0x1] %vm7_vm0, %v6_v3  }
   0xe   :  { %17 = vrot.lane.b32.xlu0 %v16_v4, %s38_s9 }
  0x7c   :  { %v12_v5 = vpop.permute.xlu0 %11   ;;  %v24_v6 = vpop.permute.xlu1 %23  }
  0x7d   :  { %14 = vst.msk [vmem:[#allocation0] sm:$0x1] %vm13_vm1, %v12_v5  }
  0x80   :  { %v18_v7 = vpop.permute.xlu0 %17  }
  0x81   :  { %20 = vst.msk [vmem:[#allocation0] sm:$0x1] %vm19_vm2, %v18_v7  }
  0x82   :  { %26 = vst.msk [vmem:[#allocation0] sm:$0x1] %vm25_vm3, %v24_v6  }
  0x89   :  { %v30_v8 = vld [vmem:[#allocation0] sm:$0x1] }
  0x8a   :  { %32 = vst [vmem:[%s56_s1] sm:$0x1] %v30_v8 }

// kernel: conv_generator_forward.12
= control target key start
LH: loop header
LB: loop body
LE: loop exit
PB: predicated region body
PF: predicated region fallthrough
CT: control target
= control target key end

     0   :  { %s326_s12 = smov 0   ;;  %s343_s0 = inlined_call_operand.vmem [shape: bf16[32,128], index: 0, kind: input, shape index: {}]   ;;  %s344_s1 = inlined_call_operand.vmem [shape: f32[1,128], index: 1, kind: input, shape index: {}]   ;;  %s345_s2 = inlined_call_operand.vmem [shape: f32[1,128], index: 2, kind: input, shape index: {}]   ;;  %s346_s3 = inlined_call_operand.vmem [shape: bf16[32,128], index: 3, kind: output, shape index: {}]  }
   0x1 LB: > { %s264_s13 = sadd.s32 4294967295, %s304_s12   ;;  %p268_p0 = scmp.ge.s32.totalorder %s304_s12, 1  ;;  %s304_s12 = sphi %s326_s12, %s13_s12  }
   0x2   : > { %p138_p1 = scmp.lt.s32.totalorder %s304_s12, 3 }
   0x4   : > { %p139_p2 = pnand %p268_p0, %p138_p1 }
   0x5   : > { %s269_s14 = sshll.u32 (!%p139_p2), %s264_s13, 1  ;;  %v273_v1 = vld [vmem:[%s344_s1] ss:$0 sm:$0xff] (!%p139_p2) }
   0x6   : > { %142 = sbr.rel (%p139_p2) target bundleno = 28 (0x1c), region = 32  ;;  %p163_p3 = scmp.lt.s32.totalorder (!%p139_p2), %s269_s14, 3  ;;  %v274_v4 = vld [vmem:[%s345_s2] ss:$0 sm:$0xff] (!%p139_p2) }
   0xd   : > { %s348_s14 = smov (!%p163_p3, %s269_s14), 3 }
   0xe   : > { %s270_s15 = sshll.u32 %s348_s14, 2 }
   0xf   : > { %s166_s18 = scalar_lea.vmem %s343_s0, %s270_s15  ;;  %s172_s25 = scalar_lea.vmem %s346_s3, %s270_s15 }
  0x10   : > { %v282_v0 = vld [vmem:[%s166_s18] sm:$0xff]  }
  0x11   : > { %v283_v2 = vunpack.c.l.bf16 %v282_v0  ;;  %v284_v3 = vunpack.c.h.bf16 %v282_v0 }
  0x13   : > { %v185_v5 = vmul.f32 %v283_v2, %v273_v1  ;;  %v186_v6 = vmul.f32 %v284_v3, %v273_v1 }
  0x15   : > { %v194_v7 = vadd.f32 %v274_v4, %v185_v5  ;;  %v195_v8 = vadd.f32 %v274_v4, %v186_v6 }
  0x17   : > { %v196_v9 = vmax.f32 %v194_v7, 0.0  ;;  %v197_v10 = vmax.f32 %v195_v8, 0.0 }
  0x19   : > { %v288_v11 = vpack.c.bf16 %v197_v10, %v196_v9 }
  0x1b   : > { %289 = vst [vmem:[%s172_s25] sm:$0xff] %v288_v11  }
  0x1c PF: > { %s13_s12 = sadd.s32 1, %s304_s12  }
  0x1d   : > { %p10_p4 = scmp.ge.s32.totalorder %s13_s12, 4  }
  0x1f   :  { %12 = sbr.rel (!%p10_p4) target bundleno = 1 (0x1), region = 62 }

// kernel: conv_generator_forward.11
= control target key start
LH: loop header
LB: loop body
LE: loop exit
PB: predicated region body
PF: predicated region fallthrough
CT: control target
= control target key end

     0   :  { %10 = vsyncpa [#allocation4], 0  ;;  %s1194_s15 = smov 0   ;;  %s1196_s16 = smov 0   ;;  %s1281_s0 = inlined_call_operand.vmem [shape: bf16[32,576], index: 0, kind: input, shape index: {}]   ;;  %s1282_s1 = inlined_call_operand.hbm [shape: bf16[576,128], index: 1, kind: input, shape index: {}]   ;;  %s1283_s2 = inlined_call_operand.vmem [shape: bf16[32,128], index: 2, kind: output, shape index: {0}]   ;;  %s1284_s3 = inlined_call_operand.vmem [shape: f32[2,1,128], index: 3, kind: output, shape index: {1}]   ;;  %s1285_s4 = inlined_call_operand.vmem [shape: f32[2,1,128], index: 4, kind: output, shape index: {2}]  }
   0x1   :  { %s1198_s17 = smov 0  }
   0x2 LB: > { %s900_s18 = sadd.s32 4294967295, %s1162_s17   ;;  %s28_s19 = sadd.s32 1, %s1158_s16  ;;  %s1162_s17 = sphi %s1198_s17, %s16_s17   ;;  %s1158_s16 = sphi %s1196_s16, %s1295_s16   ;;  %s1154_s15 = sphi %s1194_s15, %s1294_s15  }
   0x3   : > { %p30_p0 = scmp.ge.s32.totalorder %s28_s19, 2  ;;  %p902_p1 = scmp.ge.s32.totalorder %s1162_s17, 1 }
   0x4   : > { %p165_p2 = scmp.lt.s32.totalorder %s1162_s17, 3  ;;  %p1219_p4 = scmp.eq.s32.totalorder %s900_s18, 0 }
   0x5   : > { %s1297_s19 = smov (%p30_p0, %s28_s19), 0  ;;  %s1164_s22 = smov [#allocation3]  }
   0x6   : > { %p1215_p3 = pnand %p902_p1, %p165_p2  ;;  %s180_s23 = sshll.u32 %s1164_s22, 4  ;;  %s181_s23 = int_to_ptr.vmem [resolvable:$true] %s180_s23 }
   0x7   : > { %s1290_s21 = scalar_select %p1219_p4, 1, 0 }
   0x8   : > { %s1289_s20 = scalar_select %p1215_p3, 1, 0 }
   0x9   : > { %p1030_p5 = pneg %p1215_p3  ;;  %s1108_s27 = scalar_lea.hbm %s1282_s1, 4608 }
   0xa   : > { %p1109_p7 = scmp.ne.s32.totalorder %s1282_s1, %s1108_s27  ;;  %p1115_p11 = scmp.lt.u32.totalorder %s1108_s27, %s1282_s1 }
   0xb   : > { %p1227_p6 = pnand %p1219_p4, %p1030_p5 }
   0xd   : > { %p1110_p8 = pneg %p1227_p6 }
   0xf   : > { %p1111_p9 = pnand %p1110_p8, %p1109_p7 }
  0x11   : > { %p1112_p10 = pneg %p1111_p9 }
  0x13   : > { %p1117_p12 = pnand %p1115_p11, %p1112_p10 }
  0x15   : > { %1120 = shalt.err (!%p1117_p12)
}
  0x16   : > { %s1121_s6 = scalar_lea.vmem %s181_s23, 4608  ;;  %p1129_p2 = scmp.lt.s32.totalorder %s181_s23, %s181_s23 }
  0x17   : > { %p1122_p13 = scmp.ne.s32.totalorder %s181_s23, %s1121_s6  ;;  %p1130_p5 = scmp.lt.s32.totalorder %s1121_s6, %s1121_s6 }
  0x19   : > { %p1124_p0 = pnand %p1122_p13, %p1110_p8  ;;  %p1131_p4 = por %p1130_p5, %p1129_p2 }
  0x1b   : > { %p1125_p1 = pneg %p1124_p0 }
  0x1d   : > { %p1132_p3 = pnand %p1131_p4, %p1125_p1 }
  0x1f   : > { %1135 = shalt.err (!%p1132_p3)
}
  0x20   : > { %s1165_s7 = smov 64   ;;  %s1166_s8 = smov 4  }
  0x21   : > { %1033 = dma.hbm_to_vmem [thread:$0]  (!%p1227_p6), %s1282_s1, 4608, %s181_s23, [#allocation4], %s1165_s7, %s1165_s7, %s1166_s8  }
  0x22   : > { %p1292_p7 = scmp.ne.s32.totalorder %s1289_s20, 0 }
  0x23   : > { %p1293_p9 = scmp.ne.s32.totalorder (!%p1292_p7), %s1290_s21, 0 }
  0x24   : > { %211 = sbr.rel (%p1292_p7) target bundleno = 327 (0x147), region = 28 }
  0x2b   : > { %1149 = dma.done.wait (%p1293_p9), [#allocation4], 4608  }
  0x2c   : > { %1151 = vsyncadd (%p1293_p9), [#allocation4], 4294962688  ;;  %v1065_v0 = vld [vmem:[#allocation3 + $0x40] sm:$0xff]   ;;  %v1069_v4 = vld [vmem:[#allocation3 + $0x48] sm:$0xff]   ;;  %s907_s11 = sshll.u32 %s1154_s15, 1  ;;  %v1167_v34 = vmov 0.0  }
  0x2d   : > { %v1066_v1 = vld [vmem:[#allocation3 + $0xc0] sm:$0xff]   ;;  %964 = vmatprep.subr.bf16.mxu0 %v1065_v0  ;;  %v1070_v5 = vld [vmem:[#allocation3 + $0xc8] sm:$0xff]   ;;  %v1073_v8 = vld [vmem:[#allocation3 + $0x50] sm:$0xff]   ;;  %p250_p3 = scmp.lt.s32.totalorder %s907_s11, 3  ;;  %vm1168_vm0 = vmmov 0   ;;  %vm601_vm1 = vcmask 523264  }
  0x2e   : > { %v1067_v2 = vld [vmem:[#allocation3] sm:$0xff]   ;;  %986 = vmatprep.subr.bf16.mxu1 %v1066_v1  ;;  %v1071_v6 = vld [vmem:[#allocation3 + $0x8] sm:$0xff]   ;;  %v1074_v9 = vld [vmem:[#allocation3 + $0xd0] sm:$0xff]   ;;  %p267_p4 = scmp.lt.s32.totalorder %s1154_s15, 1 }
  0x2f   : > { %v1068_v3 = vld [vmem:[#allocation3 + $0x80] sm:$0xff]   ;;  %965 = vmatpush3.bf16.msra.mxu0 %v1067_v2  ;;  %v1072_v7 = vld [vmem:[#allocation3 + $0x88] sm:$0xff]   ;;  %v1075_v10 = vld [vmem:[#allocation3 + $0x10] sm:$0xff]   ;;  %s1299_s11 = smov (!%p250_p3, %s907_s11), 3 }
  0x30   : > { %987 = vmatpush3.bf16.msra.mxu1 %v1068_v3  ;;  %966 = vmatprep.subr.bf16.mxu0 %v1069_v4  ;;  %v1076_v11 = vld [vmem:[#allocation3 + $0x90] sm:$0xff]   ;;  %v1077_v12 = vld [vmem:[#allocation3 + $0x58] sm:$0xff]   ;;  %v1081_v16 = vld [vmem:[#allocation3 + $0x60] sm:$0xff]   ;;  %s1025_s12 = smul.u32 20, %s1299_s11  ;;  %s910_s20 = sshll.u32 %s1299_s11, 2 }
  0x31   : > { %988 = vmatprep.subr.bf16.mxu1 %v1070_v5  ;;  %v1078_v13 = vld [vmem:[#allocation3 + $0xd8] sm:$0xff]   ;;  %v1082_v17 = vld [vmem:[#allocation3 + $0xe0] sm:$0xff]   ;;  %v1085_v20 = vld [vmem:[#allocation3 + $0x68] sm:$0xff]   ;;  %s265_s23 = scalar_lea.vmem %s1283_s2, %s910_s20  ;;  %s1301_s15 = smov (!%p267_p4, %s1154_s15), 1 }
  0x32   : > { %v1079_v14 = vld [vmem:[#allocation3 + $0x18] sm:$0xff]   ;;  %v1083_v18 = vld [vmem:[#allocation3 + $0x20] sm:$0xff]   ;;  %v1086_v21 = vld [vmem:[#allocation3 + $0xe8] sm:$0xff]   ;;  %s257_s18 = scalar_lea.vmem %s1281_s0, %s1025_s12  ;;  %s269_s26 = scalar_lea.vmem %s1284_s3, %s1301_s15 }
  0x33   : > { %967 = vmatpush3.bf16.msra.mxu0 %v1071_v6  ;;  %v1080_v15 = vld [vmem:[#allocation3 + $0x98] sm:$0xff]   ;;  %v1084_v19 = vld [vmem:[#allocation3 + $0xa0] sm:$0xff]   ;;  %v1087_v22 = vld [vmem:[#allocation3 + $0x28] sm:$0xff]   ;;  %s272_s29 = scalar_lea.vmem %s1285_s4, %s1301_s15 }
  0x34   : > { %989 = vmatpush3.bf16.msra.mxu1 %v1072_v7  ;;  %968 = vmatprep.subr.bf16.mxu0 %v1073_v8  ;;  %v1088_v23 = vld [vmem:[#allocation3 + $0xa8] sm:$0xff]   ;;  %v1089_v24 = vld [vmem:[#allocation3 + $0x70] sm:$0xff]   ;;  %v1093_v28 = vld [vmem:[#allocation3 + $0x78] sm:$0xff]  }
  0x35   : > { %990 = vmatprep.subr.bf16.mxu1 %v1074_v9  ;;  %v1090_v25 = vld [vmem:[#allocation3 + $0xf0] sm:$0xff]   ;;  %v1094_v29 = vld [vmem:[#allocation3 + $0xf8] sm:$0xff]   ;;  %v1102_v36 = vld [vmem:[%s257_s18 + $0xc] ss:$20 sps:$4 sm:$0xff]  }
  0x36   : > { %v1091_v26 = vld [vmem:[#allocation3 + $0x30] sm:$0xff]   ;;  %v1095_v30 = vld [vmem:[#allocation3 + $0x38] sm:$0xff]   ;;  %v1103_v37 = vld [vmem:[#allocation3 + $0x100] sm:$0xff]   ;;  %678 = vmatprep.mubr.bf16.mxu1 %v1102_v36 }
  0x37   : > { %969 = vmatpush3.bf16.msra.mxu0 %v1075_v10  ;;  %v1092_v27 = vld [vmem:[#allocation3 + $0xb0] sm:$0xff]   ;;  %v1096_v31 = vld [vmem:[#allocation3 + $0xb8] sm:$0xff]   ;;  %v1104_v38 = vld [vmem:[#allocation3 + $0x108] sm:$0xff]  }
  0x38   : > { %991 = vmatpush3.bf16.msra.mxu1 %v1076_v11  ;;  %970 = vmatprep.subr.bf16.mxu0 %v1077_v12  ;;  %v1097_v32 = vld [vmem:[%s257_s18] ss:$20 sps:$4 sm:$0xff]   ;;  %v1099_v33 = vld [vmem:[%s257_s18 + $0x4] ss:$20 sps:$4 sm:$0xff]   ;;  %v1100_v35 = vld [vmem:[%s257_s18 + $0x8] ss:$20 sps:$4 sm:$0xff]  }
  0x39   : > { %992 = vmatprep.subr.bf16.mxu1 %v1078_v13  ;;  %637 = vmatprep.mubr.bf16.mxu0 %v1099_v33  ;;  %v1105_v39 = vld [vmem:[#allocation3 + $0x110] sm:$0xff]   ;;  %v1106_v40 = vld [vmem:[#allocation3 + $0x118] sm:$0xff]  }
  0x3a   : > { %v1107_v41 = vld [vmem:[%s257_s18 + $0x10] ss:$20 sps:$4 sm:$0xff]  }
  0x3b   : > { %971 = vmatpush3.bf16.msra.mxu0 %v1079_v14 }
  0x3c   : > { %993 = vmatpush3.bf16.msra.mxu1 %v1080_v15  ;;  %972 = vmatprep.subr.bf16.mxu0 %v1081_v16 }
  0x3d   : > { %994 = vmatprep.subr.bf16.mxu1 %v1082_v17 }
  0x3f   : > { %973 = vmatpush3.bf16.msra.mxu0 %v1083_v18 }
  0x40   : > { %995 = vmatpush3.bf16.msra.mxu1 %v1084_v19  ;;  %974 = vmatprep.subr.bf16.mxu0 %v1085_v20 }
  0x41   : > { %996 = vmatprep.subr.bf16.mxu1 %v1086_v21 }
  0x43   : > { %975 = vmatpush3.bf16.msra.mxu0 %v1087_v22 }
  0x44   : > { %997 = vmatpush3.bf16.msra.mxu1 %v1088_v23  ;;  %976 = vmatprep.subr.bf16.mxu0 %v1089_v24 }
  0x45   : > { %998 = vmatprep.subr.bf16.mxu1 %v1090_v25 }
  0x47   : > { %977 = vmatpush3.bf16.msra.mxu0 %v1091_v26 }
  0x48   : > { %999 = vmatpush3.bf16.msra.mxu1 %v1092_v27  ;;  %978 = vmatprep.subr.bf16.mxu0 %v1093_v28 }
  0x49   : > { %1000 = vmatprep.subr.bf16.mxu1 %v1094_v29 }
  0x4b   : > { %979 = vmatpush3.bf16.msra.mxu0 %v1095_v30 }
  0x4c   : > { %1001 = vmatpush3.bf16.msra.mxu1 %v1096_v31  ;;  %1013 = vmatprep.subr.bf16.mxu0 %v1167_v34 }
  0x4e   : > { %638 = vmatmul.mubr.bf16.vlgmr.msra.gmra.mrb[0].mxu0 %v1097_v32 }
  0x4f   : > { %679 = vmatmul.mubr.bf16.vlgmr.msra.gmra.mrb[0].mxu1 %v1100_v35  ;;  %1014 = vmatpush3.bf16.msra.mxu0 %v1103_v37 }
  0x50   : > { %1015 = vmatprep.subr.bf16.mxu0 %v1167_v34  ;;  %1021 = vmatprep.mubr.msk.bf16.mxu0 %vm1168_vm0, %v1167_v34 }
  0x53   : > { %1016 = vmatpush3.bf16.msra.mxu0 %v1104_v38 }
  0x54   : > { %1017 = vmatprep.subr.bf16.mxu0 %v1167_v34 }
  0x57   : > { %1018 = vmatpush3.bf16.msra.mxu0 %v1105_v39 }
  0x58   : > { %1019 = vmatprep.subr.bf16.mxu0 %v1167_v34 }
  0x5b   : > { %1020 = vmatpush3.bf16.msra.mxu0 %v1106_v40 }
  0x5e   : > { %1022 = vmatmul.mubr.msk.bf16.vlgmr.msra.gmra.mrb[4].mxu0 %vm601_vm1, %v1107_v41 }
 0x121   : > { %v980_v42 = vpop.f32.mrb[0].mxu0 }
 0x122   : > { %v1002_v43 = vpop.f32.mrb[0].mxu1  ;;  %v981_v44 = vpop.f32.mrb[1].mxu0 }
 0x123   : > { %v982_v45 = vadd.f32 %v981_v44, %v980_v42  ;;  %v1003_v46 = vpop.f32.mrb[1].mxu1  ;;  %v983_v47 = vpop.f32.mrb[2].mxu0 }
 0x124   : > { %v1004_v48 = vadd.f32 %v1003_v46, %v1002_v43  ;;  %v1005_v49 = vpop.f32.mrb[2].mxu1  ;;  %v984_v50 = vpop.f32.mrb[3].mxu0 }
 0x125   : > { %v985_v51 = vadd.f32 %v984_v50, %v983_v47  ;;  %v1006_v52 = vpop.f32.mrb[3].mxu1 }
 0x126   : > { %v1007_v53 = vadd.f32 %v1006_v52, %v1005_v49  ;;  %v681_v54 = vadd.f32 %v1004_v48, %v982_v45 }
 0x128   : > { %v684_v55 = vadd.f32 %v1007_v53, %v985_v51 }
 0x131   : > { %v721_v56 = vpop.f32.mrb[4].mxu0 }
 0x132   : > { %v722_v57 = vadd.f32 %v721_v56, %v681_v54  ;;  %v1023_v58 = vpop.f32.mrb[5].mxu0 }
 0x133   : > { %v724_v59 = vpop.f32.mrb[6].mxu0 }
 0x134   : > { %v725_v60 = vadd.f32 %v724_v59, %v684_v55  ;;  %v1024_v61 = vpop.f32.mrb[7].mxu0  ;;  %v745_v62 = vmul.f32 %v722_v57, %v722_v57 }
 0x136   : > { %v737_v63 = vadd.f32 %v725_v60, %v722_v57  ;;  %v746_v0 = vmul.f32 %v725_v60, %v725_v60  ;;  %v962_v1 = vpack.c.bf16 %v725_v60, %v722_v57 }
 0x138   : > { %v738_v2 = vrot.slane %v737_v63, 4  ;;  %v747_v3 = vadd.f32 %v746_v0, %v745_v62  ;;  %963 = vst [vmem:[%s265_s23] sm:$0xff] %v962_v1  }
 0x13a   : > { %v739_v4 = vadd.f32 %v738_v2, %v737_v63  ;;  %v748_v5 = vrot.slane %v747_v3, 4 }
 0x13c   : > { %v740_v6 = vrot.slane %v739_v4, 2  ;;  %v749_v7 = vadd.f32 %v748_v5, %v747_v3 }
 0x13e   : > { %v741_v8 = vadd.f32 %v740_v6, %v739_v4  ;;  %v750_v9 = vrot.slane %v749_v7, 2 }
 0x140   : > { %v742_v10 = vrot.slane %v741_v8, 1  ;;  %v751_v11 = vadd.f32 %v750_v9, %v749_v7 }
 0x142   : > { %v743_v12 = vadd.f32 %v742_v10, %v741_v8  ;;  %v752_v13 = vrot.slane %v751_v11, 1 }
 0x144   : > { %744 = vst [vmem:[%s269_s26] sm:$0x1] %v743_v12  ;;  %v753_v14 = vadd.f32 %v752_v13, %v751_v11 }
 0x146   : > { %754 = vst [vmem:[%s272_s29] sm:$0x1] %v753_v14 }
 0x147 PF: > { %s16_s17 = sadd.s32 1, %s1162_s17   ;;  %s1294_s15 = smov %s1158_s16 }
 0x148   : > { %p13_p6 = scmp.ge.s32.totalorder %s16_s17, 4   ;;  %s1295_s16 = smov %s1297_s19 }
 0x14a   :  { %15 = sbr.rel (!%p13_p6) target bundleno = 2 (0x2), region = 96 }
 0x151   :  { %811 = vsyncpa [#allocation4], 1 }
 0x152   :  { %813 = vsyncpa [#allocation4 + $0x1], 1 }

// kernel: tile.63
= control target key start
LH: loop header
LB: loop body
LE: loop exit
PB: predicated region body
PF: predicated region fallthrough
CT: control target
= control target key end

     0   :  { %s22_s0 = inlined_call_operand.vmem [shape: f32[16], index: 0, kind: input, shape index: {}]   ;;  %s23_s1 = inlined_call_operand.vmem [shape: f32[8,16], index: 1, kind: output, shape index: {}]  }
   0x1   :  { %v4_v0 = vld [vmem:[%s22_s0] ss:$0 sm:$0xff] }
   0x2   :  { %5 = vst [vmem:[%s23_s1] sm:$0xff] %v4_v0 }

// kernel: tile.64
= control target key start
LH: loop header
LB: loop body
LE: loop exit
PB: predicated region body
PF: predicated region fallthrough
CT: control target
= control target key end

     0   :  { %s67_s10 = smov 112   ;;  %s68_s11 = smov 80   ;;  %vm3_vm0 = vcmask 130048   ;;  %vm9_vm1 = vcmask 1048448   ;;  %vm15_vm2 = vcmask 917248   ;;  %vm21_vm3 = vcmask 786048   ;;  %s111_s0 = inlined_call_operand.vmem [shape: f32[8,16], index: 0, kind: input, shape index: {}]   ;;  %s112_s1 = inlined_call_operand.vmem [shape: f32[1,128], index: 1, kind: output, shape index: {}]  }
   0x1   :  { %v53_v0 = vld [vmem:[%s111_s0 + $0x7] sm:$0x1]   ;;  %v55_v1 = vld [vmem:[%s111_s0 + $0x5] sm:$0x1]   ;;  %v54_v2 = vld [vmem:[%s111_s0 + $0x6] sm:$0x1]  }
   0x2   :  { %7 = vrot.lane.b32.xlu0 %v53_v0, %s67_s10  ;;  %19 = vrot.lane.b32.xlu1 %v55_v1, %s68_s11  ;;  %v56_v3 = vld [vmem:[%s111_s0 + $0x4] sm:$0x1]   ;;  %v2_v4 = vld [vmem:[%s111_s0] sm:$0x1]   ;;  %s69_s18 = smov 96   ;;  %s70_s19 = smov 64  }
   0x3   :  { %4 = vst.msk [vmem:[#allocation0] sm:$0x1] %vm3_vm0, %v2_v4   ;;  %v57_v5 = vld [vmem:[%s111_s0 + $0x3] sm:$0x1]   ;;  %v58_v6 = vld [vmem:[%s111_s0 + $0x2] sm:$0x1]  }
   0x4   :  { %s71_s24 = smov 48   ;;  %s72_s25 = smov 32   ;;  %v59_v7 = vld [vmem:[%s111_s0 + $0x1] sm:$0x1]   ;;  %vm27_vm4 = vcmask 654848   ;;  %vm33_vm5 = vcmask 523648  }
   0x5   :  { %s73_s0 = smov 16   ;;  %vm39_vm6 = vcmask 392448   ;;  %vm45_vm7 = vcmask 261248  }
   0x6   :  { %13 = vrot.lane.b32.xlu0 %v54_v2, %s69_s18  ;;  %25 = vrot.lane.b32.xlu1 %v56_v3, %s70_s19 }
   0xa   :  { %31 = vrot.lane.b32.xlu0 %v57_v5, %s71_s24  ;;  %37 = vrot.lane.b32.xlu1 %v58_v6, %s72_s25 }
   0xe   :  { %43 = vrot.lane.b32.xlu0 %v59_v7, %s73_s0 }
  0x74   :  { %v8_v8 = vpop.permute.xlu0 %7   ;;  %v20_v9 = vpop.permute.xlu1 %19  }
  0x75   :  { %10 = vst.msk [vmem:[#allocation0] sm:$0x1] %vm9_vm1, %v8_v8  }
  0x78   :  { %v14_v10 = vpop.permute.xlu0 %13   ;;  %v26_v11 = vpop.permute.xlu1 %25  }
  0x79   :  { %16 = vst.msk [vmem:[#allocation0] sm:$0x1] %vm15_vm2, %v14_v10  }
  0x7a   :  { %22 = vst.msk [vmem:[#allocation0] sm:$0x1] %vm21_vm3, %v20_v9  }
  0x7b   :  { %28 = vst.msk [vmem:[#allocation0] sm:$0x1] %vm27_vm4, %v26_v11  }
  0x7c   :  { %v32_v12 = vpop.permute.xlu0 %31   ;;  %v38_v13 = vpop.permute.xlu1 %37  }
  0x7d   :  { %34 = vst.msk [vmem:[#allocation0] sm:$0x1] %vm33_vm5, %v32_v12  }
  0x7e   :  { %40 = vst.msk [vmem:[#allocation0] sm:$0x1] %vm39_vm6, %v38_v13  }
  0x80   :  { %v44_v14 = vpop.permute.xlu0 %43  }
  0x81   :  { %46 = vst.msk [vmem:[#allocation0] sm:$0x1] %vm45_vm7, %v44_v14  }
  0x88   :  { %v50_v15 = vld [vmem:[#allocation0] sm:$0x1] }
  0x89   :  { %52 = vst [vmem:[%s112_s1] sm:$0x1] %v50_v15 }

// kernel: conv_generator_forward.13
= control target key start
LH: loop header
LB: loop body
LE: loop exit
PB: predicated region body
PF: predicated region fallthrough
CT: control target
= control target key end

     0   :  { %s1160_s15 = smov 0   ;;  %s1162_s16 = smov 0   ;;  %s1330_s0 = inlined_call_operand.vmem [shape: bf16[128,288], index: 0, kind: input, shape index: {}]   ;;  %s1331_s1 = inlined_call_operand.vmem [shape: bf16[288,64], index: 1, kind: input, shape index: {}]   ;;  %s1332_s2 = inlined_call_operand.vmem [shape: bf16[128,64], index: 2, kind: output, shape index: {0}]   ;;  %s1333_s3 = inlined_call_operand.vmem [shape: f32[2,1,64], index: 3, kind: output, shape index: {1}]   ;;  %s1334_s4 = inlined_call_operand.vmem [shape: f32[2,1,64], index: 4, kind: output, shape index: {2}]  }
   0x1   :  { %s1164_s17 = smov 0  }
   0x2 LB: > { %s27_s18 = sadd.s32 1, %s1128_s16  ;;  %p919_p0 = scmp.ge.s32.totalorder %s1132_s17, 1  ;;  %s1132_s17 = sphi %s1164_s17, %s15_s17   ;;  %s1128_s16 = sphi %s1162_s16, %s1336_s16   ;;  %s1124_s15 = sphi %s1160_s15, %s1335_s15  }
   0x3   : > { %p29_p1 = scmp.ge.s32.totalorder %s27_s18, 2  ;;  %p199_p2 = scmp.lt.s32.totalorder %s1132_s17, 3 }
   0x5   : > { %s1338_s18 = smov (%p29_p1, %s27_s18), 0  ;;  %p200_p3 = pnand %p919_p0, %p199_p2 }
   0x6   : > { %v1076_v0 = vld [vmem:[%s1331_s1 + $0x40] sm:$0xff] (!%p200_p3)   ;;  %s920_s21 = sshll.u32 (!%p200_p3), %s1124_s15, 3  ;;  %v1078_v2 = vld [vmem:[%s1331_s1 + $0x48] sm:$0xff] (!%p200_p3)   ;;  %v1080_v4 = vld [vmem:[%s1331_s1 + $0x50] sm:$0xff] (!%p200_p3)   ;;  %vm513_vm0 = vcmask (!%p200_p3), 261120   ;;  %vm276_vm1 = vcmask (!%p200_p3), 523264  }
   0x7   : > { %203 = sbr.rel (%p200_p3) target bundleno = 308 (0x134), region = 28  ;;  %v1077_v1 = vld [vmem:[%s1331_s1] sm:$0xff] (!%p200_p3)   ;;  %976 = vmatprep.subr.bf16.mxu0 (!%p200_p3), %v1076_v0  ;;  %1034 = vmatprep.subr.bf16.mxu1 (!%p200_p3), %v1076_v0  ;;  %p243_p4 = scmp.lt.s32.totalorder (!%p200_p3), %s920_s21, 15  ;;  %v1079_v3 = vld [vmem:[%s1331_s1 + $0x8] sm:$0xff] (!%p200_p3)   ;;  %v1081_v5 = vld [vmem:[%s1331_s1 + $0x10] sm:$0xff] (!%p200_p3)   ;;  %v1134_v30 = vmov (!%p200_p3), 0.0  }
   0x8   : > { %977 = vmatpush3.bf16.msra.mxu0 (!%p200_p3), %v1077_v1  ;;  %1042 = vmatpush3.bf16.msra.mxu1 (!%p200_p3), %v1077_v1  ;;  %v1082_v6 = vld [vmem:[%s1331_s1 + $0x58] sm:$0xff] (!%p200_p3)   ;;  %v1084_v8 = vld [vmem:[%s1331_s1 + $0x60] sm:$0xff] (!%p200_p3)   ;;  %v1086_v10 = vld [vmem:[%s1331_s1 + $0x68] sm:$0xff] (!%p200_p3)   ;;  %279 = vst.msk [vmem:[#allocation2 + $0x10] sm:$0xff] (!%p200_p3), %vm276_vm1, %v1134_v30  ;;  %vm769_vm2 = vcmask (!%p200_p3), 519168   ;;  %p265_p5 = scmp.lt.s32.totalorder (!%p200_p3), %s1124_s15, 1 }
   0x9   : > { %978 = vmatprep.subr.bf16.mxu0 (!%p200_p3), %v1078_v2  ;;  %1035 = vmatprep.subr.bf16.mxu1 (!%p200_p3), %v1078_v2  ;;  %v1083_v7 = vld [vmem:[%s1331_s1 + $0x18] sm:$0xff] (!%p200_p3)   ;;  %v1085_v9 = vld [vmem:[%s1331_s1 + $0x20] sm:$0xff] (!%p200_p3)   ;;  %v1087_v13 = vld [vmem:[%s1331_s1 + $0x28] sm:$0xff] (!%p200_p3)   ;;  %277 = vst.msk [vmem:[#allocation2] sm:$0xff] (!%p200_p3), %vm276_vm1, %v1134_v30  ;;  %vm705_vm3 = vcmask (!%p200_p3), 516096  }
   0xa   : > { %v1088_v14 = vld [vmem:[%s1331_s1 + $0x70] sm:$0xff] (!%p200_p3)   ;;  %v1090_v16 = vld [vmem:[%s1331_s1 + $0x78] sm:$0xff] (!%p200_p3)   ;;  %v1098_v18 = vld [vmem:[%s1331_s1 + $0x80] sm:$0xff] (!%p200_p3)   ;;  %278 = vst.msk [vmem:[#allocation2 + $0x8] sm:$0xff] (!%p200_p3), %vm276_vm1, %v1134_v30 }
   0xb   : > { %v1089_v15 = vld [vmem:[%s1331_s1 + $0x30] sm:$0xff] (!%p200_p3)   ;;  %v1091_v17 = vld [vmem:[%s1331_s1 + $0x38] sm:$0xff] (!%p200_p3)   ;;  %v1099_v22 = vld [vmem:[%s1331_s1 + $0x88] sm:$0xff] (!%p200_p3)   ;;  %280 = vst.msk [vmem:[#allocation2 + $0x18] sm:$0xff] (!%p200_p3), %vm276_vm1, %v1134_v30 }
   0xc   : > { %979 = vmatpush3.bf16.msra.mxu0 (!%p200_p3), %v1079_v3  ;;  %1043 = vmatpush3.bf16.msra.mxu1 (!%p200_p3), %v1079_v3  ;;  %281 = vst.msk [vmem:[#allocation2 + $0x20] sm:$0xff] (!%p200_p3), %vm276_vm1, %v1134_v30  ;;  %282 = vst.msk [vmem:[#allocation2 + $0x28] sm:$0xff] (!%p200_p3), %vm276_vm1, %v1134_v30 }
   0xd   : > { %980 = vmatprep.subr.bf16.mxu0 (!%p200_p3), %v1080_v4  ;;  %1036 = vmatprep.subr.bf16.mxu1 (!%p200_p3), %v1080_v4  ;;  %283 = vst.msk [vmem:[#allocation2 + $0x30] sm:$0xff] (!%p200_p3), %vm276_vm1, %v1134_v30  ;;  %284 = vst.msk [vmem:[#allocation2 + $0x38] sm:$0xff] (!%p200_p3), %vm276_vm1, %v1134_v30 }
   0xe   : > { %s1340_s21 = smov (!%p243_p4, %s920_s21), 15  ;;  %s1342_s15 = smov (!%p265_p5, %s1124_s15), 1 }
   0xf   : > { %s1050_s8 = smul.u32 12, %s1340_s21  ;;  %v287_v52 = vld [vmem:[#allocation2 + $0x10] sm:$0xff]  ;;  %s923_s13 = sshll.u32 %s1340_s21, 2 }
  0x10   : > { %981 = vmatpush3.bf16.msra.mxu0 %v1081_v5  ;;  %1044 = vmatpush3.bf16.msra.mxu1 %v1081_v5  ;;  %v285_v46 = vld [vmem:[#allocation2] sm:$0xff]  ;;  %s1275_s20 = scalar_lea.vmem %s1332_s2, %s923_s13  ;;  %s267_s23 = scalar_lea.vmem %s1333_s3, %s1342_s15 }
  0x11   : > { %982 = vmatprep.subr.bf16.mxu0 %v1082_v6  ;;  %1037 = vmatprep.subr.bf16.mxu1 %v1082_v6  ;;  %s1214_s19 = scalar_lea.vmem %s1330_s0, %s1050_s8  ;;  %v286_v54 = vld [vmem:[#allocation2 + $0x8] sm:$0xff]  ;;  %s270_s26 = scalar_lea.vmem %s1334_s4, %s1342_s15 }
  0x12   : > { %v1094_v11 = vld [vmem:[%s1214_s19 + $0x4] ss:$12 sps:$4 sm:$0xff]   ;;  %v1097_v12 = vld [vmem:[%s1214_s19 + $0x4c] ss:$12 sps:$4 sm:$0xff]   ;;  %v1095_v20 = vld [vmem:[%s1214_s19 + $0x48] ss:$12 sps:$4 sm:$0xff]  }
  0x13   : > { %558 = vmatprep.mubr.bf16.mxu0 %v1094_v11  ;;  %582 = vmatprep.mubr.bf16.mxu1 %v1097_v12  ;;  %v1092_v19 = vld [vmem:[%s1214_s19] ss:$12 sps:$4 sm:$0xff]   ;;  %v1100_v21 = vld [vmem:[%s1214_s19 + $0x1c] ss:$12 sps:$4 sm:$0xff]   ;;  %v1103_v24 = vld [vmem:[%s1214_s19 + $0x18] ss:$12 sps:$4 sm:$0xff]  }
  0x14   : > { %983 = vmatpush3.bf16.msra.mxu0 %v1083_v7  ;;  %1045 = vmatpush3.bf16.msra.mxu1 %v1083_v7  ;;  %v1102_v23 = vld [vmem:[%s1214_s19 + $0x8] ss:$12 sps:$4 sm:$0xff]   ;;  %v1104_v25 = vld [vmem:[%s1214_s19 + $0x20] ss:$12 sps:$4 sm:$0xff]   ;;  %v1107_v27 = vld [vmem:[%s1214_s19 + $0x38] ss:$12 sps:$4 sm:$0xff]  }
  0x15   : > { %984 = vmatprep.subr.bf16.mxu0 %v1084_v8  ;;  %1038 = vmatprep.subr.bf16.mxu1 %v1084_v8  ;;  %v1105_v26 = vld [vmem:[%s1214_s19 + $0x34] ss:$12 sps:$4 sm:$0xff]   ;;  %v1108_v28 = vld [vmem:[%s1214_s19 + $0x30] ss:$12 sps:$4 sm:$0xff]  }
  0x16   : > { %v1109_v29 = vld [vmem:[%s1214_s19 + $0x50] ss:$12 sps:$4 sm:$0xff]   ;;  %v289_v12 = vld [vmem:[#allocation2 + $0x20] sm:$0xff] }
  0x17   : > { %v288_v60 = vld [vmem:[#allocation2 + $0x18] sm:$0xff]  ;;  %v291_v2 = vld [vmem:[#allocation2 + $0x30] sm:$0xff] }
  0x18   : > { %985 = vmatpush3.bf16.msra.mxu0 %v1085_v9  ;;  %1046 = vmatpush3.bf16.msra.mxu1 %v1085_v9  ;;  %v292_v9 = vld [vmem:[#allocation2 + $0x38] sm:$0xff] }
  0x19   : > { %986 = vmatprep.subr.bf16.mxu0 %v1086_v10  ;;  %1039 = vmatprep.subr.bf16.mxu1 %v1086_v10 }
  0x1c   : > { %987 = vmatpush3.bf16.msra.mxu0 %v1087_v13  ;;  %1047 = vmatpush3.bf16.msra.mxu1 %v1087_v13 }
  0x1d   : > { %988 = vmatprep.subr.bf16.mxu0 %v1088_v14  ;;  %1040 = vmatprep.subr.bf16.mxu1 %v1088_v14 }
  0x20   : > { %989 = vmatpush3.bf16.msra.mxu0 %v1089_v15  ;;  %1048 = vmatpush3.bf16.msra.mxu1 %v1089_v15 }
  0x21   : > { %990 = vmatprep.subr.bf16.mxu0 %v1090_v16  ;;  %1041 = vmatprep.subr.bf16.mxu1 %v1090_v16 }
  0x24   : > { %991 = vmatpush3.bf16.msra.mxu0 %v1091_v17  ;;  %1049 = vmatpush3.bf16.msra.mxu1 %v1091_v17 }
  0x25   : > { %1022 = vmatprep.subr.bf16.mxu1 %v1098_v18 }
  0x27   : > { %559 = vmatmul.mubr.bf16.vlgmr.msra.gmra.mrb[0].mxu0 %v1092_v19  ;;  %583 = vmatmul.mubr.bf16.vlgmr.msra.gmra.mrb[0].mxu1 %v1095_v20 }
  0x28   : > { %1023 = vmatpush3.bf16.msra.mxu1 %v1098_v18  ;;  %566 = vmatprep.mubr.bf16.mxu0 %v1100_v21 }
  0x29   : > { %1024 = vmatprep.subr.bf16.mxu1 %v1099_v22  ;;  %1026 = vmatprep.mubr.msk.bf16.mxu1 %vm513_vm0, %v1102_v23 }
  0x2c   : > { %1025 = vmatpush3.bf16.msra.mxu1 %v1099_v22  ;;  %v290_v22 = vld [vmem:[#allocation2 + $0x28] sm:$0xff] }
  0x2f   : > { %567 = vmatmul.mubr.bf16.gmra.mrb[4].mxu0 %v1103_v24  ;;  %1027 = vmatmul.mubr.msk.bf16.vlgmr.msra.gmra.mrb[4].mxu1 %vm513_vm0, %v1104_v25 }
  0x30   : > { %574 = vmatprep.mubr.bf16.mxu0 %v1105_v26  ;;  %1030 = vmatprep.mubr.msk.bf16.mxu1 %vm513_vm0, %v1107_v27 }
  0x37   : > { %575 = vmatmul.mubr.bf16.gmra.mrb[8].mxu0 %v1108_v28  ;;  %1031 = vmatmul.mubr.msk.bf16.gmra.mrb[8].mxu1 %vm513_vm0, %v1109_v29 }
  0xfa   : > { %v992_v31 = vpop.f32.mrb[0].mxu0  ;;  %v1010_v32 = vpop.f32.mrb[0].mxu1 }
  0xfb   : > { %v993_v33 = vpop.f32.mrb[1].mxu0  ;;  %v1011_v34 = vpop.f32.mrb[1].mxu1 }
  0xfc   : > { %v994_v35 = vadd.f32 %v993_v33, %v992_v31  ;;  %v1012_v36 = vadd.f32 %v1011_v34, %v1010_v32  ;;  %v995_v37 = vpop.f32.mrb[2].mxu0  ;;  %v1013_v38 = vpop.f32.mrb[2].mxu1 }
  0xfd   : > { %v996_v39 = vpop.f32.mrb[3].mxu0  ;;  %v1014_v40 = vpop.f32.mrb[3].mxu1 }
  0xfe   : > { %v997_v41 = vadd.f32 %v996_v39, %v995_v37  ;;  %v1015_v42 = vadd.f32 %v1014_v40, %v1013_v38 }
 0x102   : > { %v998_v43 = vpop.f32.mrb[4].mxu0  ;;  %v1028_v44 = vpop.f32.mrb[4].mxu1 }
 0x103   : > { %v999_v45 = vpop.f32.mrb[5].mxu0  ;;  %v625_v47 = vpop.f32.mrb[5].mxu1 }
 0x104   : > { %v1000_v48 = vadd.f32 %v999_v45, %v998_v43  ;;  %v626_v49 = vadd.f32 %v994_v35, %v625_v47  ;;  %v1001_v50 = vpop.f32.mrb[6].mxu0  ;;  %v1029_v51 = vpop.f32.mrb[6].mxu1 }
 0x105   : > { %v1002_v53 = vpop.f32.mrb[7].mxu0  ;;  %v628_v55 = vpop.f32.mrb[7].mxu1 }
 0x106   : > { %v634_v56 = vadd.f32 %v1028_v44, %v1000_v48  ;;  %v656_v57 = vadd.f32 %v626_v49, %v285_v46  ;;  %v1003_v58 = vadd.f32 %v1002_v53, %v1001_v50  ;;  %v629_v59 = vadd.f32 %v997_v41, %v628_v55 }
 0x108   : > { %v658_v61 = vadd.f32 %v634_v56, %v287_v52  ;;  %665 = vst.msk [vmem:[#allocation2] sm:$0xff] %vm276_vm1, %v656_v57  ;;  %v637_v62 = vadd.f32 %v1029_v51, %v1003_v58  ;;  %v657_v63 = vadd.f32 %v629_v59, %v286_v54 }
 0x10a   : > { %667 = vst.msk [vmem:[#allocation2 + $0x10] sm:$0xff] %vm276_vm1, %v658_v61  ;;  %v659_v0 = vadd.f32 %v637_v62, %v288_v60  ;;  %666 = vst.msk [vmem:[#allocation2 + $0x8] sm:$0xff] %vm276_vm1, %v657_v63  ;;  %v1004_v1 = vpop.f32.mrb[8].mxu0  ;;  %v1032_v3 = vpop.f32.mrb[8].mxu1 }
 0x10b   : > { %v650_v4 = vadd.f32 %v1032_v3, %v1012_v36  ;;  %v1005_v5 = vpop.f32.mrb[9].mxu0  ;;  %v641_v6 = vpop.f32.mrb[9].mxu1 }
 0x10c   : > { %668 = vst.msk [vmem:[#allocation2 + $0x18] sm:$0xff] %vm276_vm1, %v659_v0  ;;  %v1006_v7 = vadd.f32 %v1005_v5, %v1004_v1  ;;  %v1007_v8 = vpop.f32.mrb[10].mxu0  ;;  %v1033_v10 = vpop.f32.mrb[10].mxu1 }
 0x10d   : > { %v662_v11 = vadd.f32 %v650_v4, %v291_v2  ;;  %v653_v13 = vadd.f32 %v1033_v10, %v1015_v42  ;;  %v1008_v14 = vpop.f32.mrb[11].mxu0  ;;  %v644_v15 = vpop.f32.mrb[11].mxu1 }
 0x10e   : > { %v642_v16 = vadd.f32 %v1006_v7, %v641_v6  ;;  %v1009_v17 = vadd.f32 %v1008_v14, %v1007_v8 }
 0x10f   : > { %v676_v18 = vld [vmem:[#allocation2] sm:$0xff]  ;;  %671 = vst.msk [vmem:[#allocation2 + $0x30] sm:$0xff] %vm276_vm1, %v662_v11  ;;  %v663_v19 = vadd.f32 %v653_v13, %v292_v9 }
 0x110   : > { %v968_v20 = vpack.c.bf16 %v676_v18, %v676_v18  ;;  %v660_v21 = vadd.f32 %v642_v16, %v289_v12  ;;  %v707_v24 = vmul.f32 %v676_v18, %v676_v18  ;;  %v645_v26 = vadd.f32 %v1009_v17, %v644_v15 }
 0x111   : > { %v678_v23 = vld [vmem:[#allocation2 + $0x10] sm:$0xff]  ;;  %v677_v25 = vld [vmem:[#allocation2 + $0x8] sm:$0xff]  ;;  %672 = vst.msk [vmem:[#allocation2 + $0x38] sm:$0xff] %vm276_vm1, %v663_v19  ;;  %v684_v34 = vsel %vm276_vm1, %v676_v18, 0.0 }
 0x112   : > { %v709_v27 = vmul.f32 %v678_v23, %v678_v23  ;;  %v970_v28 = vpack.c.bf16 %v678_v23, %v678_v23  ;;  %770 = vst.msk [vmem:[%s1275_s20] sm:$0xf] %vm769_vm2, %v968_v20  ;;  %v685_v30 = vsel %vm276_vm1, %v677_v25, 0.0  ;;  %v708_v31 = vmul.f32 %v677_v25, %v677_v25 }
 0x113   : > { %669 = vst.msk [vmem:[#allocation2 + $0x20] sm:$0xff] %vm276_vm1, %v660_v21  ;;  %v679_v29 = vld [vmem:[#allocation2 + $0x18] sm:$0xff]  ;;  %v969_v32 = vpack.c.bf16 %v677_v25, %v677_v25  ;;  %v661_v33 = vadd.f32 %v645_v26, %v290_v22  ;;  %v715_v36 = vsel %vm276_vm1, %v707_v24, 0.0  ;;  %v686_v37 = vadd.f32 %v685_v30, %v684_v34 }
 0x114   : > { %772 = vst.msk [vmem:[%s1275_s20 + $0x8] sm:$0xf] %vm769_vm2, %v970_v28  ;;  %v971_v35 = vpack.c.bf16 %v679_v29, %v679_v29  ;;  %v716_v38 = vsel %vm276_vm1, %v708_v31, 0.0  ;;  %v687_v39 = vsel %vm276_vm1, %v678_v23, 0.0  ;;  %v710_v40 = vmul.f32 %v679_v29, %v679_v29 }
 0x115   : > { %771 = vst.msk [vmem:[%s1275_s20 + $0x4] sm:$0xf] %vm769_vm2, %v969_v32  ;;  %v717_v41 = vadd.f32 %v716_v38, %v715_v36  ;;  %v718_v43 = vsel %vm276_vm1, %v709_v27, 0.0  ;;  %v688_v44 = vadd.f32 %v687_v39, %v686_v37  ;;  %v689_v46 = vsel %vm276_vm1, %v679_v29, 0.0 }
 0x116   : > { %670 = vst.msk [vmem:[#allocation2 + $0x28] sm:$0xff] %vm276_vm1, %v661_v33  ;;  %v682_v42 = vld [vmem:[#allocation2 + $0x30] sm:$0xff]  ;;  %v720_v51 = vsel %vm276_vm1, %v710_v40, 0.0 }
 0x117   : > { %773 = vst.msk [vmem:[%s1275_s20 + $0xc] sm:$0xf] %vm769_vm2, %v971_v35  ;;  %v974_v45 = vpack.c.bf16 %v682_v42, %v682_v42  ;;  %v719_v47 = vadd.f32 %v718_v43, %v717_v41  ;;  %v690_v50 = vadd.f32 %v689_v46, %v688_v44  ;;  %v713_v58 = vmul.f32 %v682_v42, %v682_v42 }
 0x118   : > { %v683_v48 = vld [vmem:[#allocation2 + $0x38] sm:$0xff]  ;;  %v695_v2 = vsel %vm276_vm1, %v682_v42, 0.0 }
 0x119   : > { %776 = vst.msk [vmem:[%s1275_s20 + $0x18] sm:$0xf] %vm769_vm2, %v974_v45  ;;  %v721_v56 = vadd.f32 %v720_v51, %v719_v47  ;;  %v975_v57 = vpack.c.bf16 %v683_v48, %v683_v48  ;;  %v714_v3 = vmul.f32 %v683_v48, %v683_v48  ;;  %v726_v7 = vsel %vm276_vm1, %v713_v58, 0.0 }
 0x11a   : > { %v680_v49 = vld [vmem:[#allocation2 + $0x20] sm:$0xff]  ;;  %v697_v8 = vsel %vm276_vm1, %v683_v48, 0.0 }
 0x11b   : > { %v691_v52 = vsel %vm276_vm1, %v680_v49, 0.0  ;;  %v711_v53 = vmul.f32 %v680_v49, %v680_v49  ;;  %v972_v54 = vpack.c.bf16 %v680_v49, %v680_v49  ;;  %777 = vst.msk [vmem:[%s1275_s20 + $0x1c] sm:$0xf] %vm769_vm2, %v975_v57  ;;  %v728_v11 = vsel %vm276_vm1, %v714_v3, 0.0 }
 0x11c   : > { %v692_v55 = vadd.f32 %v691_v52, %v690_v50 }
 0x11d   : > { %v722_v59 = vsel %vm276_vm1, %v711_v53, 0.0  ;;  %774 = vst.msk [vmem:[%s1275_s20 + $0x10] sm:$0xf] %vm769_vm2, %v972_v54  ;;  %v681_v60 = vld [vmem:[#allocation2 + $0x28] sm:$0xff] }
 0x11e   : > { %v723_v61 = vadd.f32 %v722_v59, %v721_v56  ;;  %v693_v62 = vsel %vm276_vm1, %v681_v60, 0.0  ;;  %v712_v63 = vmul.f32 %v681_v60, %v681_v60  ;;  %v973_v0 = vpack.c.bf16 %v681_v60, %v681_v60 }
 0x11f   : > { %v694_v1 = vadd.f32 %v693_v62, %v692_v55 }
 0x120   : > { %v724_v4 = vsel %vm276_vm1, %v712_v63, 0.0  ;;  %775 = vst.msk [vmem:[%s1275_s20 + $0x14] sm:$0xf] %vm769_vm2, %v973_v0 }
 0x121   : > { %v696_v5 = vadd.f32 %v695_v2, %v694_v1  ;;  %v725_v6 = vadd.f32 %v724_v4, %v723_v61 }
 0x123   : > { %v698_v9 = vadd.f32 %v697_v8, %v696_v5  ;;  %v727_v10 = vadd.f32 %v726_v7, %v725_v6 }
 0x125   : > { %v699_v12 = vrot.slane %v698_v9, 4  ;;  %v729_v13 = vadd.f32 %v728_v11, %v727_v10 }
 0x127   : > { %v700_v14 = vadd.f32 %v699_v12, %v698_v9  ;;  %v730_v15 = vrot.slane %v729_v13, 4 }
 0x129   : > { %v701_v16 = vrot.slane %v700_v14, 2  ;;  %v731_v17 = vadd.f32 %v730_v15, %v729_v13 }
 0x12b   : > { %v702_v18 = vadd.f32 %v701_v16, %v700_v14  ;;  %v732_v19 = vrot.slane %v731_v17, 2 }
 0x12d   : > { %v703_v20 = vrot.slane %v702_v18, 1  ;;  %v733_v21 = vadd.f32 %v732_v19, %v731_v17 }
 0x12f   : > { %v704_v22 = vadd.f32 %v703_v20, %v702_v18  ;;  %v734_v23 = vrot.slane %v733_v21, 1 }
 0x131   : > { %706 = vst.msk [vmem:[%s267_s23] sm:$0x1] %vm705_vm3, %v704_v22  ;;  %v735_v24 = vadd.f32 %v734_v23, %v733_v21 }
 0x133   : > { %736 = vst.msk [vmem:[%s270_s26] sm:$0x1] %vm705_vm3, %v735_v24 }
 0x134 PF: > { %s15_s17 = sadd.s32 1, %s1132_s17   ;;  %s1335_s15 = smov %s1128_s16 }
 0x135   : > { %p12_p6 = scmp.ge.s32.totalorder %s15_s17, 4   ;;  %s1336_s16 = smov %s1338_s18 }
 0x137   :  { %14 = sbr.rel (!%p12_p6) target bundleno = 2 (0x2), region = 93 }

// kernel: conv_generator_forward.14
= control target key start
LH: loop header
LB: loop body
LE: loop exit
PB: predicated region body
PF: predicated region fallthrough
CT: control target
= control target key end

     0   :  { %s361_s12 = smov 0   ;;  %s384_s0 = inlined_call_operand.vmem [shape: bf16[64,128], index: 0, kind: input, shape index: {}]   ;;  %s385_s1 = inlined_call_operand.vmem [shape: f32[1,128], index: 1, kind: input, shape index: {}]   ;;  %s386_s2 = inlined_call_operand.vmem [shape: f32[1,128], index: 2, kind: input, shape index: {}]   ;;  %s387_s3 = inlined_call_operand.vmem [shape: bf16[64,128], index: 3, kind: output, shape index: {}]  }
   0x1 LB: > { %s284_s13 = sadd.s32 4294967295, %s339_s12   ;;  %p288_p0 = scmp.ge.s32.totalorder %s339_s12, 1  ;;  %s339_s12 = sphi %s361_s12, %s13_s12  }
   0x2   : > { %p138_p1 = scmp.lt.s32.totalorder %s339_s12, 3 }
   0x4   : > { %p139_p2 = pnand %p288_p0, %p138_p1 }
   0x5   : > { %s289_s14 = sshll.u32 (!%p139_p2), %s284_s13, 2  ;;  %v293_v2 = vld [vmem:[%s385_s1] ss:$0 sm:$0xff] (!%p139_p2) }
   0x6   : > { %142 = sbr.rel (%p139_p2) target bundleno = 28 (0x1c), region = 32  ;;  %p163_p3 = scmp.lt.s32.totalorder (!%p139_p2), %s289_s14, 7  ;;  %v294_v7 = vld [vmem:[%s386_s2] ss:$0 sm:$0xff] (!%p139_p2) }
   0xd   : > { %s389_s14 = smov (!%p163_p3, %s289_s14), 7 }
   0xe   : > { %s290_s15 = sshll.u32 %s389_s14, 2 }
   0xf   : > { %s166_s18 = scalar_lea.vmem %s384_s0, %s290_s15  ;;  %s172_s25 = scalar_lea.vmem %s387_s3, %s290_s15 }
  0x10   : > { %v306_v0 = vld [vmem:[%s166_s18] sm:$0xff]   ;;  %v323_v1 = vld [vmem:[%s166_s18 + $0x8] sm:$0xff]  }
  0x11   : > { %v307_v3 = vunpack.c.l.bf16 %v306_v0  ;;  %v308_v4 = vunpack.c.h.bf16 %v306_v0  ;;  %v311_v5 = vunpack.c.l.bf16 %v323_v1  ;;  %v312_v6 = vunpack.c.h.bf16 %v323_v1 }
  0x13   : > { %v189_v8 = vmul.f32 %v307_v3, %v293_v2  ;;  %v190_v9 = vmul.f32 %v308_v4, %v293_v2  ;;  %v191_v10 = vmul.f32 %v311_v5, %v293_v2  ;;  %v192_v11 = vmul.f32 %v312_v6, %v293_v2 }
  0x15   : > { %v200_v12 = vadd.f32 %v294_v7, %v189_v8  ;;  %v201_v13 = vadd.f32 %v294_v7, %v190_v9  ;;  %v202_v14 = vadd.f32 %v294_v7, %v191_v10  ;;  %v203_v15 = vadd.f32 %v294_v7, %v192_v11 }
  0x17   : > { %v204_v16 = vmax.f32 %v200_v12, 0.0  ;;  %v205_v17 = vmax.f32 %v201_v13, 0.0  ;;  %v206_v18 = vmax.f32 %v202_v14, 0.0  ;;  %v207_v19 = vmax.f32 %v203_v15, 0.0 }
  0x19   : > { %v316_v20 = vpack.c.bf16 %v205_v17, %v204_v16  ;;  %v321_v21 = vpack.c.bf16 %v207_v19, %v206_v18 }
  0x1b   : > { %317 = vst [vmem:[%s172_s25] sm:$0xff] %v316_v20   ;;  %324 = vst [vmem:[%s172_s25 + $0x8] sm:$0xff] %v321_v21  }
  0x1c PF: > { %s13_s12 = sadd.s32 1, %s339_s12  }
  0x1d   : > { %p10_p4 = scmp.ge.s32.totalorder %s13_s12, 4  }
  0x1f   :  { %12 = sbr.rel (!%p10_p4) target bundleno = 1 (0x1), region = 62 }

// kernel: tile.73
= control target key start
LH: loop header
LB: loop body
LE: loop exit
PB: predicated region body
PF: predicated region fallthrough
CT: control target
= control target key end

     0   :  { %s28_s0 = inlined_call_operand.vmem [shape: f32[8], index: 0, kind: input, shape index: {}]   ;;  %s29_s1 = inlined_call_operand.vmem [shape: f32[16,8], index: 1, kind: output, shape index: {}]  }
   0x1   :  { %v4_v0 = vld [vmem:[%s28_s0] ss:$0 sm:$0xff] }
   0x2   :  { %5 = vst [vmem:[%s29_s1] sm:$0xff] %v4_v0  ;;  %8 = vst [vmem:[%s29_s1 + $0x8] sm:$0xff] %v4_v0 }

// kernel: tile.74
= control target key start
LH: loop header
LB: loop body
LE: loop exit
PB: predicated region body
PF: predicated region fallthrough
CT: control target
= control target key end

     0   :  { %s131_s10 = smov 120   ;;  %s132_s11 = smov 104   ;;  %vm3_vm0 = vcmask 64512   ;;  %vm9_vm1 = vcmask 1048512   ;;  %vm15_vm2 = vcmask 982912   ;;  %vm21_vm3 = vcmask 917312   ;;  %s207_s0 = inlined_call_operand.vmem [shape: f32[16,8], index: 0, kind: input, shape index: {}]   ;;  %s208_s1 = inlined_call_operand.vmem [shape: f32[1,128], index: 1, kind: output, shape index: {}]  }
   0x1   :  { %v101_v0 = vld [vmem:[%s207_s0 + $0xf] sm:$0x1]   ;;  %v103_v1 = vld [vmem:[%s207_s0 + $0xd] sm:$0x1]   ;;  %v102_v2 = vld [vmem:[%s207_s0 + $0xe] sm:$0x1]  }
   0x2   :  { %7 = vrot.lane.b32.xlu0 %v101_v0, %s131_s10  ;;  %19 = vrot.lane.b32.xlu1 %v103_v1, %s132_s11  ;;  %v104_v3 = vld [vmem:[%s207_s0 + $0xc] sm:$0x1]   ;;  %s133_s16 = smov 112   ;;  %s134_s17 = smov 96   ;;  %v105_v4 = vld [vmem:[%s207_s0 + $0xb] sm:$0x1]  }
   0x3   :  { %v106_v5 = vld [vmem:[%s207_s0 + $0xa] sm:$0x1]   ;;  %v2_v6 = vld [vmem:[%s207_s0] sm:$0x1]   ;;  %s135_s24 = smov 88   ;;  %s136_s25 = smov 80  }
   0x4   :  { %4 = vst.msk [vmem:[#allocation0] sm:$0x1] %vm3_vm0, %v2_v6   ;;  %v107_v7 = vld [vmem:[%s207_s0 + $0x9] sm:$0x1]   ;;  %v108_v8 = vld [vmem:[%s207_s0 + $0x8] sm:$0x1]  }
   0x5   :  { %s137_s30 = smov 72   ;;  %s138_s2 = smov 64   ;;  %v109_v9 = vld [vmem:[%s207_s0 + $0x7] sm:$0x1]   ;;  %v110_v10 = vld [vmem:[%s207_s0 + $0x6] sm:$0x1]  }
   0x6   :  { %13 = vrot.lane.b32.xlu0 %v102_v2, %s133_s16  ;;  %25 = vrot.lane.b32.xlu1 %v104_v3, %s134_s17  ;;  %s139_s7 = smov 56   ;;  %s140_s8 = smov 48   ;;  %v111_v11 = vld [vmem:[%s207_s0 + $0x5] sm:$0x1]   ;;  %v112_v12 = vld [vmem:[%s207_s0 + $0x4] sm:$0x1]  }
   0x7   :  { %s141_s13 = smov 40   ;;  %s142_s14 = smov 32   ;;  %v113_v13 = vld [vmem:[%s207_s0 + $0x3] sm:$0x1]   ;;  %v114_v14 = vld [vmem:[%s207_s0 + $0x2] sm:$0x1]  }
   0x8   :  { %s143_s19 = smov 24   ;;  %s144_s20 = smov 16   ;;  %v115_v15 = vld [vmem:[%s207_s0 + $0x1] sm:$0x1]   ;;  %vm27_vm4 = vcmask 851712   ;;  %vm33_vm5 = vcmask 786112  }
   0x9   :  { %s145_s0 = smov 8   ;;  %vm39_vm6 = vcmask 720512   ;;  %vm45_vm7 = vcmask 654912   ;;  %vm51_vm8 = vcmask 589312   ;;  %vm57_vm9 = vcmask 523712  }
   0xa   :  { %31 = vrot.lane.b32.xlu0 %v105_v4, %s135_s24  ;;  %37 = vrot.lane.b32.xlu1 %v106_v5, %s136_s25  ;;  %vm63_vm10 = vcmask 458112   ;;  %vm69_vm11 = vcmask 392512   ;;  %vm75_vm12 = vcmask 326912   ;;  %vm81_vm13 = vcmask 261312  }
   0xb   :  { %vm87_vm14 = vcmask 195712   ;;  %vm93_vm15 = vcmask 130112  }
   0xe   :  { %43 = vrot.lane.b32.xlu0 %v107_v7, %s137_s30  ;;  %49 = vrot.lane.b32.xlu1 %v108_v8, %s138_s2 }
  0x12   :  { %55 = vrot.lane.b32.xlu0 %v109_v9, %s139_s7  ;;  %61 = vrot.lane.b32.xlu1 %v110_v10, %s140_s8 }
  0x16   :  { %67 = vrot.lane.b32.xlu0 %v111_v11, %s141_s13  ;;  %73 = vrot.lane.b32.xlu1 %v112_v12, %s142_s14 }
  0x1a   :  { %79 = vrot.lane.b32.xlu0 %v113_v13, %s143_s19  ;;  %85 = vrot.lane.b32.xlu1 %v114_v14, %s144_s20 }
  0x1e   :  { %91 = vrot.lane.b32.xlu0 %v115_v15, %s145_s0 }
  0x74   :  { %v8_v16 = vpop.permute.xlu0 %7   ;;  %v20_v17 = vpop.permute.xlu1 %19  }
  0x75   :  { %10 = vst.msk [vmem:[#allocation0] sm:$0x1] %vm9_vm1, %v8_v16  }
  0x78   :  { %v14_v18 = vpop.permute.xlu0 %13   ;;  %v26_v19 = vpop.permute.xlu1 %25  }
  0x79   :  { %16 = vst.msk [vmem:[#allocation0] sm:$0x1] %vm15_vm2, %v14_v18  }
  0x7a   :  { %22 = vst.msk [vmem:[#allocation0] sm:$0x1] %vm21_vm3, %v20_v17  }
  0x7b   :  { %28 = vst.msk [vmem:[#allocation0] sm:$0x1] %vm27_vm4, %v26_v19  }
  0x7c   :  { %v32_v20 = vpop.permute.xlu0 %31   ;;  %v38_v21 = vpop.permute.xlu1 %37  }
  0x7d   :  { %34 = vst.msk [vmem:[#allocation0] sm:$0x1] %vm33_vm5, %v32_v20  }
  0x7e   :  { %40 = vst.msk [vmem:[#allocation0] sm:$0x1] %vm39_vm6, %v38_v21  }
  0x80   :  { %v44_v22 = vpop.permute.xlu0 %43   ;;  %v50_v23 = vpop.permute.xlu1 %49  }
  0x81   :  { %46 = vst.msk [vmem:[#allocation0] sm:$0x1] %vm45_vm7, %v44_v22  }
  0x82   :  { %52 = vst.msk [vmem:[#allocation0] sm:$0x1] %vm51_vm8, %v50_v23  }
  0x84   :  { %v56_v24 = vpop.permute.xlu0 %55   ;;  %v62_v25 = vpop.permute.xlu1 %61  }
  0x85   :  { %58 = vst.msk [vmem:[#allocation0] sm:$0x1] %vm57_vm9, %v56_v24  }
  0x86   :  { %64 = vst.msk [vmem:[#allocation0] sm:$0x1] %vm63_vm10, %v62_v25  }
  0x88   :  { %v68_v26 = vpop.permute.xlu0 %67   ;;  %v74_v27 = vpop.permute.xlu1 %73  }
  0x89   :  { %70 = vst.msk [vmem:[#allocation0] sm:$0x1] %vm69_vm11, %v68_v26  }
  0x8a   :  { %76 = vst.msk [vmem:[#allocation0] sm:$0x1] %vm75_vm12, %v74_v27  }
  0x8c   :  { %v80_v28 = vpop.permute.xlu0 %79   ;;  %v86_v29 = vpop.permute.xlu1 %85  }
  0x8d   :  { %82 = vst.msk [vmem:[#allocation0] sm:$0x1] %vm81_vm13, %v80_v28  }
  0x8e   :  { %88 = vst.msk [vmem:[#allocation0] sm:$0x1] %vm87_vm14, %v86_v29  }
  0x90   :  { %v92_v30 = vpop.permute.xlu0 %91  }
  0x91   :  { %94 = vst.msk [vmem:[#allocation0] sm:$0x1] %vm93_vm15, %v92_v30  }
  0x98   :  { %v98_v31 = vld [vmem:[#allocation0] sm:$0x1] }
  0x99   :  { %100 = vst [vmem:[%s208_s1] sm:$0x1] %v98_v31 }

// kernel: conv_generator_forward.15
= control target key start
LH: loop header
LB: loop body
LE: loop exit
PB: predicated region body
PF: predicated region fallthrough
CT: control target
= control target key end

     0   :  { %s1656_s15 = smov 0   ;;  %s1658_s16 = smov 0   ;;  %s2112_s0 = inlined_call_operand.vmem [shape: bf16[512,144], index: 0, kind: input, shape index: {}]   ;;  %s2113_s1 = inlined_call_operand.vmem [shape: bf16[144,32], index: 1, kind: input, shape index: {}]   ;;  %s2114_s2 = inlined_call_operand.vmem [shape: bf16[512,32], index: 2, kind: output, shape index: {0}]   ;;  %s2115_s3 = inlined_call_operand.vmem [shape: f32[2,1,32], index: 3, kind: output, shape index: {1}]   ;;  %s2116_s4 = inlined_call_operand.vmem [shape: f32[2,1,32], index: 4, kind: output, shape index: {2}]  }
   0x1   :  { %s1660_s17 = smov 0  }
   0x2 LB: > { %s27_s18 = sadd.s32 1, %s1623_s16  ;;  %p1374_p0 = scmp.ge.s32.totalorder %s1627_s17, 1  ;;  %s1627_s17 = sphi %s1660_s17, %s15_s17   ;;  %s1623_s16 = sphi %s1658_s16, %s2118_s16   ;;  %s1619_s15 = sphi %s1656_s15, %s2117_s15  }
   0x3   : > { %p29_p1 = scmp.ge.s32.totalorder %s27_s18, 2  ;;  %p199_p2 = scmp.lt.s32.totalorder %s1627_s17, 3 }
   0x5   : > { %s2120_s18 = smov (%p29_p1, %s27_s18), 0  ;;  %p200_p3 = pnand %p1374_p0, %p199_p2 }
   0x6   : > { %v1548_v0 = vld [vmem:[%s2113_s1] sm:$0xff] (!%p200_p3)   ;;  %v1629_v1 = vmov (!%p200_p3), 0   ;;  %s1375_s21 = sshll.u32 (!%p200_p3), %s1619_s15, 5  ;;  %v1549_v2 = vld [vmem:[%s2113_s1 + $0x8] sm:$0xff] (!%p200_p3)   ;;  %v1550_v3 = vld [vmem:[%s2113_s1 + $0x10] sm:$0xff] (!%p200_p3)   ;;  %vm276_vm0 = vcmask (!%p200_p3), 261120  }
   0x7   : > { %203 = sbr.rel (%p200_p3) target bundleno = 374 (0x176), region = 28  ;;  %638 = vmatprep.subr.bf16.mxu0 (!%p200_p3), %v1629_v1  ;;  %1504 = vmatprep.subr.bf16.mxu1 (!%p200_p3), %v1629_v1  ;;  %p243_p4 = scmp.lt.s32.totalorder (!%p200_p3), %s1375_s21, 63  ;;  %v1551_v4 = vld [vmem:[%s2113_s1 + $0x18] sm:$0xff] (!%p200_p3)   ;;  %vm589_vm1 = vcmask (!%p200_p3), 130048   ;;  %v1630_v5 = vmov (!%p200_p3), 0.0   ;;  %v1552_v7 = vld [vmem:[%s2113_s1 + $0x20] sm:$0xff] (!%p200_p3)  }
   0x8   : > { %639 = vmatpush1.bf16.msra.mxu0 (!%p200_p3), %v1548_v0  ;;  %1513 = vmatpush1.bf16.msra.mxu1 (!%p200_p3), %v1548_v0  ;;  %277 = vst.msk [vmem:[#allocation2] sm:$0xff] (!%p200_p3), %vm276_vm0, %v1630_v5  ;;  %278 = vst.msk [vmem:[#allocation2 + $0x8] sm:$0xff] (!%p200_p3), %vm276_vm0, %v1630_v5  ;;  %v1553_v9 = vld [vmem:[%s2113_s1 + $0x28] sm:$0xff] (!%p200_p3)   ;;  %v1554_v10 = vld [vmem:[%s2113_s1 + $0x30] sm:$0xff] (!%p200_p3)   ;;  %vm1200_vm2 = vcmask (!%p200_p3), 257024   ;;  %p265_p5 = scmp.lt.s32.totalorder (!%p200_p3), %s1619_s15, 1 }
   0x9   : > { %640 = vmatprep.subr.bf16.mxu0 (!%p200_p3), %v1629_v1  ;;  %1505 = vmatprep.subr.bf16.mxu1 (!%p200_p3), %v1629_v1  ;;  %279 = vst.msk [vmem:[#allocation2 + $0x10] sm:$0xff] (!%p200_p3), %vm276_vm0, %v1630_v5  ;;  %280 = vst.msk [vmem:[#allocation2 + $0x18] sm:$0xff] (!%p200_p3), %vm276_vm0, %v1630_v5  ;;  %v1555_v11 = vld [vmem:[%s2113_s1 + $0x38] sm:$0xff] (!%p200_p3)   ;;  %v1556_v12 = vld [vmem:[%s2113_s1 + $0x40] sm:$0xff] (!%p200_p3)   ;;  %vm968_vm3 = vcmask (!%p200_p3), 253952  }
   0xa   : > { %281 = vst.msk [vmem:[#allocation2 + $0x20] sm:$0xff] (!%p200_p3), %vm276_vm0, %v1630_v5  ;;  %282 = vst.msk [vmem:[#allocation2 + $0x28] sm:$0xff] (!%p200_p3), %vm276_vm0, %v1630_v5 }
   0xb   : > { %283 = vst.msk [vmem:[#allocation2 + $0x30] sm:$0xff] (!%p200_p3), %vm276_vm0, %v1630_v5  ;;  %284 = vst.msk [vmem:[#allocation2 + $0x38] sm:$0xff] (!%p200_p3), %vm276_vm0, %v1630_v5 }
   0xc   : > { %641 = vmatpush1.bf16.msra.mxu0 (!%p200_p3), %v1549_v2  ;;  %1514 = vmatpush1.bf16.msra.mxu1 (!%p200_p3), %v1549_v2  ;;  %285 = vst.msk [vmem:[#allocation2 + $0x40] sm:$0xff] (!%p200_p3), %vm276_vm0, %v1630_v5  ;;  %286 = vst.msk [vmem:[#allocation2 + $0x48] sm:$0xff] (!%p200_p3), %vm276_vm0, %v1630_v5 }
   0xd   : > { %642 = vmatprep.subr.bf16.mxu0 (!%p200_p3), %v1629_v1  ;;  %1506 = vmatprep.subr.bf16.mxu1 (!%p200_p3), %v1629_v1  ;;  %287 = vst.msk [vmem:[#allocation2 + $0x50] sm:$0xff] (!%p200_p3), %vm276_vm0, %v1630_v5  ;;  %288 = vst.msk [vmem:[#allocation2 + $0x58] sm:$0xff] (!%p200_p3), %vm276_vm0, %v1630_v5 }
   0xe   : > { %s2122_s21 = smov (!%p243_p4, %s1375_s21), 63  ;;  %289 = vst.msk [vmem:[#allocation2 + $0x60] sm:$0xff] %vm276_vm0, %v1630_v5  ;;  %290 = vst.msk [vmem:[#allocation2 + $0x68] sm:$0xff] %vm276_vm0, %v1630_v5  ;;  %s2124_s15 = smov (!%p265_p5, %s1619_s15), 1 }
   0xf   : > { %s1471_s26 = sshll.u32 %s2122_s21, 3  ;;  %291 = vst.msk [vmem:[#allocation2 + $0x70] sm:$0xff] %vm276_vm0, %v1630_v5  ;;  %292 = vst.msk [vmem:[#allocation2 + $0x78] sm:$0xff] %vm276_vm0, %v1630_v5  ;;  %v309_v43 = vld [vmem:[#allocation2] sm:$0xff]  ;;  %v310_v46 = vld [vmem:[#allocation2 + $0x8] sm:$0xff]  ;;  %s1379_s20 = sshll.u32 %s2122_s21, 2 }
  0x10   : > { %s1697_s29 = scalar_lea.vmem %s2112_s0, %s1471_s26  ;;  %293 = vst.msk [vmem:[#allocation2 + $0x80] sm:$0xff] %vm276_vm0, %v1630_v5  ;;  %294 = vst.msk [vmem:[#allocation2 + $0x88] sm:$0xff] %vm276_vm0, %v1630_v5  ;;  %643 = vmatpush1.bf16.msra.mxu0 %v1550_v3  ;;  %1515 = vmatpush1.bf16.msra.mxu1 %v1550_v3  ;;  %v311_v59 = vld [vmem:[#allocation2 + $0x10] sm:$0xff]  ;;  %v312_v62 = vld [vmem:[#allocation2 + $0x18] sm:$0xff]  ;;  %s1818_s24 = scalar_lea.vmem %s2114_s2, %s1379_s20 }
  0x11   : > { %295 = vst.msk [vmem:[#allocation2 + $0x90] sm:$0xff] %vm276_vm0, %v1630_v5  ;;  %296 = vst.msk [vmem:[#allocation2 + $0x98] sm:$0xff] %vm276_vm0, %v1630_v5  ;;  %v1559_v6 = vld [vmem:[%s1697_s29 + $0x4] ss:$8 sps:$4 sm:$0xff]   ;;  %644 = vmatprep.subr.bf16.mxu0 %v1629_v1  ;;  %1507 = vmatprep.subr.bf16.mxu1 %v1629_v1  ;;  %v1557_v13 = vld [vmem:[%s1697_s29] ss:$8 sps:$4 sm:$0xff]   ;;  %s267_s26 = scalar_lea.vmem %s2115_s3, %s2124_s15 }
  0x12   : > { %297 = vst.msk [vmem:[#allocation2 + $0xa0] sm:$0xff] %vm276_vm0, %v1630_v5  ;;  %298 = vst.msk [vmem:[#allocation2 + $0xa8] sm:$0xff] %vm276_vm0, %v1630_v5  ;;  %1421 = vmatprep.mubr.msk.bf16.mxu0 %vm589_vm1, %v1559_v6  ;;  %v1571_v8 = vld [vmem:[%s1697_s29 + $0x84] ss:$8 sps:$4 sm:$0xff]   ;;  %v1569_v14 = vld [vmem:[%s1697_s29 + $0x80] ss:$8 sps:$4 sm:$0xff]  }
  0x13   : > { %299 = vst.msk [vmem:[#allocation2 + $0xb0] sm:$0xff] %vm276_vm0, %v1630_v5  ;;  %300 = vst.msk [vmem:[#allocation2 + $0xb8] sm:$0xff] %vm276_vm0, %v1630_v5  ;;  %1429 = vmatprep.mubr.msk.bf16.mxu1 %vm589_vm1, %v1571_v8  ;;  %v1560_v15 = vld [vmem:[%s1697_s29 + $0x14] ss:$8 sps:$4 sm:$0xff]   ;;  %v1562_v17 = vld [vmem:[%s1697_s29 + $0x10] ss:$8 sps:$4 sm:$0xff]  }
  0x14   : > { %301 = vst.msk [vmem:[#allocation2 + $0xc0] sm:$0xff] %vm276_vm0, %v1630_v5  ;;  %302 = vst.msk [vmem:[#allocation2 + $0xc8] sm:$0xff] %vm276_vm0, %v1630_v5  ;;  %645 = vmatpush1.bf16.msra.mxu0 %v1551_v4  ;;  %1516 = vmatpush1.bf16.msra.mxu1 %v1551_v4  ;;  %v1575_v16 = vld [vmem:[%s1697_s29 + $0x94] ss:$8 sps:$4 sm:$0xff]   ;;  %v1577_v18 = vld [vmem:[%s1697_s29 + $0x90] ss:$8 sps:$4 sm:$0xff]  }
  0x15   : > { %303 = vst.msk [vmem:[#allocation2 + $0xd0] sm:$0xff] %vm276_vm0, %v1630_v5  ;;  %304 = vst.msk [vmem:[#allocation2 + $0xd8] sm:$0xff] %vm276_vm0, %v1630_v5  ;;  %646 = vmatprep.subr.bf16.mxu0 %v1629_v1  ;;  %1508 = vmatprep.subr.bf16.mxu1 %v1629_v1  ;;  %v1563_v19 = vld [vmem:[%s1697_s29 + $0x24] ss:$8 sps:$4 sm:$0xff]   ;;  %v1565_v21 = vld [vmem:[%s1697_s29 + $0x20] ss:$8 sps:$4 sm:$0xff]  }
  0x16   : > { %305 = vst.msk [vmem:[#allocation2 + $0xe0] sm:$0xff] %vm276_vm0, %v1630_v5  ;;  %306 = vst.msk [vmem:[#allocation2 + $0xe8] sm:$0xff] %vm276_vm0, %v1630_v5  ;;  %v1581_v20 = vld [vmem:[%s1697_s29 + $0xa4] ss:$8 sps:$4 sm:$0xff]   ;;  %v1583_v22 = vld [vmem:[%s1697_s29 + $0xa0] ss:$8 sps:$4 sm:$0xff]  }
  0x17   : > { %307 = vst.msk [vmem:[#allocation2 + $0xf0] sm:$0xff] %vm276_vm0, %v1630_v5  ;;  %308 = vst.msk [vmem:[#allocation2 + $0xf8] sm:$0xff] %vm276_vm0, %v1630_v5  ;;  %v1566_v23 = vld [vmem:[%s1697_s29 + $0x34] ss:$8 sps:$4 sm:$0xff]   ;;  %v1568_v25 = vld [vmem:[%s1697_s29 + $0x30] ss:$8 sps:$4 sm:$0xff]  }
  0x18   : > { %647 = vmatpush1.bf16.msra.mxu0 %v1552_v7  ;;  %1517 = vmatpush1.bf16.msra.mxu1 %v1552_v7  ;;  %v1587_v24 = vld [vmem:[%s1697_s29 + $0xb4] ss:$8 sps:$4 sm:$0xff]   ;;  %v1589_v26 = vld [vmem:[%s1697_s29 + $0xb0] ss:$8 sps:$4 sm:$0xff]   ;;  %v1572_v27 = vld [vmem:[%s1697_s29 + $0x44] ss:$8 sps:$4 sm:$0xff]  }
  0x19   : > { %648 = vmatprep.subr.bf16.mxu0 %v1629_v1  ;;  %1509 = vmatprep.subr.bf16.mxu1 %v1629_v1  ;;  %v1593_v28 = vld [vmem:[%s1697_s29 + $0xc4] ss:$8 sps:$4 sm:$0xff]   ;;  %v1574_v29 = vld [vmem:[%s1697_s29 + $0x40] ss:$8 sps:$4 sm:$0xff]   ;;  %v1578_v31 = vld [vmem:[%s1697_s29 + $0x54] ss:$8 sps:$4 sm:$0xff]  }
  0x1a   : > { %v1595_v30 = vld [vmem:[%s1697_s29 + $0xc0] ss:$8 sps:$4 sm:$0xff]   ;;  %v1596_v32 = vld [vmem:[%s1697_s29 + $0xd4] ss:$8 sps:$4 sm:$0xff]   ;;  %v1580_v33 = vld [vmem:[%s1697_s29 + $0x50] ss:$8 sps:$4 sm:$0xff]  }
  0x1b   : > { %v1598_v34 = vld [vmem:[%s1697_s29 + $0xd0] ss:$8 sps:$4 sm:$0xff]   ;;  %v1584_v35 = vld [vmem:[%s1697_s29 + $0x64] ss:$8 sps:$4 sm:$0xff]   ;;  %v1586_v37 = vld [vmem:[%s1697_s29 + $0x60] ss:$8 sps:$4 sm:$0xff]  }
  0x1c   : > { %649 = vmatpush1.bf16.msra.mxu0 %v1553_v9  ;;  %1518 = vmatpush1.bf16.msra.mxu1 %v1553_v9  ;;  %v1599_v36 = vld [vmem:[%s1697_s29 + $0xe4] ss:$8 sps:$4 sm:$0xff]   ;;  %v1601_v38 = vld [vmem:[%s1697_s29 + $0xe0] ss:$8 sps:$4 sm:$0xff]   ;;  %v1590_v39 = vld [vmem:[%s1697_s29 + $0x74] ss:$8 sps:$4 sm:$0xff]  }
  0x1d   : > { %650 = vmatprep.subr.bf16.mxu0 %v1629_v1  ;;  %1510 = vmatprep.subr.bf16.mxu1 %v1629_v1  ;;  %v1602_v40 = vld [vmem:[%s1697_s29 + $0xf4] ss:$8 sps:$4 sm:$0xff]   ;;  %v1592_v41 = vld [vmem:[%s1697_s29 + $0x70] ss:$8 sps:$4 sm:$0xff]   ;;  %v325_v44 = vld [vmem:[#allocation2 + $0x80] sm:$0xff] }
  0x1e   : > { %v1604_v42 = vld [vmem:[%s1697_s29 + $0xf0] ss:$8 sps:$4 sm:$0xff]   ;;  %v326_v48 = vld [vmem:[#allocation2 + $0x88] sm:$0xff]  ;;  %s270_s29 = scalar_lea.vmem %s2116_s4, %s2124_s15 }
  0x1f   : > { %v327_v60 = vld [vmem:[#allocation2 + $0x90] sm:$0xff]  ;;  %v328_v4 = vld [vmem:[#allocation2 + $0x98] sm:$0xff] }
  0x20   : > { %651 = vmatpush1.bf16.msra.mxu0 %v1554_v10  ;;  %1519 = vmatpush1.bf16.msra.mxu1 %v1554_v10 }
  0x21   : > { %652 = vmatprep.subr.bf16.mxu0 %v1629_v1  ;;  %1511 = vmatprep.subr.bf16.mxu1 %v1629_v1 }
  0x24   : > { %653 = vmatpush1.bf16.msra.mxu0 %v1555_v11  ;;  %1520 = vmatpush1.bf16.msra.mxu1 %v1555_v11 }
  0x25   : > { %654 = vmatprep.subr.bf16.mxu0 %v1629_v1  ;;  %1512 = vmatprep.subr.bf16.mxu1 %v1629_v1 }
  0x28   : > { %655 = vmatpush1.bf16.msra.mxu0 %v1556_v12  ;;  %1521 = vmatpush1.bf16.msra.mxu1 %v1556_v12 }
  0x2b   : > { %671 = vmatmul.mubr.bf16.vlgmr.msra.gmra.mrb[0].mxu0 %v1557_v13  ;;  %735 = vmatmul.mubr.bf16.vlgmr.msra.gmra.mrb[0].mxu1 %v1569_v14 }
  0x2c   : > { %1422 = vmatprep.mubr.msk.bf16.mxu0 %vm589_vm1, %v1560_v15  ;;  %1430 = vmatprep.mubr.msk.bf16.mxu1 %vm589_vm1, %v1575_v16 }
  0x33   : > { %679 = vmatmul.mubr.bf16.gmra.mrb[4].mxu0 %v1562_v17  ;;  %743 = vmatmul.mubr.bf16.gmra.mrb[4].mxu1 %v1577_v18  ;;  %v313_v18 = vld [vmem:[#allocation2 + $0x20] sm:$0xff] }
  0x34   : > { %1423 = vmatprep.mubr.msk.bf16.mxu0 %vm589_vm1, %v1563_v19  ;;  %1431 = vmatprep.mubr.msk.bf16.mxu1 %vm589_vm1, %v1581_v20  ;;  %v329_v19 = vld [vmem:[#allocation2 + $0xa0] sm:$0xff] }
  0x3b   : > { %687 = vmatmul.mubr.bf16.gmra.mrb[8].mxu0 %v1565_v21  ;;  %751 = vmatmul.mubr.bf16.gmra.mrb[8].mxu1 %v1583_v22  ;;  %v314_v22 = vld [vmem:[#allocation2 + $0x28] sm:$0xff] }
  0x3c   : > { %1424 = vmatprep.mubr.msk.bf16.mxu0 %vm589_vm1, %v1566_v23  ;;  %1432 = vmatprep.mubr.msk.bf16.mxu1 %vm589_vm1, %v1587_v24 }
  0x43   : > { %695 = vmatmul.mubr.bf16.gmra.mrb[12].mxu0 %v1568_v25  ;;  %759 = vmatmul.mubr.bf16.gmra.mrb[12].mxu1 %v1589_v26 }
  0x44   : > { %1425 = vmatprep.mubr.msk.bf16.mxu0 %vm589_vm1, %v1572_v27  ;;  %1433 = vmatprep.mubr.msk.bf16.mxu1 %vm589_vm1, %v1593_v28 }
  0x4b   : > { %703 = vmatmul.mubr.bf16.gmra.mrb[16].mxu0 %v1574_v29  ;;  %767 = vmatmul.mubr.bf16.gmra.mrb[16].mxu1 %v1595_v30 }
  0x4c   : > { %1426 = vmatprep.mubr.msk.bf16.mxu0 %vm589_vm1, %v1578_v31  ;;  %1434 = vmatprep.mubr.msk.bf16.mxu1 %vm589_vm1, %v1596_v32 }
  0x53   : > { %711 = vmatmul.mubr.bf16.gmra.mrb[20].mxu0 %v1580_v33  ;;  %775 = vmatmul.mubr.bf16.gmra.mrb[20].mxu1 %v1598_v34 }
  0x54   : > { %1427 = vmatprep.mubr.msk.bf16.mxu0 %vm589_vm1, %v1584_v35  ;;  %1435 = vmatprep.mubr.msk.bf16.mxu1 %vm589_vm1, %v1599_v36 }
  0x5b   : > { %719 = vmatmul.mubr.bf16.gmra.mrb[24].mxu0 %v1586_v37  ;;  %783 = vmatmul.mubr.bf16.gmra.mrb[24].mxu1 %v1601_v38  ;;  %v330_v38 = vld [vmem:[#allocation2 + $0xa8] sm:$0xff] }
  0x5c   : > { %1428 = vmatprep.mubr.msk.bf16.mxu0 %vm589_vm1, %v1590_v39  ;;  %1436 = vmatprep.mubr.msk.bf16.mxu1 %vm589_vm1, %v1602_v40 }
  0x63   : > { %727 = vmatmul.mubr.bf16.gmra.mrb[28].mxu0 %v1592_v41  ;;  %791 = vmatmul.mubr.bf16.gmra.mrb[28].mxu1 %v1604_v42  ;;  %v315_v41 = vld [vmem:[#allocation2 + $0x30] sm:$0xff] }
  0x64   : > { %v331_v42 = vld [vmem:[#allocation2 + $0xb0] sm:$0xff] }
  0xfe   : > { %v672_v45 = vpop.f32.mrb[0].mxu0  ;;  %v736_v47 = vpop.f32.mrb[0].mxu1 }
  0xff   : > { %v799_v49 = vadd.f32 %v672_v45, %v309_v43  ;;  %v674_v50 = vpop.f32.mrb[1].mxu0  ;;  %v815_v51 = vadd.f32 %v736_v47, %v325_v44  ;;  %v738_v52 = vpop.f32.mrb[1].mxu1 }
 0x100   : > { %v675_v53 = vpop.f32.mrb[2].mxu0  ;;  %v739_v54 = vpop.f32.mrb[2].mxu1 }
 0x101   : > { %832 = vst.msk [vmem:[#allocation2] sm:$0xff] %vm276_vm0, %v799_v49  ;;  %v800_v55 = vadd.f32 %v675_v53, %v310_v46  ;;  %v677_v56 = vpop.f32.mrb[3].mxu0  ;;  %848 = vst.msk [vmem:[#allocation2 + $0x80] sm:$0xff] %vm276_vm0, %v815_v51  ;;  %v816_v57 = vadd.f32 %v739_v54, %v326_v48  ;;  %v741_v58 = vpop.f32.mrb[3].mxu1  ;;  %v316_v46 = vld [vmem:[#allocation2 + $0x38] sm:$0xff] }
 0x103   : > { %833 = vst.msk [vmem:[#allocation2 + $0x8] sm:$0xff] %vm276_vm0, %v800_v55  ;;  %849 = vst.msk [vmem:[#allocation2 + $0x88] sm:$0xff] %vm276_vm0, %v816_v57 }
 0x106   : > { %v680_v61 = vpop.f32.mrb[4].mxu0  ;;  %v744_v63 = vpop.f32.mrb[4].mxu1 }
 0x107   : > { %v801_v0 = vadd.f32 %v680_v61, %v311_v59  ;;  %v682_v1 = vpop.f32.mrb[5].mxu0  ;;  %v817_v2 = vadd.f32 %v744_v63, %v327_v60  ;;  %v746_v3 = vpop.f32.mrb[5].mxu1  ;;  %v332_v63 = vld [vmem:[#allocation2 + $0xb8] sm:$0xff] }
 0x108   : > { %v1820_v5 = vld [vmem:[#allocation2] sm:$0xff]  ;;  %v683_v6 = vpop.f32.mrb[6].mxu0  ;;  %v747_v8 = vpop.f32.mrb[6].mxu1 }
 0x109   : > { %v1822_v7 = vld [vmem:[#allocation2 + $0x80] sm:$0xff]  ;;  %v1472_v9 = vpack.c.bf16 %v1820_v5, %v1820_v5  ;;  %834 = vst.msk [vmem:[#allocation2 + $0x10] sm:$0xff] %vm276_vm0, %v801_v0  ;;  %v802_v10 = vadd.f32 %v683_v6, %v312_v62  ;;  %v685_v11 = vpop.f32.mrb[7].mxu0  ;;  %850 = vst.msk [vmem:[#allocation2 + $0x90] sm:$0xff] %vm276_vm0, %v817_v2  ;;  %v749_v12 = vpop.f32.mrb[7].mxu1  ;;  %v818_v16 = vadd.f32 %v747_v8, %v328_v4  ;;  %v899_v3 = vsel %vm276_vm0, %v1820_v5, 0.0 }
 0x10a   : > { %v868_v13 = vld [vmem:[#allocation2 + $0x8] sm:$0xff]  ;;  %v1488_v14 = vpack.c.bf16 %v1822_v7, %v1822_v7  ;;  %v970_v53 = vmul.f32 %v1820_v5, %v1820_v5  ;;  %v333_v5 = vld [vmem:[#allocation2 + $0xc0] sm:$0xff] }
 0x10b   : > { %v1830_v15 = vld [vmem:[#allocation2 + $0x88] sm:$0xff]  ;;  %1201 = vst.msk [vmem:[%s1818_s24] sm:$0xf] %vm1200_vm2, %v1472_v9  ;;  %v1473_v17 = vpack.c.bf16 %v868_v13, %v868_v13  ;;  %v971_v48 = vmul.f32 %v868_v13, %v868_v13  ;;  %v900_v58 = vsel %vm276_vm0, %v868_v13, 0.0 }
 0x10c   : > { %835 = vst.msk [vmem:[#allocation2 + $0x18] sm:$0xff] %vm276_vm0, %v802_v10  ;;  %851 = vst.msk [vmem:[#allocation2 + $0x98] sm:$0xff] %vm276_vm0, %v818_v16  ;;  %v1489_v20 = vpack.c.bf16 %v1830_v15, %v1830_v15  ;;  %v901_v9 = vadd.f32 %v900_v58, %v899_v3  ;;  %v317_v10 = vld [vmem:[#allocation2 + $0x40] sm:$0xff]  ;;  %v1002_v12 = vsel %vm276_vm0, %v970_v53, 0.0 }
 0x10d   : > { %1217 = vst.msk [vmem:[%s1818_s24 + $0x40] sm:$0xf] %vm1200_vm2, %v1488_v14  ;;  %1202 = vst.msk [vmem:[%s1818_s24 + $0x4] sm:$0xf] %vm1200_vm2, %v1473_v17  ;;  %v1003_v4 = vsel %vm276_vm0, %v971_v48, 0.0 }
 0x10e   : > { %v688_v21 = vpop.f32.mrb[8].mxu0  ;;  %v752_v23 = vpop.f32.mrb[8].mxu1  ;;  %1218 = vst.msk [vmem:[%s1818_s24 + $0x44] sm:$0xf] %vm1200_vm2, %v1489_v20  ;;  %v1004_v16 = vadd.f32 %v1003_v4, %v1002_v12 }
 0x10f   : > { %v803_v24 = vadd.f32 %v688_v21, %v313_v18  ;;  %v690_v25 = vpop.f32.mrb[9].mxu0  ;;  %v819_v26 = vadd.f32 %v752_v23, %v329_v19  ;;  %v754_v27 = vpop.f32.mrb[9].mxu1  ;;  %v318_v19 = vld [vmem:[#allocation2 + $0x48] sm:$0xff] }
 0x110   : > { %v869_v28 = vld [vmem:[#allocation2 + $0x10] sm:$0xff]  ;;  %v691_v29 = vpop.f32.mrb[10].mxu0  ;;  %v755_v31 = vpop.f32.mrb[10].mxu1 }
 0x111   : > { %v1844_v30 = vld [vmem:[#allocation2 + $0x90] sm:$0xff]  ;;  %v1474_v32 = vpack.c.bf16 %v869_v28, %v869_v28  ;;  %836 = vst.msk [vmem:[#allocation2 + $0x20] sm:$0xff] %vm276_vm0, %v803_v24  ;;  %v804_v33 = vadd.f32 %v691_v29, %v314_v22  ;;  %v693_v34 = vpop.f32.mrb[11].mxu0  ;;  %852 = vst.msk [vmem:[#allocation2 + $0xa0] sm:$0xff] %vm276_vm0, %v819_v26  ;;  %v757_v35 = vpop.f32.mrb[11].mxu1  ;;  %v820_v44 = vadd.f32 %v755_v31, %v330_v38  ;;  %v902_v6 = vsel %vm276_vm0, %v869_v28, 0.0 }
 0x112   : > { %v1490_v37 = vpack.c.bf16 %v1844_v30, %v1844_v30  ;;  %v972_v59 = vmul.f32 %v869_v28, %v869_v28  ;;  %v903_v17 = vadd.f32 %v902_v6, %v901_v9 }
 0x113   : > { %v870_v36 = vld [vmem:[#allocation2 + $0x18] sm:$0xff]  ;;  %1203 = vst.msk [vmem:[%s1818_s24 + $0x8] sm:$0xf] %vm1200_vm2, %v1474_v32 }
 0x114   : > { %v1475_v39 = vpack.c.bf16 %v870_v36, %v870_v36  ;;  %837 = vst.msk [vmem:[#allocation2 + $0x28] sm:$0xff] %vm276_vm0, %v804_v33  ;;  %v1853_v40 = vld [vmem:[#allocation2 + $0x98] sm:$0xff]  ;;  %853 = vst.msk [vmem:[#allocation2 + $0xa8] sm:$0xff] %vm276_vm0, %v820_v44  ;;  %v1005_v13 = vsel %vm276_vm0, %v972_v59, 0.0  ;;  %v973_v14 = vmul.f32 %v870_v36, %v870_v36  ;;  %v904_v22 = vsel %vm276_vm0, %v870_v36, 0.0  ;;  %v334_v44 = vld [vmem:[#allocation2 + $0xc8] sm:$0xff] }
 0x115   : > { %1219 = vst.msk [vmem:[%s1818_s24 + $0x48] sm:$0xf] %vm1200_vm2, %v1490_v37  ;;  %v1491_v43 = vpack.c.bf16 %v1853_v40, %v1853_v40  ;;  %v1006_v28 = vadd.f32 %v1005_v13, %v1004_v16 }
 0x116   : > { %1204 = vst.msk [vmem:[%s1818_s24 + $0xc] sm:$0xf] %vm1200_vm2, %v1475_v39  ;;  %v696_v45 = vpop.f32.mrb[12].mxu0  ;;  %v760_v47 = vpop.f32.mrb[12].mxu1  ;;  %v1007_v34 = vsel %vm276_vm0, %v973_v14, 0.0 }
 0x117   : > { %v805_v49 = vadd.f32 %v696_v45, %v315_v41  ;;  %v698_v50 = vpop.f32.mrb[13].mxu0  ;;  %1220 = vst.msk [vmem:[%s1818_s24 + $0x4c] sm:$0xf] %vm1200_vm2, %v1491_v43  ;;  %v821_v51 = vadd.f32 %v760_v47, %v331_v42  ;;  %v762_v52 = vpop.f32.mrb[13].mxu1  ;;  %v905_v42 = vadd.f32 %v904_v22, %v903_v17  ;;  %v1008_v48 = vadd.f32 %v1007_v34, %v1006_v28  ;;  %v336_v17 = vld [vmem:[#allocation2 + $0xd8] sm:$0xff]  ;;  %v321_v28 = vld [vmem:[#allocation2 + $0x60] sm:$0xff] }
 0x118   : > { %v871_v54 = vld [vmem:[#allocation2 + $0x20] sm:$0xff]  ;;  %v699_v55 = vpop.f32.mrb[14].mxu0  ;;  %v763_v57 = vpop.f32.mrb[14].mxu1  ;;  %v319_v50 = vld [vmem:[#allocation2 + $0x50] sm:$0xff] }
 0x119   : > { %v1866_v56 = vld [vmem:[#allocation2 + $0xa0] sm:$0xff]  ;;  %v1476_v60 = vpack.c.bf16 %v871_v54, %v871_v54  ;;  %838 = vst.msk [vmem:[#allocation2 + $0x30] sm:$0xff] %vm276_vm0, %v805_v49  ;;  %v806_v61 = vadd.f32 %v699_v55, %v316_v46  ;;  %v701_v62 = vpop.f32.mrb[15].mxu0  ;;  %854 = vst.msk [vmem:[#allocation2 + $0xb0] sm:$0xff] %vm276_vm0, %v821_v51  ;;  %v765_v0 = vpop.f32.mrb[15].mxu1  ;;  %v822_v11 = vadd.f32 %v763_v57, %v332_v63  ;;  %v906_v35 = vsel %vm276_vm0, %v871_v54, 0.0 }
 0x11a   : > { %v1492_v2 = vpack.c.bf16 %v1866_v56, %v1866_v56  ;;  %v974_v23 = vmul.f32 %v871_v54, %v871_v54  ;;  %v907_v49 = vadd.f32 %v906_v35, %v905_v42  ;;  %v335_v52 = vld [vmem:[#allocation2 + $0xd0] sm:$0xff] }
 0x11b   : > { %v872_v1 = vld [vmem:[#allocation2 + $0x28] sm:$0xff]  ;;  %1205 = vst.msk [vmem:[%s1818_s24 + $0x10] sm:$0xf] %vm1200_vm2, %v1476_v60  ;;  %v320_v60 = vld [vmem:[#allocation2 + $0x58] sm:$0xff] }
 0x11c   : > { %v1477_v8 = vpack.c.bf16 %v872_v1, %v872_v1  ;;  %839 = vst.msk [vmem:[#allocation2 + $0x38] sm:$0xff] %vm276_vm0, %v806_v61  ;;  %v1886_v20 = vld [vmem:[#allocation2 + $0xa8] sm:$0xff]  ;;  %855 = vst.msk [vmem:[#allocation2 + $0xb8] sm:$0xff] %vm276_vm0, %v822_v11  ;;  %v1009_v45 = vsel %vm276_vm0, %v974_v23, 0.0  ;;  %v975_v46 = vmul.f32 %v872_v1, %v872_v1  ;;  %v908_v53 = vsel %vm276_vm0, %v872_v1, 0.0 }
 0x11d   : > { %1221 = vst.msk [vmem:[%s1818_s24 + $0x50] sm:$0xf] %vm1200_vm2, %v1492_v2  ;;  %v1493_v26 = vpack.c.bf16 %v1886_v20, %v1886_v20  ;;  %v1010_v58 = vadd.f32 %v1009_v45, %v1008_v48  ;;  %v909_v6 = vadd.f32 %v908_v53, %v907_v49 }
 0x11e   : > { %1206 = vst.msk [vmem:[%s1818_s24 + $0x14] sm:$0xf] %vm1200_vm2, %v1477_v8  ;;  %v704_v18 = vpop.f32.mrb[16].mxu0  ;;  %v768_v21 = vpop.f32.mrb[16].mxu1  ;;  %v1011_v63 = vsel %vm276_vm0, %v975_v46, 0.0 }
 0x11f   : > { %v807_v24 = vadd.f32 %v704_v18, %v317_v10  ;;  %v706_v25 = vpop.f32.mrb[17].mxu0  ;;  %v770_v27 = vpop.f32.mrb[17].mxu1  ;;  %v823_v32 = vadd.f32 %v768_v21, %v333_v5  ;;  %1222 = vst.msk [vmem:[%s1818_s24 + $0x54] sm:$0xf] %vm1200_vm2, %v1493_v26 }
 0x120   : > { %v873_v29 = vld [vmem:[#allocation2 + $0x30] sm:$0xff]  ;;  %v707_v31 = vpop.f32.mrb[18].mxu0  ;;  %v771_v33 = vpop.f32.mrb[18].mxu1 }
 0x121   : > { %v1478_v37 = vpack.c.bf16 %v873_v29, %v873_v29  ;;  %840 = vst.msk [vmem:[#allocation2 + $0x40] sm:$0xff] %vm276_vm0, %v807_v24  ;;  %v808_v36 = vadd.f32 %v707_v31, %v318_v19  ;;  %v709_v38 = vpop.f32.mrb[19].mxu0  ;;  %v1897_v39 = vld [vmem:[#allocation2 + $0xb0] sm:$0xff]  ;;  %v773_v41 = vpop.f32.mrb[19].mxu1  ;;  %856 = vst.msk [vmem:[#allocation2 + $0xc0] sm:$0xff] %vm276_vm0, %v823_v32  ;;  %v976_v54 = vmul.f32 %v873_v29, %v873_v29  ;;  %v910_v0 = vsel %vm276_vm0, %v873_v29, 0.0 }
 0x122   : > { %v1494_v51 = vpack.c.bf16 %v1897_v39, %v1897_v39  ;;  %v824_v57 = vadd.f32 %v771_v33, %v334_v44  ;;  %v1012_v19 = vadd.f32 %v1011_v63, %v1010_v58  ;;  %v911_v21 = vadd.f32 %v910_v0, %v909_v6  ;;  %v337_v33 = vld [vmem:[#allocation2 + $0xe0] sm:$0xff]  ;;  %v338_v0 = vld [vmem:[#allocation2 + $0xe8] sm:$0xff] }
 0x123   : > { %v874_v43 = vld [vmem:[#allocation2 + $0x38] sm:$0xff]  ;;  %1207 = vst.msk [vmem:[%s1818_s24 + $0x18] sm:$0xf] %vm1200_vm2, %v1478_v37  ;;  %v1013_v11 = vsel %vm276_vm0, %v976_v54, 0.0  ;;  %v322_v37 = vld [vmem:[#allocation2 + $0x68] sm:$0xff] }
 0x124   : > { %v1479_v47 = vpack.c.bf16 %v874_v43, %v874_v43  ;;  %841 = vst.msk [vmem:[#allocation2 + $0x48] sm:$0xff] %vm276_vm0, %v808_v36  ;;  %v1909_v55 = vld [vmem:[#allocation2 + $0xb8] sm:$0xff]  ;;  %857 = vst.msk [vmem:[#allocation2 + $0xc8] sm:$0xff] %vm276_vm0, %v824_v57  ;;  %v977_v12 = vmul.f32 %v874_v43, %v874_v43  ;;  %v912_v24 = vsel %vm276_vm0, %v874_v43, 0.0  ;;  %v1014_v27 = vadd.f32 %v1013_v11, %v1012_v19 }
 0x125   : > { %1223 = vst.msk [vmem:[%s1818_s24 + $0x58] sm:$0xf] %vm1200_vm2, %v1494_v51  ;;  %v1495_v61 = vpack.c.bf16 %v1909_v55, %v1909_v55  ;;  %v913_v34 = vadd.f32 %v912_v24, %v911_v21 }
 0x126   : > { %1208 = vst.msk [vmem:[%s1818_s24 + $0x1c] sm:$0xf] %vm1200_vm2, %v1479_v47  ;;  %v712_v59 = vpop.f32.mrb[20].mxu0  ;;  %v776_v62 = vpop.f32.mrb[20].mxu1  ;;  %v1015_v31 = vsel %vm276_vm0, %v977_v12, 0.0 }
 0x127   : > { %v809_v1 = vadd.f32 %v712_v59, %v319_v50  ;;  %v714_v2 = vpop.f32.mrb[21].mxu0  ;;  %v825_v3 = vadd.f32 %v776_v62, %v335_v52  ;;  %v778_v4 = vpop.f32.mrb[21].mxu1  ;;  %1224 = vst.msk [vmem:[%s1818_s24 + $0x5c] sm:$0xf] %vm1200_vm2, %v1495_v61  ;;  %v1016_v47 = vadd.f32 %v1015_v31, %v1014_v27 }
 0x128   : > { %v875_v8 = vld [vmem:[#allocation2 + $0x40] sm:$0xff]  ;;  %v715_v9 = vpop.f32.mrb[22].mxu0  ;;  %v779_v10 = vpop.f32.mrb[22].mxu1 }
 0x129   : > { %v1480_v13 = vpack.c.bf16 %v875_v8, %v875_v8  ;;  %842 = vst.msk [vmem:[#allocation2 + $0x50] sm:$0xff] %vm276_vm0, %v809_v1  ;;  %v810_v14 = vadd.f32 %v715_v9, %v320_v60  ;;  %v717_v5 = vpop.f32.mrb[23].mxu0  ;;  %v1922_v16 = vld [vmem:[#allocation2 + $0xc0] sm:$0xff]  ;;  %858 = vst.msk [vmem:[#allocation2 + $0xd0] sm:$0xff] %vm276_vm0, %v825_v3  ;;  %v781_v18 = vpop.f32.mrb[23].mxu1  ;;  %v978_v25 = vmul.f32 %v875_v8, %v875_v8  ;;  %v914_v32 = vsel %vm276_vm0, %v875_v8, 0.0 }
 0x12a   : > { %v1496_v23 = vpack.c.bf16 %v1922_v16, %v1922_v16  ;;  %v826_v29 = vadd.f32 %v779_v10, %v336_v17  ;;  %v915_v48 = vadd.f32 %v914_v32, %v913_v34  ;;  %v323_v8 = vld [vmem:[#allocation2 + $0x70] sm:$0xff]  ;;  %v324_v18 = vld [vmem:[#allocation2 + $0x78] sm:$0xff] }
 0x12b   : > { %v876_v22 = vld [vmem:[#allocation2 + $0x48] sm:$0xff]  ;;  %1209 = vst.msk [vmem:[%s1818_s24 + $0x20] sm:$0xf] %vm1200_vm2, %v1480_v13  ;;  %v1017_v41 = vsel %vm276_vm0, %v978_v25, 0.0  ;;  %v339_v10 = vld [vmem:[#allocation2 + $0xf0] sm:$0xff] }
 0x12c   : > { %v1481_v26 = vpack.c.bf16 %v876_v22, %v876_v22  ;;  %843 = vst.msk [vmem:[#allocation2 + $0x58] sm:$0xff] %vm276_vm0, %v810_v14  ;;  %v1937_v36 = vld [vmem:[#allocation2 + $0xc8] sm:$0xff]  ;;  %859 = vst.msk [vmem:[#allocation2 + $0xd8] sm:$0xff] %vm276_vm0, %v826_v29  ;;  %v979_v42 = vmul.f32 %v876_v22, %v876_v22  ;;  %v916_v53 = vsel %vm276_vm0, %v876_v22, 0.0  ;;  %v1018_v62 = vadd.f32 %v1017_v41, %v1016_v47 }
 0x12d   : > { %1225 = vst.msk [vmem:[%s1818_s24 + $0x60] sm:$0xf] %vm1200_vm2, %v1496_v23  ;;  %v1497_v45 = vpack.c.bf16 %v1937_v36, %v1937_v36  ;;  %v917_v4 = vadd.f32 %v916_v53, %v915_v48 }
 0x12e   : > { %1210 = vst.msk [vmem:[%s1818_s24 + $0x24] sm:$0xf] %vm1200_vm2, %v1481_v26  ;;  %v720_v35 = vpop.f32.mrb[24].mxu0  ;;  %v784_v38 = vpop.f32.mrb[24].mxu1  ;;  %v1019_v1 = vsel %vm276_vm0, %v979_v42, 0.0  ;;  %v340_v42 = vld [vmem:[#allocation2 + $0xf8] sm:$0xff] }
 0x12f   : > { %v811_v43 = vadd.f32 %v720_v35, %v321_v28  ;;  %v722_v44 = vpop.f32.mrb[25].mxu0  ;;  %v786_v46 = vpop.f32.mrb[25].mxu1  ;;  %v827_v51 = vadd.f32 %v784_v38, %v337_v33  ;;  %1226 = vst.msk [vmem:[%s1818_s24 + $0x64] sm:$0xf] %vm1200_vm2, %v1497_v45  ;;  %v1020_v14 = vadd.f32 %v1019_v1, %v1018_v62 }
 0x130   : > { %v877_v49 = vld [vmem:[#allocation2 + $0x50] sm:$0xff]  ;;  %v723_v50 = vpop.f32.mrb[26].mxu0  ;;  %v787_v52 = vpop.f32.mrb[26].mxu1 }
 0x131   : > { %v980_v54 = vmul.f32 %v877_v49, %v877_v49  ;;  %v1482_v57 = vpack.c.bf16 %v877_v49, %v877_v49  ;;  %844 = vst.msk [vmem:[#allocation2 + $0x60] sm:$0xff] %vm276_vm0, %v811_v43  ;;  %v812_v58 = vadd.f32 %v723_v50, %v322_v37  ;;  %v725_v59 = vpop.f32.mrb[27].mxu0  ;;  %v1947_v60 = vld [vmem:[#allocation2 + $0xd0] sm:$0xff]  ;;  %v789_v61 = vpop.f32.mrb[27].mxu1  ;;  %860 = vst.msk [vmem:[#allocation2 + $0xe0] sm:$0xff] %vm276_vm0, %v827_v51  ;;  %v918_v2 = vsel %vm276_vm0, %v877_v49, 0.0 }
 0x132   : > { %v1498_v9 = vpack.c.bf16 %v1947_v60, %v1947_v60  ;;  %v828_v13 = vadd.f32 %v787_v52, %v338_v0  ;;  %v919_v5 = vadd.f32 %v918_v2, %v917_v4 }
 0x133   : > { %v878_v63 = vld [vmem:[#allocation2 + $0x58] sm:$0xff]  ;;  %1211 = vst.msk [vmem:[%s1818_s24 + $0x28] sm:$0xf] %vm1200_vm2, %v1482_v57  ;;  %v1021_v11 = vsel %vm276_vm0, %v980_v54, 0.0 }
 0x134   : > { %v1483_v3 = vpack.c.bf16 %v878_v63, %v878_v63  ;;  %845 = vst.msk [vmem:[#allocation2 + $0x68] sm:$0xff] %vm276_vm0, %v812_v58  ;;  %v981_v6 = vmul.f32 %v878_v63, %v878_v63  ;;  %v1960_v12 = vld [vmem:[#allocation2 + $0xd8] sm:$0xff]  ;;  %v920_v22 = vsel %vm276_vm0, %v878_v63, 0.0  ;;  %861 = vst.msk [vmem:[#allocation2 + $0xe8] sm:$0xff] %vm276_vm0, %v828_v13  ;;  %v1022_v27 = vadd.f32 %v1021_v11, %v1020_v14 }
 0x135   : > { %1227 = vst.msk [vmem:[%s1818_s24 + $0x68] sm:$0xf] %vm1200_vm2, %v1498_v9  ;;  %v1499_v19 = vpack.c.bf16 %v1960_v12, %v1960_v12  ;;  %v921_v44 = vadd.f32 %v920_v22, %v919_v5 }
 0x136   : > { %1212 = vst.msk [vmem:[%s1818_s24 + $0x2c] sm:$0xf] %vm1200_vm2, %v1483_v3  ;;  %v728_v17 = vpop.f32.mrb[28].mxu0  ;;  %v792_v21 = vpop.f32.mrb[28].mxu1  ;;  %v1023_v28 = vsel %vm276_vm0, %v981_v6, 0.0  ;;  %v986_v3 = vmul.f32 %v1822_v7, %v1822_v7 }
 0x137   : > { %v813_v23 = vadd.f32 %v728_v17, %v323_v8  ;;  %v730_v24 = vpop.f32.mrb[29].mxu0  ;;  %v829_v25 = vadd.f32 %v792_v21, %v339_v10  ;;  %v794_v26 = vpop.f32.mrb[29].mxu1  ;;  %1228 = vst.msk [vmem:[%s1818_s24 + $0x6c] sm:$0xf] %vm1200_vm2, %v1499_v19  ;;  %v1024_v50 = vadd.f32 %v1023_v28, %v1022_v27  ;;  %v987_v19 = vmul.f32 %v1830_v15, %v1830_v15 }
 0x138   : > { %v879_v29 = vld [vmem:[#allocation2 + $0x60] sm:$0xff]  ;;  %v731_v31 = vpop.f32.mrb[30].mxu0  ;;  %v795_v32 = vpop.f32.mrb[30].mxu1  ;;  %v932_v26 = vsel %vm276_vm0, %v1830_v15, 0.0 }
 0x139   : > { %v922_v33 = vsel %vm276_vm0, %v879_v29, 0.0  ;;  %v982_v34 = vmul.f32 %v879_v29, %v879_v29  ;;  %v1484_v35 = vpack.c.bf16 %v879_v29, %v879_v29  ;;  %846 = vst.msk [vmem:[#allocation2 + $0x70] sm:$0xff] %vm276_vm0, %v813_v23  ;;  %v814_v37 = vadd.f32 %v731_v31, %v324_v18  ;;  %v733_v38 = vpop.f32.mrb[31].mxu0  ;;  %v1973_v41 = vld [vmem:[#allocation2 + $0xe0] sm:$0xff]  ;;  %862 = vst.msk [vmem:[#allocation2 + $0xf0] sm:$0xff] %vm276_vm0, %v829_v25  ;;  %v797_v43 = vpop.f32.mrb[31].mxu1 }
 0x13a   : > { %v1500_v46 = vpack.c.bf16 %v1973_v41, %v1973_v41  ;;  %v923_v51 = vadd.f32 %v922_v33, %v921_v44  ;;  %v830_v52 = vadd.f32 %v795_v32, %v340_v42  ;;  %v930_v18 = vsel %vm276_vm0, %v1822_v7, 0.0 }
 0x13b   : > { %v880_v45 = vld [vmem:[#allocation2 + $0x68] sm:$0xff]  ;;  %v1025_v47 = vsel %vm276_vm0, %v982_v34, 0.0  ;;  %1213 = vst.msk [vmem:[%s1818_s24 + $0x30] sm:$0xf] %vm1200_vm2, %v1484_v35  ;;  %v1033_v25 = vsel %vm276_vm0, %v986_v3, 0.0  ;;  %v988_v7 = vmul.f32 %v1844_v30, %v1844_v30  ;;  %v1035_v31 = vsel %vm276_vm0, %v987_v19, 0.0 }
 0x13c   : > { %v983_v48 = vmul.f32 %v880_v45, %v880_v45  ;;  %v1485_v49 = vpack.c.bf16 %v880_v45, %v880_v45  ;;  %847 = vst.msk [vmem:[#allocation2 + $0x78] sm:$0xff] %vm276_vm0, %v814_v37  ;;  %v924_v53 = vsel %vm276_vm0, %v880_v45, 0.0  ;;  %v1026_v54 = vadd.f32 %v1025_v47, %v1024_v50  ;;  %v1987_v57 = vld [vmem:[#allocation2 + $0xe8] sm:$0xff]  ;;  %863 = vst.msk [vmem:[#allocation2 + $0xf8] sm:$0xff] %vm276_vm0, %v830_v52 }
 0x13d   : > { %1229 = vst.msk [vmem:[%s1818_s24 + $0x70] sm:$0xf] %vm1200_vm2, %v1500_v46  ;;  %v1501_v59 = vpack.c.bf16 %v1987_v57, %v1987_v57  ;;  %v925_v61 = vadd.f32 %v924_v53, %v923_v51  ;;  %v934_v32 = vsel %vm276_vm0, %v1844_v30, 0.0  ;;  %v989_v33 = vmul.f32 %v1853_v40, %v1853_v40 }
 0x13e   : > { %1214 = vst.msk [vmem:[%s1818_s24 + $0x34] sm:$0xf] %vm1200_vm2, %v1485_v49  ;;  %v1027_v58 = vsel %vm276_vm0, %v983_v48, 0.0  ;;  %v1037_v35 = vsel %vm276_vm0, %v988_v7, 0.0  ;;  %v936_v37 = vsel %vm276_vm0, %v1853_v40, 0.0  ;;  %v990_v38 = vmul.f32 %v1866_v56, %v1866_v56 }
 0x13f   : > { %1230 = vst.msk [vmem:[%s1818_s24 + $0x74] sm:$0xf] %vm1200_vm2, %v1501_v59  ;;  %v1028_v4 = vadd.f32 %v1027_v58, %v1026_v54  ;;  %v1039_v44 = vsel %vm276_vm0, %v989_v33, 0.0  ;;  %v938_v30 = vsel %vm276_vm0, %v1866_v56, 0.0  ;;  %v991_v45 = vmul.f32 %v1886_v20, %v1886_v20 }
 0x140   : > { %v881_v62 = vld [vmem:[#allocation2 + $0x70] sm:$0xff]  ;;  %v1041_v48 = vsel %vm276_vm0, %v990_v38, 0.0  ;;  %v940_v40 = vsel %vm276_vm0, %v1886_v20, 0.0  ;;  %v992_v49 = vmul.f32 %v1897_v39, %v1897_v39  ;;  %v942_v56 = vsel %vm276_vm0, %v1897_v39, 0.0 }
 0x141   : > { %v1993_v63 = vld [vmem:[#allocation2 + $0xf0] sm:$0xff]  ;;  %v926_v0 = vsel %vm276_vm0, %v881_v62, 0.0  ;;  %v984_v1 = vmul.f32 %v881_v62, %v881_v62  ;;  %v1486_v2 = vpack.c.bf16 %v881_v62, %v881_v62  ;;  %v1043_v52 = vsel %vm276_vm0, %v991_v45, 0.0 }
 0x142   : > { %v927_v6 = vadd.f32 %v926_v0, %v925_v61  ;;  %v1502_v9 = vpack.c.bf16 %v1993_v63, %v1993_v63  ;;  %v993_v53 = vmul.f32 %v1909_v55, %v1909_v55  ;;  %v1045_v59 = vsel %vm276_vm0, %v992_v49, 0.0 }
 0x143   : > { %v882_v8 = vld [vmem:[#allocation2 + $0x78] sm:$0xff]  ;;  %v1029_v10 = vsel %vm276_vm0, %v984_v1, 0.0  ;;  %1215 = vst.msk [vmem:[%s1818_s24 + $0x38] sm:$0xf] %vm1200_vm2, %v1486_v2  ;;  %v944_v20 = vsel %vm276_vm0, %v1909_v55, 0.0  ;;  %v994_v61 = vmul.f32 %v1922_v16, %v1922_v16  ;;  %v946_v39 = vsel %vm276_vm0, %v1922_v16, 0.0 }
 0x144   : > { %v928_v11 = vsel %vm276_vm0, %v882_v8, 0.0  ;;  %v985_v13 = vmul.f32 %v882_v8, %v882_v8  ;;  %v1487_v14 = vpack.c.bf16 %v882_v8, %v882_v8  ;;  %v1030_v5 = vadd.f32 %v1029_v10, %v1028_v4  ;;  %1231 = vst.msk [vmem:[%s1818_s24 + $0x78] sm:$0xf] %vm1200_vm2, %v1502_v9  ;;  %v2015_v22 = vld [vmem:[#allocation2 + $0xf8] sm:$0xff] }
 0x145   : > { %v929_v17 = vadd.f32 %v928_v11, %v927_v6  ;;  %v1503_v27 = vpack.c.bf16 %v2015_v22, %v2015_v22  ;;  %v1047_v1 = vsel %vm276_vm0, %v993_v53, 0.0  ;;  %v995_v2 = vmul.f32 %v1937_v36, %v1937_v36 }
 0x146   : > { %v1031_v21 = vsel %vm276_vm0, %v985_v13, 0.0  ;;  %1216 = vst.msk [vmem:[%s1818_s24 + $0x3c] sm:$0xf] %vm1200_vm2, %v1487_v14  ;;  %v1049_v6 = vsel %vm276_vm0, %v994_v61, 0.0  ;;  %v948_v55 = vsel %vm276_vm0, %v1937_v36, 0.0  ;;  %v996_v8 = vmul.f32 %v1947_v60, %v1947_v60 }
 0x147   : > { %v931_v23 = vadd.f32 %v930_v18, %v929_v17  ;;  %v1032_v24 = vadd.f32 %v1031_v21, %v1030_v5  ;;  %1232 = vst.msk [vmem:[%s1818_s24 + $0x7c] sm:$0xf] %vm1200_vm2, %v1503_v27  ;;  %v1051_v11 = vsel %vm276_vm0, %v995_v2, 0.0  ;;  %v950_v16 = vsel %vm276_vm0, %v1947_v60, 0.0 }
 0x148   : > { %v997_v13 = vmul.f32 %v1960_v12, %v1960_v12  ;;  %v1053_v17 = vsel %vm276_vm0, %v996_v8, 0.0  ;;  %v952_v36 = vsel %vm276_vm0, %v1960_v12, 0.0  ;;  %v998_v18 = vmul.f32 %v1973_v41, %v1973_v41 }
 0x149   : > { %v933_v28 = vadd.f32 %v932_v26, %v931_v23  ;;  %v1034_v29 = vadd.f32 %v1033_v25, %v1032_v24  ;;  %v954_v60 = vsel %vm276_vm0, %v1973_v41, 0.0  ;;  %v999_v24 = vmul.f32 %v1987_v57, %v1987_v57 }
 0x14a   : > { %v1055_v23 = vsel %vm276_vm0, %v997_v13, 0.0  ;;  %v1000_v25 = vmul.f32 %v1993_v63, %v1993_v63  ;;  %v1057_v12 = vsel %vm276_vm0, %v998_v18, 0.0  ;;  %v956_v27 = vsel %vm276_vm0, %v1987_v57, 0.0 }
 0x14b   : > { %v935_v34 = vadd.f32 %v934_v32, %v933_v28  ;;  %v1036_v15 = vadd.f32 %v1035_v31, %v1034_v29  ;;  %v958_v28 = vsel %vm276_vm0, %v1993_v63, 0.0  ;;  %v1059_v41 = vsel %vm276_vm0, %v999_v24, 0.0 }
 0x14c   : > { %v1061_v32 = vsel %vm276_vm0, %v1000_v25, 0.0  ;;  %v1001_v33 = vmul.f32 %v2015_v22, %v2015_v22 }
 0x14d   : > { %v937_v42 = vadd.f32 %v936_v37, %v935_v34  ;;  %v1038_v43 = vadd.f32 %v1037_v35, %v1036_v15  ;;  %v960_v35 = vsel %vm276_vm0, %v2015_v22, 0.0 }
 0x14e   : > { %v1063_v38 = vsel %vm276_vm0, %v1001_v33, 0.0 }
 0x14f   : > { %v1040_v46 = vadd.f32 %v1039_v44, %v1038_v43  ;;  %v939_v47 = vadd.f32 %v938_v30, %v937_v42 }
 0x151   : > { %v941_v50 = vadd.f32 %v940_v40, %v939_v47  ;;  %v1042_v51 = vadd.f32 %v1041_v48, %v1040_v46 }
 0x153   : > { %v943_v54 = vadd.f32 %v942_v56, %v941_v50  ;;  %v1044_v58 = vadd.f32 %v1043_v52, %v1042_v51 }
 0x155   : > { %v945_v62 = vadd.f32 %v944_v20, %v943_v54  ;;  %v1046_v0 = vadd.f32 %v1045_v59, %v1044_v58 }
 0x157   : > { %v947_v3 = vadd.f32 %v946_v39, %v945_v62  ;;  %v1048_v4 = vadd.f32 %v1047_v1, %v1046_v0 }
 0x159   : > { %v1050_v9 = vadd.f32 %v1049_v6, %v1048_v4  ;;  %v949_v10 = vadd.f32 %v948_v55, %v947_v3 }
 0x15b   : > { %v1052_v14 = vadd.f32 %v1051_v11, %v1050_v9  ;;  %v951_v5 = vadd.f32 %v950_v16, %v949_v10 }
 0x15d   : > { %v1054_v19 = vadd.f32 %v1053_v17, %v1052_v14  ;;  %v953_v21 = vadd.f32 %v952_v36, %v951_v5 }
 0x15f   : > { %v1056_v26 = vadd.f32 %v1055_v23, %v1054_v19  ;;  %v955_v7 = vadd.f32 %v954_v60, %v953_v21 }
 0x161   : > { %v1058_v29 = vadd.f32 %v1057_v12, %v1056_v26  ;;  %v957_v31 = vadd.f32 %v956_v27, %v955_v7 }
 0x163   : > { %v1060_v34 = vadd.f32 %v1059_v41, %v1058_v29  ;;  %v959_v15 = vadd.f32 %v958_v28, %v957_v31 }
 0x165   : > { %v1062_v37 = vadd.f32 %v1061_v32, %v1060_v34  ;;  %v961_v57 = vadd.f32 %v960_v35, %v959_v15 }
 0x167   : > { %v962_v63 = vrot.slane %v961_v57, 4  ;;  %v1064_v42 = vadd.f32 %v1063_v38, %v1062_v37 }
 0x169   : > { %v963_v43 = vadd.f32 %v962_v63, %v961_v57  ;;  %v1065_v44 = vrot.slane %v1064_v42, 4 }
 0x16b   : > { %v964_v30 = vrot.slane %v963_v43, 2  ;;  %v1066_v45 = vadd.f32 %v1065_v44, %v1064_v42 }
 0x16d   : > { %v965_v46 = vadd.f32 %v964_v30, %v963_v43  ;;  %v1067_v47 = vrot.slane %v1066_v45, 2 }
 0x16f   : > { %v966_v48 = vrot.slane %v965_v46, 1  ;;  %v1068_v40 = vadd.f32 %v1067_v47, %v1066_v45 }
 0x171   : > { %v967_v22 = vadd.f32 %v966_v48, %v965_v46  ;;  %v1069_v49 = vrot.slane %v1068_v40, 1 }
 0x173   : > { %969 = vst.msk [vmem:[%s267_s26] sm:$0x1] %vm968_vm3, %v967_v22  ;;  %v1070_v50 = vadd.f32 %v1069_v49, %v1068_v40 }
 0x175   : > { %1071 = vst.msk [vmem:[%s270_s29] sm:$0x1] %vm968_vm3, %v1070_v50 }
 0x176 PF: > { %s15_s17 = sadd.s32 1, %s1627_s17   ;;  %s2117_s15 = smov %s1623_s16 }
 0x177   : > { %p12_p6 = scmp.ge.s32.totalorder %s15_s17, 4   ;;  %s2118_s16 = smov %s2120_s18 }
 0x179   :  { %14 = sbr.rel (!%p12_p6) target bundleno = 2 (0x2), region = 93 }

// kernel: conv_generator_forward.16
= control target key start
LH: loop header
LB: loop body
LE: loop exit
PB: predicated region body
PF: predicated region fallthrough
CT: control target
= control target key end

     0   :  { %s431_s12 = smov 0   ;;  %s461_s0 = inlined_call_operand.vmem [shape: bf16[128,128], index: 0, kind: input, shape index: {}]   ;;  %s462_s1 = inlined_call_operand.vmem [shape: f32[1,128], index: 1, kind: input, shape index: {}]   ;;  %s463_s2 = inlined_call_operand.vmem [shape: f32[1,128], index: 2, kind: input, shape index: {}]   ;;  %s464_s3 = inlined_call_operand.vmem [shape: bf16[128,128], index: 3, kind: output, shape index: {}]  }
   0x1 LB: > { %s324_s13 = sadd.s32 4294967295, %s409_s12   ;;  %p328_p0 = scmp.ge.s32.totalorder %s409_s12, 1  ;;  %s409_s12 = sphi %s431_s12, %s13_s12  }
   0x2   : > { %p138_p1 = scmp.lt.s32.totalorder %s409_s12, 3 }
   0x4   : > { %p139_p2 = pnand %p328_p0, %p138_p1 }
   0x5   : > { %s329_s14 = sshll.u32 (!%p139_p2), %s324_s13, 3  ;;  %v333_v0 = vld [vmem:[%s462_s1] ss:$0 sm:$0xff] (!%p139_p2) }
   0x6   : > { %142 = sbr.rel (%p139_p2) target bundleno = 29 (0x1d), region = 32  ;;  %p163_p3 = scmp.lt.s32.totalorder (!%p139_p2), %s329_s14, 15  ;;  %v334_v9 = vld [vmem:[%s463_s2] ss:$0 sm:$0xff] (!%p139_p2) }
   0xd   : > { %s466_s14 = smov (!%p163_p3, %s329_s14), 15 }
   0xe   : > { %s330_s15 = sshll.u32 %s466_s14, 2 }
   0xf   : > { %s166_s18 = scalar_lea.vmem %s461_s0, %s330_s15  ;;  %s172_s25 = scalar_lea.vmem %s464_s3, %s330_s15 }
  0x10   : > { %v354_v1 = vld [vmem:[%s166_s18] sm:$0xff]   ;;  %v389_v2 = vld [vmem:[%s166_s18 + $0x8] sm:$0xff]   ;;  %v390_v3 = vld [vmem:[%s166_s18 + $0x10] sm:$0xff]  }
  0x11   : > { %v355_v4 = vunpack.c.l.bf16 %v354_v1  ;;  %v356_v5 = vunpack.c.h.bf16 %v354_v1  ;;  %v359_v6 = vunpack.c.l.bf16 %v389_v2  ;;  %v360_v7 = vunpack.c.h.bf16 %v389_v2  ;;  %v391_v8 = vld [vmem:[%s166_s18 + $0x18] sm:$0xff]  }
  0x12   : > { %v363_v10 = vunpack.c.l.bf16 %v390_v3  ;;  %v364_v11 = vunpack.c.h.bf16 %v390_v3  ;;  %v367_v12 = vunpack.c.l.bf16 %v391_v8  ;;  %v368_v13 = vunpack.c.h.bf16 %v391_v8 }
  0x13   : > { %v197_v14 = vmul.f32 %v355_v4, %v333_v0  ;;  %v198_v15 = vmul.f32 %v356_v5, %v333_v0  ;;  %v199_v16 = vmul.f32 %v359_v6, %v333_v0  ;;  %v200_v17 = vmul.f32 %v360_v7, %v333_v0 }
  0x14   : > { %v201_v18 = vmul.f32 %v363_v10, %v333_v0  ;;  %v202_v19 = vmul.f32 %v364_v11, %v333_v0  ;;  %v203_v20 = vmul.f32 %v367_v12, %v333_v0  ;;  %v204_v21 = vmul.f32 %v368_v13, %v333_v0 }
  0x15   : > { %v212_v22 = vadd.f32 %v334_v9, %v197_v14  ;;  %v213_v23 = vadd.f32 %v334_v9, %v198_v15  ;;  %v214_v24 = vadd.f32 %v334_v9, %v199_v16  ;;  %v215_v25 = vadd.f32 %v334_v9, %v200_v17 }
  0x16   : > { %v216_v26 = vadd.f32 %v334_v9, %v201_v18  ;;  %v217_v27 = vadd.f32 %v334_v9, %v202_v19  ;;  %v218_v28 = vadd.f32 %v334_v9, %v203_v20  ;;  %v219_v29 = vadd.f32 %v334_v9, %v204_v21 }
  0x17   : > { %v220_v30 = vmax.f32 %v212_v22, 0.0  ;;  %v221_v31 = vmax.f32 %v213_v23, 0.0  ;;  %v222_v32 = vmax.f32 %v214_v24, 0.0  ;;  %v223_v33 = vmax.f32 %v215_v25, 0.0 }
  0x18   : > { %v224_v34 = vmax.f32 %v216_v26, 0.0  ;;  %v225_v35 = vmax.f32 %v217_v27, 0.0  ;;  %v226_v36 = vmax.f32 %v218_v28, 0.0  ;;  %v227_v37 = vmax.f32 %v219_v29, 0.0 }
  0x19   : > { %v372_v38 = vpack.c.bf16 %v221_v31, %v220_v30  ;;  %v377_v39 = vpack.c.bf16 %v223_v33, %v222_v32 }
  0x1a   : > { %v382_v40 = vpack.c.bf16 %v225_v35, %v224_v34  ;;  %v387_v41 = vpack.c.bf16 %v227_v37, %v226_v36 }
  0x1b   : > { %373 = vst [vmem:[%s172_s25] sm:$0xff] %v372_v38   ;;  %392 = vst [vmem:[%s172_s25 + $0x8] sm:$0xff] %v377_v39  }
  0x1c   : > { %393 = vst [vmem:[%s172_s25 + $0x10] sm:$0xff] %v382_v40   ;;  %394 = vst [vmem:[%s172_s25 + $0x18] sm:$0xff] %v387_v41  }
  0x1d PF: > { %s13_s12 = sadd.s32 1, %s409_s12  }
  0x1e   : > { %p10_p4 = scmp.ge.s32.totalorder %s13_s12, 4  }
  0x20   :  { %12 = sbr.rel (!%p10_p4) target bundleno = 1 (0x1), region = 62 }

// kernel: conv_generator_forward.17
= control target key start
LH: loop header
LB: loop body
LE: loop exit
PB: predicated region body
PF: predicated region fallthrough
CT: control target
= control target key end

     0   :  { %s3161_s9 = smov 0   ;;  %s3163_s10 = smov 0   ;;  %s3992_s0 = inlined_call_operand.vmem [shape: bf16[2048,72], index: 0, kind: input, shape index: {}]   ;;  %s3993_s1 = inlined_call_operand.vmem [shape: bf16[72,12], index: 1, kind: input, shape index: {}]   ;;  %s3994_s2 = inlined_call_operand.vmem [shape: f32[2048,12], index: 2, kind: output, shape index: {}]  }
   0x1   :  { %s3165_s11 = smov 0  }
   0x2 LB: > { %s24_s12 = sadd.s32 1, %s3139_s10  ;;  %p2412_p0 = scmp.ge.s32.totalorder %s3143_s11, 1  ;;  %s3143_s11 = sphi %s3165_s11, %s12_s11   ;;  %s3139_s10 = sphi %s3163_s10, %s3996_s10   ;;  %s3135_s9 = sphi %s3161_s9, %s3995_s9  }
   0x3   : > { %p26_p1 = scmp.ge.s32.totalorder %s24_s12, 2  ;;  %p141_p2 = scmp.lt.s32.totalorder %s3143_s11, 3 }
   0x5   : > { %s3998_s12 = smov (%p26_p1, %s24_s12), 0  ;;  %p142_p3 = pnand %p2412_p0, %p141_p2 }
   0x6   : > { %v2796_v0 = vld [vmem:[%s3993_s1] sm:$0xff] (!%p142_p3)   ;;  %v2797_v1 = vld [vmem:[%s3993_s1 + $0x8] sm:$0xff] (!%p142_p3)   ;;  %s2413_s17 = sshll.u32 (!%p142_p3), %s3135_s9, 7  ;;  %v2798_v2 = vld [vmem:[%s3993_s1 + $0x10] sm:$0xff] (!%p142_p3)   ;;  %vm938_vm0 = vcmask (!%p142_p3), 588800   ;;  %vm1131_vm1 = vcmask (!%p142_p3), 1043456  }
   0x7   : > { %145 = sbr.rel (%p142_p3) target bundleno = 391 (0x187), region = 28  ;;  %2621 = vmatprep.subr.bf16.mxu0 (!%p142_p3), %v2796_v0  ;;  %2759 = vmatprep.subr.bf16.mxu1 (!%p142_p3), %v2796_v0  ;;  %p172_p4 = scmp.lt.s32.totalorder (!%p142_p3), %s2413_s17, 255  ;;  %v2799_v3 = vld [vmem:[%s3993_s1 + $0x18] sm:$0xff] (!%p142_p3)   ;;  %v2800_v6 = vld [vmem:[%s3993_s1 + $0x20] ss:$0 sps:$4 sm:$0xff] (!%p142_p3)   ;;  %vm197_vm2 = vcmask (!%p142_p3), 97280  }
   0x8   : > { %2622 = vmatpush3.bf16.msra.mxu0 (!%p142_p3), %v2796_v0  ;;  %2764 = vmatpush3.bf16.msra.mxu1 (!%p142_p3), %v2796_v0  ;;  %v3206_v7 = vsel (!%p142_p3), %vm1131_vm1, %v2800_v6, 0  ;;  %v3145_v9 = vmov (!%p142_p3), 0.0  }
   0x9   : > { %2623 = vmatprep.subr.bf16.mxu0 (!%p142_p3), %v2797_v1  ;;  %2760 = vmatprep.subr.bf16.mxu1 (!%p142_p3), %v2797_v1  ;;  %200 = vst.msk [vmem:[#allocation2 + $0x10] sm:$0xff] (!%p142_p3), %vm197_vm2, %v3145_v9  ;;  %198 = vst.msk [vmem:[#allocation2] sm:$0xff] (!%p142_p3), %vm197_vm2, %v3145_v9 }
   0xa   : > { %199 = vst.msk [vmem:[#allocation2 + $0x8] sm:$0xff] (!%p142_p3), %vm197_vm2, %v3145_v9  ;;  %201 = vst.msk [vmem:[#allocation2 + $0x18] sm:$0xff] (!%p142_p3), %vm197_vm2, %v3145_v9 }
   0xb   : > { %202 = vst.msk [vmem:[#allocation2 + $0x20] sm:$0xff] (!%p142_p3), %vm197_vm2, %v3145_v9  ;;  %203 = vst.msk [vmem:[#allocation2 + $0x28] sm:$0xff] (!%p142_p3), %vm197_vm2, %v3145_v9 }
   0xc   : > { %2624 = vmatpush3.bf16.msra.mxu0 (!%p142_p3), %v2797_v1  ;;  %2765 = vmatpush3.bf16.msra.mxu1 (!%p142_p3), %v2797_v1  ;;  %204 = vst.msk [vmem:[#allocation2 + $0x30] sm:$0xff] (!%p142_p3), %vm197_vm2, %v3145_v9  ;;  %205 = vst.msk [vmem:[#allocation2 + $0x38] sm:$0xff] (!%p142_p3), %vm197_vm2, %v3145_v9 }
   0xd   : > { %2625 = vmatprep.subr.bf16.mxu0 (!%p142_p3), %v2798_v2  ;;  %2761 = vmatprep.subr.bf16.mxu1 (!%p142_p3), %v2798_v2  ;;  %206 = vst.msk [vmem:[#allocation2 + $0x40] sm:$0xff] (!%p142_p3), %vm197_vm2, %v3145_v9  ;;  %207 = vst.msk [vmem:[#allocation2 + $0x48] sm:$0xff] (!%p142_p3), %vm197_vm2, %v3145_v9 }
   0xe   : > { %s4000_s17 = smov (!%p172_p4, %s2413_s17), 255  ;;  %208 = vst.msk [vmem:[#allocation2 + $0x50] sm:$0xff] %vm197_vm2, %v3145_v9  ;;  %209 = vst.msk [vmem:[#allocation2 + $0x58] sm:$0xff] %vm197_vm2, %v3145_v9 }
   0xf   : > { %s2414_s20 = sshll.u32 %s4000_s17, 2  ;;  %210 = vst.msk [vmem:[#allocation2 + $0x60] sm:$0xff] %vm197_vm2, %v3145_v9  ;;  %211 = vst.msk [vmem:[#allocation2 + $0x68] sm:$0xff] %vm197_vm2, %v3145_v9  ;;  %s2416_s28 = sshll.u32 %s4000_s17, 3 }
  0x10   : > { %s3197_s25 = scalar_lea.vmem %s3992_s0, %s2414_s20  ;;  %2626 = vmatpush3.bf16.msra.mxu0 %v2798_v2  ;;  %2766 = vmatpush3.bf16.msra.mxu1 %v2798_v2  ;;  %212 = vst.msk [vmem:[#allocation2 + $0x70] sm:$0xff] %vm197_vm2, %v3145_v9  ;;  %213 = vst.msk [vmem:[#allocation2 + $0x78] sm:$0xff] %vm197_vm2, %v3145_v9  ;;  %s3613_s3 = scalar_lea.vmem %s3994_s2, %s2416_s28 }
  0x11   : > { %v2801_v4 = vld [vmem:[%s3197_s25] sm:$0xff]   ;;  %2627 = vmatprep.subr.bf16.mxu0 %v2799_v3  ;;  %2762 = vmatprep.subr.bf16.mxu1 %v2799_v3  ;;  %v3209_v8 = vld [vmem:[%s3197_s25 + $0x8] sm:$0xff]   ;;  %214 = vst.msk [vmem:[#allocation2 + $0x80] sm:$0xff] %vm197_vm2, %v3145_v9  ;;  %215 = vst.msk [vmem:[#allocation2 + $0x88] sm:$0xff] %vm197_vm2, %v3145_v9 }
  0x12   : > { %v2802_v5 = vld [vmem:[%s3197_s25 + $0x100] sm:$0xff]   ;;  %2631 = vmatprep.mubr.msk.bf16.mxu0 %vm938_vm0, %v2801_v4  ;;  %216 = vst.msk [vmem:[#allocation2 + $0x90] sm:$0xff] %vm197_vm2, %v3145_v9  ;;  %217 = vst.msk [vmem:[#allocation2 + $0x98] sm:$0xff] %vm197_vm2, %v3145_v9  ;;  %v2804_v10 = vld [vmem:[%s3197_s25 + $0x108] sm:$0xff]  }
  0x13   : > { %2695 = vmatprep.mubr.msk.bf16.mxu1 %vm938_vm0, %v2802_v5  ;;  %218 = vst.msk [vmem:[#allocation2 + $0xa0] sm:$0xff] %vm197_vm2, %v3145_v9  ;;  %219 = vst.msk [vmem:[#allocation2 + $0xa8] sm:$0xff] %vm197_vm2, %v3145_v9  ;;  %v2805_v11 = vld [vmem:[%s3197_s25 + $0x10] sm:$0xff]   ;;  %v2807_v13 = vld [vmem:[%s3197_s25 + $0x18] sm:$0xff]  }
  0x14   : > { %2628 = vmatpush3.bf16.msra.mxu0 %v2799_v3  ;;  %2767 = vmatpush3.bf16.msra.mxu1 %v2799_v3  ;;  %220 = vst.msk [vmem:[#allocation2 + $0xb0] sm:$0xff] %vm197_vm2, %v3145_v9  ;;  %221 = vst.msk [vmem:[#allocation2 + $0xb8] sm:$0xff] %vm197_vm2, %v3145_v9  ;;  %v2806_v12 = vld [vmem:[%s3197_s25 + $0x110] sm:$0xff]   ;;  %v2808_v14 = vld [vmem:[%s3197_s25 + $0x118] sm:$0xff]  }
  0x15   : > { %2769 = vmatprep.subr.msk.bf16.mxu0 %vm1131_vm1, %v2800_v6  ;;  %2770 = vmatprep.subr.msk.bf16.mxu1 %vm1131_vm1, %v2800_v6  ;;  %222 = vst.msk [vmem:[#allocation2 + $0xc0] sm:$0xff] %vm197_vm2, %v3145_v9  ;;  %223 = vst.msk [vmem:[#allocation2 + $0xc8] sm:$0xff] %vm197_vm2, %v3145_v9  ;;  %v2809_v15 = vld [vmem:[%s3197_s25 + $0x20] sm:$0xff]   ;;  %v2811_v17 = vld [vmem:[%s3197_s25 + $0x28] sm:$0xff]  }
  0x16   : > { %224 = vst.msk [vmem:[#allocation2 + $0xd0] sm:$0xff] %vm197_vm2, %v3145_v9  ;;  %225 = vst.msk [vmem:[#allocation2 + $0xd8] sm:$0xff] %vm197_vm2, %v3145_v9  ;;  %v2810_v16 = vld [vmem:[%s3197_s25 + $0x120] sm:$0xff]   ;;  %v2812_v18 = vld [vmem:[%s3197_s25 + $0x128] sm:$0xff]  }
  0x17   : > { %226 = vst.msk [vmem:[#allocation2 + $0xe0] sm:$0xff] %vm197_vm2, %v3145_v9  ;;  %227 = vst.msk [vmem:[#allocation2 + $0xe8] sm:$0xff] %vm197_vm2, %v3145_v9  ;;  %v2813_v19 = vld [vmem:[%s3197_s25 + $0x30] sm:$0xff]   ;;  %v2815_v21 = vld [vmem:[%s3197_s25 + $0x38] sm:$0xff]  }
  0x18   : > { %228 = vst.msk [vmem:[#allocation2 + $0xf0] sm:$0xff] %vm197_vm2, %v3145_v9  ;;  %229 = vst.msk [vmem:[#allocation2 + $0xf8] sm:$0xff] %vm197_vm2, %v3145_v9  ;;  %2630 = vmatpush3.bf16.msra.mxu0 %v3206_v7  ;;  %2768 = vmatpush3.bf16.msra.mxu1 %v3206_v7  ;;  %v2814_v20 = vld [vmem:[%s3197_s25 + $0x130] sm:$0xff]   ;;  %v2816_v22 = vld [vmem:[%s3197_s25 + $0x138] sm:$0xff]  }
  0x19   : > { %230 = vst.msk [vmem:[#allocation2 + $0x100] sm:$0xff] %vm197_vm2, %v3145_v9  ;;  %231 = vst.msk [vmem:[#allocation2 + $0x108] sm:$0xff] %vm197_vm2, %v3145_v9  ;;  %v2817_v23 = vld [vmem:[%s3197_s25 + $0x40] sm:$0xff]   ;;  %v2819_v25 = vld [vmem:[%s3197_s25 + $0x48] sm:$0xff]  }
  0x1a   : > { %232 = vst.msk [vmem:[#allocation2 + $0x110] sm:$0xff] %vm197_vm2, %v3145_v9  ;;  %233 = vst.msk [vmem:[#allocation2 + $0x118] sm:$0xff] %vm197_vm2, %v3145_v9  ;;  %v2818_v24 = vld [vmem:[%s3197_s25 + $0x140] sm:$0xff]   ;;  %v2820_v26 = vld [vmem:[%s3197_s25 + $0x148] sm:$0xff]  }
  0x1b   : > { %234 = vst.msk [vmem:[#allocation2 + $0x120] sm:$0xff] %vm197_vm2, %v3145_v9  ;;  %235 = vst.msk [vmem:[#allocation2 + $0x128] sm:$0xff] %vm197_vm2, %v3145_v9  ;;  %2632 = vmatmul.mubr.msk.bf16.vlgmr.msra.gmra.mrb[0].mxu0 %vm938_vm0, %v3209_v8  ;;  %2696 = vmatmul.mubr.msk.bf16.vlgmr.msra.gmra.mrb[0].mxu1 %vm938_vm0, %v2804_v10  ;;  %v2821_v27 = vld [vmem:[%s3197_s25 + $0x50] sm:$0xff]   ;;  %v2823_v29 = vld [vmem:[%s3197_s25 + $0x58] sm:$0xff]  }
  0x1c   : > { %236 = vst.msk [vmem:[#allocation2 + $0x130] sm:$0xff] %vm197_vm2, %v3145_v9  ;;  %237 = vst.msk [vmem:[#allocation2 + $0x138] sm:$0xff] %vm197_vm2, %v3145_v9  ;;  %2635 = vmatprep.mubr.msk.bf16.mxu0 %vm938_vm0, %v2805_v11  ;;  %2699 = vmatprep.mubr.msk.bf16.mxu1 %vm938_vm0, %v2806_v12  ;;  %v2822_v28 = vld [vmem:[%s3197_s25 + $0x150] sm:$0xff]   ;;  %v2824_v30 = vld [vmem:[%s3197_s25 + $0x158] sm:$0xff]  }
  0x1d   : > { %238 = vst.msk [vmem:[#allocation2 + $0x140] sm:$0xff] %vm197_vm2, %v3145_v9  ;;  %239 = vst.msk [vmem:[#allocation2 + $0x148] sm:$0xff] %vm197_vm2, %v3145_v9  ;;  %v2825_v31 = vld [vmem:[%s3197_s25 + $0x60] sm:$0xff]   ;;  %v2827_v33 = vld [vmem:[%s3197_s25 + $0x68] sm:$0xff]  }
  0x1e   : > { %240 = vst.msk [vmem:[#allocation2 + $0x150] sm:$0xff] %vm197_vm2, %v3145_v9  ;;  %241 = vst.msk [vmem:[#allocation2 + $0x158] sm:$0xff] %vm197_vm2, %v3145_v9  ;;  %v2826_v32 = vld [vmem:[%s3197_s25 + $0x160] sm:$0xff]   ;;  %v2828_v34 = vld [vmem:[%s3197_s25 + $0x168] sm:$0xff]  }
  0x1f   : > { %242 = vst.msk [vmem:[#allocation2 + $0x160] sm:$0xff] %vm197_vm2, %v3145_v9  ;;  %243 = vst.msk [vmem:[#allocation2 + $0x168] sm:$0xff] %vm197_vm2, %v3145_v9  ;;  %v2829_v35 = vld [vmem:[%s3197_s25 + $0x70] sm:$0xff]   ;;  %v2831_v37 = vld [vmem:[%s3197_s25 + $0x78] sm:$0xff]  }
  0x20   : > { %244 = vst.msk [vmem:[#allocation2 + $0x170] sm:$0xff] %vm197_vm2, %v3145_v9  ;;  %245 = vst.msk [vmem:[#allocation2 + $0x178] sm:$0xff] %vm197_vm2, %v3145_v9  ;;  %v2830_v36 = vld [vmem:[%s3197_s25 + $0x170] sm:$0xff]   ;;  %v2832_v38 = vld [vmem:[%s3197_s25 + $0x178] sm:$0xff]  }
  0x21   : > { %246 = vst.msk [vmem:[#allocation2 + $0x180] sm:$0xff] %vm197_vm2, %v3145_v9  ;;  %247 = vst.msk [vmem:[#allocation2 + $0x188] sm:$0xff] %vm197_vm2, %v3145_v9  ;;  %v2833_v39 = vld [vmem:[%s3197_s25 + $0x80] sm:$0xff]   ;;  %v2835_v41 = vld [vmem:[%s3197_s25 + $0x88] sm:$0xff]  }
  0x22   : > { %248 = vst.msk [vmem:[#allocation2 + $0x190] sm:$0xff] %vm197_vm2, %v3145_v9  ;;  %249 = vst.msk [vmem:[#allocation2 + $0x198] sm:$0xff] %vm197_vm2, %v3145_v9  ;;  %v2834_v40 = vld [vmem:[%s3197_s25 + $0x180] sm:$0xff]   ;;  %v2836_v42 = vld [vmem:[%s3197_s25 + $0x188] sm:$0xff]  }
  0x23   : > { %250 = vst.msk [vmem:[#allocation2 + $0x1a0] sm:$0xff] %vm197_vm2, %v3145_v9  ;;  %251 = vst.msk [vmem:[#allocation2 + $0x1a8] sm:$0xff] %vm197_vm2, %v3145_v9  ;;  %2636 = vmatmul.mubr.msk.bf16.gmra.mrb[4].mxu0 %vm938_vm0, %v2807_v13  ;;  %2700 = vmatmul.mubr.msk.bf16.gmra.mrb[4].mxu1 %vm938_vm0, %v2808_v14  ;;  %v2837_v43 = vld [vmem:[%s3197_s25 + $0x90] sm:$0xff]   ;;  %v2839_v45 = vld [vmem:[%s3197_s25 + $0x98] sm:$0xff]  }
  0x24   : > { %252 = vst.msk [vmem:[#allocation2 + $0x1b0] sm:$0xff] %vm197_vm2, %v3145_v9  ;;  %253 = vst.msk [vmem:[#allocation2 + $0x1b8] sm:$0xff] %vm197_vm2, %v3145_v9  ;;  %2639 = vmatprep.mubr.msk.bf16.mxu0 %vm938_vm0, %v2809_v15  ;;  %2703 = vmatprep.mubr.msk.bf16.mxu1 %vm938_vm0, %v2810_v16  ;;  %v2838_v44 = vld [vmem:[%s3197_s25 + $0x190] sm:$0xff]   ;;  %v2840_v46 = vld [vmem:[%s3197_s25 + $0x198] sm:$0xff]  }
  0x25   : > { %254 = vst.msk [vmem:[#allocation2 + $0x1c0] sm:$0xff] %vm197_vm2, %v3145_v9  ;;  %255 = vst.msk [vmem:[#allocation2 + $0x1c8] sm:$0xff] %vm197_vm2, %v3145_v9  ;;  %v2841_v47 = vld [vmem:[%s3197_s25 + $0xa0] sm:$0xff]   ;;  %v2843_v49 = vld [vmem:[%s3197_s25 + $0xa8] sm:$0xff]  }
  0x26   : > { %256 = vst.msk [vmem:[#allocation2 + $0x1d0] sm:$0xff] %vm197_vm2, %v3145_v9  ;;  %257 = vst.msk [vmem:[#allocation2 + $0x1d8] sm:$0xff] %vm197_vm2, %v3145_v9  ;;  %v2842_v48 = vld [vmem:[%s3197_s25 + $0x1a0] sm:$0xff]   ;;  %v2844_v50 = vld [vmem:[%s3197_s25 + $0x1a8] sm:$0xff]  }
  0x27   : > { %258 = vst.msk [vmem:[#allocation2 + $0x1e0] sm:$0xff] %vm197_vm2, %v3145_v9  ;;  %259 = vst.msk [vmem:[#allocation2 + $0x1e8] sm:$0xff] %vm197_vm2, %v3145_v9  ;;  %v2845_v51 = vld [vmem:[%s3197_s25 + $0xb0] sm:$0xff]   ;;  %v2847_v53 = vld [vmem:[%s3197_s25 + $0xb8] sm:$0xff]  }
  0x28   : > { %260 = vst.msk [vmem:[#allocation2 + $0x1f0] sm:$0xff] %vm197_vm2, %v3145_v9  ;;  %261 = vst.msk [vmem:[#allocation2 + $0x1f8] sm:$0xff] %vm197_vm2, %v3145_v9  ;;  %v2846_v52 = vld [vmem:[%s3197_s25 + $0x1b0] sm:$0xff]   ;;  %v2848_v54 = vld [vmem:[%s3197_s25 + $0x1b8] sm:$0xff]  }
  0x29   : > { %262 = vst.msk [vmem:[#allocation2 + $0x200] sm:$0xff] %vm197_vm2, %v3145_v9  ;;  %263 = vst.msk [vmem:[#allocation2 + $0x208] sm:$0xff] %vm197_vm2, %v3145_v9  ;;  %v2849_v55 = vld [vmem:[%s3197_s25 + $0xc0] sm:$0xff]   ;;  %v2851_v57 = vld [vmem:[%s3197_s25 + $0xc8] sm:$0xff]  }
  0x2a   : > { %264 = vst.msk [vmem:[#allocation2 + $0x210] sm:$0xff] %vm197_vm2, %v3145_v9  ;;  %265 = vst.msk [vmem:[#allocation2 + $0x218] sm:$0xff] %vm197_vm2, %v3145_v9  ;;  %v2850_v56 = vld [vmem:[%s3197_s25 + $0x1c0] sm:$0xff]   ;;  %v2852_v58 = vld [vmem:[%s3197_s25 + $0x1c8] sm:$0xff]  }
  0x2b   : > { %266 = vst.msk [vmem:[#allocation2 + $0x220] sm:$0xff] %vm197_vm2, %v3145_v9  ;;  %267 = vst.msk [vmem:[#allocation2 + $0x228] sm:$0xff] %vm197_vm2, %v3145_v9  ;;  %2640 = vmatmul.mubr.msk.bf16.gmra.mrb[8].mxu0 %vm938_vm0, %v2811_v17  ;;  %2704 = vmatmul.mubr.msk.bf16.gmra.mrb[8].mxu1 %vm938_vm0, %v2812_v18  ;;  %v2853_v59 = vld [vmem:[%s3197_s25 + $0xd0] sm:$0xff]   ;;  %v2855_v61 = vld [vmem:[%s3197_s25 + $0xd8] sm:$0xff]  }
  0x2c   : > { %268 = vst.msk [vmem:[#allocation2 + $0x230] sm:$0xff] %vm197_vm2, %v3145_v9  ;;  %269 = vst.msk [vmem:[#allocation2 + $0x238] sm:$0xff] %vm197_vm2, %v3145_v9  ;;  %2643 = vmatprep.mubr.msk.bf16.mxu0 %vm938_vm0, %v2813_v19  ;;  %2707 = vmatprep.mubr.msk.bf16.mxu1 %vm938_vm0, %v2814_v20  ;;  %v2854_v60 = vld [vmem:[%s3197_s25 + $0x1d0] sm:$0xff]   ;;  %v2856_v62 = vld [vmem:[%s3197_s25 + $0x1d8] sm:$0xff]  }
  0x2d   : > { %270 = vst.msk [vmem:[#allocation2 + $0x240] sm:$0xff] %vm197_vm2, %v3145_v9  ;;  %271 = vst.msk [vmem:[#allocation2 + $0x248] sm:$0xff] %vm197_vm2, %v3145_v9  ;;  %v2857_v63 = vld [vmem:[%s3197_s25 + $0xe0] sm:$0xff]   ;;  %v2859_v1 = vld [vmem:[%s3197_s25 + $0xe8] sm:$0xff]  }
  0x2e   : > { %272 = vst.msk [vmem:[#allocation2 + $0x250] sm:$0xff] %vm197_vm2, %v3145_v9  ;;  %273 = vst.msk [vmem:[#allocation2 + $0x258] sm:$0xff] %vm197_vm2, %v3145_v9  ;;  %v2858_v0 = vld [vmem:[%s3197_s25 + $0x1e0] sm:$0xff]   ;;  %v2860_v2 = vld [vmem:[%s3197_s25 + $0x1e8] sm:$0xff]  }
  0x2f   : > { %274 = vst.msk [vmem:[#allocation2 + $0x260] sm:$0xff] %vm197_vm2, %v3145_v9  ;;  %275 = vst.msk [vmem:[#allocation2 + $0x268] sm:$0xff] %vm197_vm2, %v3145_v9  ;;  %v2861_v3 = vld [vmem:[%s3197_s25 + $0xf0] sm:$0xff]   ;;  %v2863_v5 = vld [vmem:[%s3197_s25 + $0xf8] sm:$0xff]  }
  0x30   : > { %276 = vst.msk [vmem:[#allocation2 + $0x270] sm:$0xff] %vm197_vm2, %v3145_v9  ;;  %277 = vst.msk [vmem:[#allocation2 + $0x278] sm:$0xff] %vm197_vm2, %v3145_v9  ;;  %v2862_v4 = vld [vmem:[%s3197_s25 + $0x1f0] sm:$0xff]   ;;  %v2864_v6 = vld [vmem:[%s3197_s25 + $0x1f8] sm:$0xff]  }
  0x31   : > { %278 = vst.msk [vmem:[#allocation2 + $0x280] sm:$0xff] %vm197_vm2, %v3145_v9  ;;  %279 = vst.msk [vmem:[#allocation2 + $0x288] sm:$0xff] %vm197_vm2, %v3145_v9  ;;  %v328_v7 = vld [vmem:[#allocation2 + $0x10] sm:$0xff]  ;;  %v390_v10 = vld [vmem:[#allocation2 + $0x200] sm:$0xff] }
  0x32   : > { %280 = vst.msk [vmem:[#allocation2 + $0x290] sm:$0xff] %vm197_vm2, %v3145_v9  ;;  %281 = vst.msk [vmem:[#allocation2 + $0x298] sm:$0xff] %vm197_vm2, %v3145_v9  ;;  %v392_v8 = vld [vmem:[#allocation2 + $0x210] sm:$0xff]  ;;  %v329_v13 = vld [vmem:[#allocation2 + $0x18] sm:$0xff] }
  0x33   : > { %282 = vst.msk [vmem:[#allocation2 + $0x2a0] sm:$0xff] %vm197_vm2, %v3145_v9  ;;  %283 = vst.msk [vmem:[#allocation2 + $0x2a8] sm:$0xff] %vm197_vm2, %v3145_v9  ;;  %2644 = vmatmul.mubr.msk.bf16.gmra.mrb[12].mxu0 %vm938_vm0, %v2815_v21  ;;  %2708 = vmatmul.mubr.msk.bf16.gmra.mrb[12].mxu1 %vm938_vm0, %v2816_v22  ;;  %v393_v14 = vld [vmem:[#allocation2 + $0x218] sm:$0xff]  ;;  %v327_v19 = vld [vmem:[#allocation2 + $0x8] sm:$0xff] }
  0x34   : > { %284 = vst.msk [vmem:[#allocation2 + $0x2b0] sm:$0xff] %vm197_vm2, %v3145_v9  ;;  %285 = vst.msk [vmem:[#allocation2 + $0x2b8] sm:$0xff] %vm197_vm2, %v3145_v9  ;;  %2647 = vmatprep.mubr.msk.bf16.mxu0 %vm938_vm0, %v2817_v23  ;;  %2711 = vmatprep.mubr.msk.bf16.mxu1 %vm938_vm0, %v2818_v24  ;;  %v391_v20 = vld [vmem:[#allocation2 + $0x208] sm:$0xff] }
  0x35   : > { %286 = vst.msk [vmem:[#allocation2 + $0x2c0] sm:$0xff] %vm197_vm2, %v3145_v9  ;;  %287 = vst.msk [vmem:[#allocation2 + $0x2c8] sm:$0xff] %vm197_vm2, %v3145_v9 }
  0x36   : > { %288 = vst.msk [vmem:[#allocation2 + $0x2d0] sm:$0xff] %vm197_vm2, %v3145_v9  ;;  %289 = vst.msk [vmem:[#allocation2 + $0x2d8] sm:$0xff] %vm197_vm2, %v3145_v9 }
  0x37   : > { %290 = vst.msk [vmem:[#allocation2 + $0x2e0] sm:$0xff] %vm197_vm2, %v3145_v9  ;;  %291 = vst.msk [vmem:[#allocation2 + $0x2e8] sm:$0xff] %vm197_vm2, %v3145_v9 }
  0x38   : > { %292 = vst.msk [vmem:[#allocation2 + $0x2f0] sm:$0xff] %vm197_vm2, %v3145_v9  ;;  %293 = vst.msk [vmem:[#allocation2 + $0x2f8] sm:$0xff] %vm197_vm2, %v3145_v9 }
  0x39   : > { %294 = vst.msk [vmem:[#allocation2 + $0x300] sm:$0xff] %vm197_vm2, %v3145_v9  ;;  %295 = vst.msk [vmem:[#allocation2 + $0x308] sm:$0xff] %vm197_vm2, %v3145_v9 }
  0x3a   : > { %296 = vst.msk [vmem:[#allocation2 + $0x310] sm:$0xff] %vm197_vm2, %v3145_v9  ;;  %297 = vst.msk [vmem:[#allocation2 + $0x318] sm:$0xff] %vm197_vm2, %v3145_v9 }
  0x3b   : > { %298 = vst.msk [vmem:[#allocation2 + $0x320] sm:$0xff] %vm197_vm2, %v3145_v9  ;;  %299 = vst.msk [vmem:[#allocation2 + $0x328] sm:$0xff] %vm197_vm2, %v3145_v9  ;;  %2648 = vmatmul.mubr.msk.bf16.gmra.mrb[16].mxu0 %vm938_vm0, %v2819_v25  ;;  %2712 = vmatmul.mubr.msk.bf16.gmra.mrb[16].mxu1 %vm938_vm0, %v2820_v26 }
  0x3c   : > { %300 = vst.msk [vmem:[#allocation2 + $0x330] sm:$0xff] %vm197_vm2, %v3145_v9  ;;  %301 = vst.msk [vmem:[#allocation2 + $0x338] sm:$0xff] %vm197_vm2, %v3145_v9  ;;  %2651 = vmatprep.mubr.msk.bf16.mxu0 %vm938_vm0, %v2821_v27  ;;  %2715 = vmatprep.mubr.msk.bf16.mxu1 %vm938_vm0, %v2822_v28 }
  0x3d   : > { %302 = vst.msk [vmem:[#allocation2 + $0x340] sm:$0xff] %vm197_vm2, %v3145_v9  ;;  %303 = vst.msk [vmem:[#allocation2 + $0x348] sm:$0xff] %vm197_vm2, %v3145_v9 }
  0x3e   : > { %304 = vst.msk [vmem:[#allocation2 + $0x350] sm:$0xff] %vm197_vm2, %v3145_v9  ;;  %305 = vst.msk [vmem:[#allocation2 + $0x358] sm:$0xff] %vm197_vm2, %v3145_v9 }
  0x3f   : > { %306 = vst.msk [vmem:[#allocation2 + $0x360] sm:$0xff] %vm197_vm2, %v3145_v9  ;;  %307 = vst.msk [vmem:[#allocation2 + $0x368] sm:$0xff] %vm197_vm2, %v3145_v9 }
  0x40   : > { %308 = vst.msk [vmem:[#allocation2 + $0x370] sm:$0xff] %vm197_vm2, %v3145_v9  ;;  %309 = vst.msk [vmem:[#allocation2 + $0x378] sm:$0xff] %vm197_vm2, %v3145_v9 }
  0x41   : > { %310 = vst.msk [vmem:[#allocation2 + $0x380] sm:$0xff] %vm197_vm2, %v3145_v9  ;;  %311 = vst.msk [vmem:[#allocation2 + $0x388] sm:$0xff] %vm197_vm2, %v3145_v9 }
  0x42   : > { %312 = vst.msk [vmem:[#allocation2 + $0x390] sm:$0xff] %vm197_vm2, %v3145_v9  ;;  %313 = vst.msk [vmem:[#allocation2 + $0x398] sm:$0xff] %vm197_vm2, %v3145_v9 }
  0x43   : > { %314 = vst.msk [vmem:[#allocation2 + $0x3a0] sm:$0xff] %vm197_vm2, %v3145_v9  ;;  %315 = vst.msk [vmem:[#allocation2 + $0x3a8] sm:$0xff] %vm197_vm2, %v3145_v9  ;;  %2652 = vmatmul.mubr.msk.bf16.gmra.mrb[20].mxu0 %vm938_vm0, %v2823_v29  ;;  %2716 = vmatmul.mubr.msk.bf16.gmra.mrb[20].mxu1 %vm938_vm0, %v2824_v30 }
  0x44   : > { %316 = vst.msk [vmem:[#allocation2 + $0x3b0] sm:$0xff] %vm197_vm2, %v3145_v9  ;;  %317 = vst.msk [vmem:[#allocation2 + $0x3b8] sm:$0xff] %vm197_vm2, %v3145_v9  ;;  %2655 = vmatprep.mubr.msk.bf16.mxu0 %vm938_vm0, %v2825_v31  ;;  %2719 = vmatprep.mubr.msk.bf16.mxu1 %vm938_vm0, %v2826_v32  ;;  %v332_v31 = vld [vmem:[#allocation2 + $0x30] sm:$0xff] }
  0x45   : > { %318 = vst.msk [vmem:[#allocation2 + $0x3c0] sm:$0xff] %vm197_vm2, %v3145_v9  ;;  %319 = vst.msk [vmem:[#allocation2 + $0x3c8] sm:$0xff] %vm197_vm2, %v3145_v9  ;;  %v396_v32 = vld [vmem:[#allocation2 + $0x230] sm:$0xff] }
  0x46   : > { %320 = vst.msk [vmem:[#allocation2 + $0x3d0] sm:$0xff] %vm197_vm2, %v3145_v9  ;;  %321 = vst.msk [vmem:[#allocation2 + $0x3d8] sm:$0xff] %vm197_vm2, %v3145_v9 }
  0x47   : > { %322 = vst.msk [vmem:[#allocation2 + $0x3e0] sm:$0xff] %vm197_vm2, %v3145_v9  ;;  %323 = vst.msk [vmem:[#allocation2 + $0x3e8] sm:$0xff] %vm197_vm2, %v3145_v9 }
  0x48   : > { %324 = vst.msk [vmem:[#allocation2 + $0x3f0] sm:$0xff] %vm197_vm2, %v3145_v9  ;;  %325 = vst.msk [vmem:[#allocation2 + $0x3f8] sm:$0xff] %vm197_vm2, %v3145_v9  ;;  %v326_v9 = vld [vmem:[#allocation2] sm:$0xff] }
  0x4b   : > { %2656 = vmatmul.mubr.msk.bf16.gmra.mrb[24].mxu0 %vm938_vm0, %v2827_v33  ;;  %2720 = vmatmul.mubr.msk.bf16.gmra.mrb[24].mxu1 %vm938_vm0, %v2828_v34  ;;  %v330_v33 = vld [vmem:[#allocation2 + $0x20] sm:$0xff] }
  0x4c   : > { %2659 = vmatprep.mubr.msk.bf16.mxu0 %vm938_vm0, %v2829_v35  ;;  %2723 = vmatprep.mubr.msk.bf16.mxu1 %vm938_vm0, %v2830_v36  ;;  %v394_v34 = vld [vmem:[#allocation2 + $0x220] sm:$0xff] }
  0x53   : > { %2660 = vmatmul.mubr.msk.bf16.gmra.mrb[28].mxu0 %vm938_vm0, %v2831_v37  ;;  %2724 = vmatmul.mubr.msk.bf16.gmra.mrb[28].mxu1 %vm938_vm0, %v2832_v38  ;;  %v333_v37 = vld [vmem:[#allocation2 + $0x38] sm:$0xff] }
  0x54   : > { %2663 = vmatprep.mubr.msk.bf16.mxu0 %vm938_vm0, %v2833_v39  ;;  %2727 = vmatprep.mubr.msk.bf16.mxu1 %vm938_vm0, %v2834_v40  ;;  %v397_v38 = vld [vmem:[#allocation2 + $0x238] sm:$0xff] }
  0x5b   : > { %2664 = vmatmul.mubr.msk.bf16.gmra.mrb[32].mxu0 %vm938_vm0, %v2835_v41  ;;  %2728 = vmatmul.mubr.msk.bf16.gmra.mrb[32].mxu1 %vm938_vm0, %v2836_v42 }
  0x5c   : > { %2667 = vmatprep.mubr.msk.bf16.mxu0 %vm938_vm0, %v2837_v43  ;;  %2731 = vmatprep.mubr.msk.bf16.mxu1 %vm938_vm0, %v2838_v44  ;;  %v331_v43 = vld [vmem:[#allocation2 + $0x28] sm:$0xff] }
  0x5d   : > { %v395_v44 = vld [vmem:[#allocation2 + $0x228] sm:$0xff] }
  0x63   : > { %2668 = vmatmul.mubr.msk.bf16.gmra.mrb[36].mxu0 %vm938_vm0, %v2839_v45  ;;  %2732 = vmatmul.mubr.msk.bf16.gmra.mrb[36].mxu1 %vm938_vm0, %v2840_v46 }
  0x64   : > { %2671 = vmatprep.mubr.msk.bf16.mxu0 %vm938_vm0, %v2841_v47  ;;  %2735 = vmatprep.mubr.msk.bf16.mxu1 %vm938_vm0, %v2842_v48 }
  0x6b   : > { %2672 = vmatmul.mubr.msk.bf16.gmra.mrb[40].mxu0 %vm938_vm0, %v2843_v49  ;;  %2736 = vmatmul.mubr.msk.bf16.gmra.mrb[40].mxu1 %vm938_vm0, %v2844_v50 }
  0x6c   : > { %2675 = vmatprep.mubr.msk.bf16.mxu0 %vm938_vm0, %v2845_v51  ;;  %2739 = vmatprep.mubr.msk.bf16.mxu1 %vm938_vm0, %v2846_v52 }
  0x73   : > { %2676 = vmatmul.mubr.msk.bf16.gmra.mrb[44].mxu0 %vm938_vm0, %v2847_v53  ;;  %2740 = vmatmul.mubr.msk.bf16.gmra.mrb[44].mxu1 %vm938_vm0, %v2848_v54 }
  0x74   : > { %2679 = vmatprep.mubr.msk.bf16.mxu0 %vm938_vm0, %v2849_v55  ;;  %2743 = vmatprep.mubr.msk.bf16.mxu1 %vm938_vm0, %v2850_v56 }
  0x7b   : > { %2680 = vmatmul.mubr.msk.bf16.gmra.mrb[48].mxu0 %vm938_vm0, %v2851_v57  ;;  %2744 = vmatmul.mubr.msk.bf16.gmra.mrb[48].mxu1 %vm938_vm0, %v2852_v58 }
  0x7c   : > { %2683 = vmatprep.mubr.msk.bf16.mxu0 %vm938_vm0, %v2853_v59  ;;  %2747 = vmatprep.mubr.msk.bf16.mxu1 %vm938_vm0, %v2854_v60 }
  0x83   : > { %2684 = vmatmul.mubr.msk.bf16.gmra.mrb[52].mxu0 %vm938_vm0, %v2855_v61  ;;  %2748 = vmatmul.mubr.msk.bf16.gmra.mrb[52].mxu1 %vm938_vm0, %v2856_v62  ;;  %v336_v62 = vld [vmem:[#allocation2 + $0x50] sm:$0xff] }
  0x84   : > { %2687 = vmatprep.mubr.msk.bf16.mxu0 %vm938_vm0, %v2857_v63  ;;  %2751 = vmatprep.mubr.msk.bf16.mxu1 %vm938_vm0, %v2858_v0  ;;  %v400_v63 = vld [vmem:[#allocation2 + $0x250] sm:$0xff] }
  0x8b   : > { %2688 = vmatmul.mubr.msk.bf16.gmra.mrb[56].mxu0 %vm938_vm0, %v2859_v1  ;;  %2752 = vmatmul.mubr.msk.bf16.gmra.mrb[56].mxu1 %vm938_vm0, %v2860_v2  ;;  %v334_v1 = vld [vmem:[#allocation2 + $0x40] sm:$0xff] }
  0x8c   : > { %2691 = vmatprep.mubr.msk.bf16.mxu0 %vm938_vm0, %v2861_v3  ;;  %2755 = vmatprep.mubr.msk.bf16.mxu1 %vm938_vm0, %v2862_v4  ;;  %v398_v2 = vld [vmem:[#allocation2 + $0x240] sm:$0xff] }
  0x93   : > { %2692 = vmatmul.mubr.msk.bf16.gmra.mrb[60].mxu0 %vm938_vm0, %v2863_v5  ;;  %2756 = vmatmul.mubr.msk.bf16.gmra.mrb[60].mxu1 %vm938_vm0, %v2864_v6  ;;  %v337_v5 = vld [vmem:[#allocation2 + $0x58] sm:$0xff] }
  0x94   : > { %v401_v6 = vld [vmem:[#allocation2 + $0x258] sm:$0xff] }
  0xee   : > { %v2633_v11 = vpop.f32.mrb[0].mxu0  ;;  %v2697_v12 = vpop.f32.mrb[0].mxu1 }
  0xef   : > { %v1682_v15 = vadd.f32 %v2633_v11, %v328_v7  ;;  %v1746_v16 = vadd.f32 %v2697_v12, %v392_v8  ;;  %v1169_v17 = vpop.f32.mrb[1].mxu0  ;;  %v1425_v18 = vpop.f32.mrb[1].mxu1  ;;  %v335_v11 = vld [vmem:[#allocation2 + $0x48] sm:$0xff] }
  0xf0   : > { %v1680_v21 = vadd.f32 %v1169_v17, %v326_v9  ;;  %v1744_v22 = vadd.f32 %v1425_v18, %v390_v10  ;;  %v2634_v23 = vpop.f32.mrb[2].mxu0  ;;  %v2698_v24 = vpop.f32.mrb[2].mxu1  ;;  %v399_v12 = vld [vmem:[#allocation2 + $0x248] sm:$0xff] }
  0xf1   : > { %1811 = vst.msk [vmem:[#allocation2 + $0x10] sm:$0xff] %vm197_vm2, %v1682_v15  ;;  %1875 = vst.msk [vmem:[#allocation2 + $0x210] sm:$0xff] %vm197_vm2, %v1746_v16  ;;  %v1683_v25 = vadd.f32 %v2634_v23, %v329_v13  ;;  %v1747_v26 = vadd.f32 %v2698_v24, %v393_v14  ;;  %v1172_v27 = vpop.f32.mrb[3].mxu0  ;;  %v1428_v28 = vpop.f32.mrb[3].mxu1 }
  0xf2   : > { %1809 = vst.msk [vmem:[#allocation2] sm:$0xff] %vm197_vm2, %v1680_v21  ;;  %1873 = vst.msk [vmem:[#allocation2 + $0x200] sm:$0xff] %vm197_vm2, %v1744_v22  ;;  %v1681_v29 = vadd.f32 %v1172_v27, %v327_v19  ;;  %v1745_v30 = vadd.f32 %v1428_v28, %v391_v20 }
  0xf3   : > { %1812 = vst.msk [vmem:[#allocation2 + $0x18] sm:$0xff] %vm197_vm2, %v1683_v25  ;;  %1876 = vst.msk [vmem:[#allocation2 + $0x218] sm:$0xff] %vm197_vm2, %v1747_v26 }
  0xf4   : > { %1810 = vst.msk [vmem:[#allocation2 + $0x8] sm:$0xff] %vm197_vm2, %v1681_v29  ;;  %1874 = vst.msk [vmem:[#allocation2 + $0x208] sm:$0xff] %vm197_vm2, %v1745_v30 }
  0xf6   : > { %v2637_v35 = vpop.f32.mrb[4].mxu0  ;;  %v2701_v36 = vpop.f32.mrb[4].mxu1 }
  0xf7   : > { %v1686_v39 = vadd.f32 %v2637_v35, %v332_v31  ;;  %v1750_v40 = vadd.f32 %v2701_v36, %v396_v32  ;;  %v1185_v41 = vpop.f32.mrb[5].mxu0  ;;  %v1441_v42 = vpop.f32.mrb[5].mxu1  ;;  %v340_v32 = vld [vmem:[#allocation2 + $0x70] sm:$0xff]  ;;  %v338_v36 = vld [vmem:[#allocation2 + $0x60] sm:$0xff] }
  0xf8   : > { %v1942_v45 = vld [vmem:[#allocation2 + $0x10] sm:$0xff]  ;;  %v1684_v47 = vadd.f32 %v1185_v41, %v330_v33  ;;  %v1748_v48 = vadd.f32 %v1441_v42, %v394_v34  ;;  %v2638_v49 = vpop.f32.mrb[6].mxu0  ;;  %v2702_v50 = vpop.f32.mrb[6].mxu1  ;;  %v341_v41 = vld [vmem:[#allocation2 + $0x78] sm:$0xff] }
  0xf9   : > { %v2006_v46 = vld [vmem:[#allocation2 + $0x210] sm:$0xff]  ;;  %2865 = vtanh.f32 %v1942_v45  ;;  %v1940_v51 = vld [vmem:[#allocation2] sm:$0xff]  ;;  %1815 = vst.msk [vmem:[#allocation2 + $0x30] sm:$0xff] %vm197_vm2, %v1686_v39  ;;  %1879 = vst.msk [vmem:[#allocation2 + $0x230] sm:$0xff] %vm197_vm2, %v1750_v40  ;;  %v1687_v53 = vadd.f32 %v2638_v49, %v333_v37  ;;  %v1751_v54 = vadd.f32 %v2702_v50, %v397_v38  ;;  %v1188_v55 = vpop.f32.mrb[7].mxu0  ;;  %v1444_v56 = vpop.f32.mrb[7].mxu1 }
  0xfa   : > { %v2004_v52 = vld [vmem:[#allocation2 + $0x200] sm:$0xff]  ;;  %2867 = vtanh.f32 %v2006_v46  ;;  %v1943_v57 = vld [vmem:[#allocation2 + $0x18] sm:$0xff]  ;;  %1813 = vst.msk [vmem:[#allocation2 + $0x20] sm:$0xff] %vm197_vm2, %v1684_v47  ;;  %1877 = vst.msk [vmem:[#allocation2 + $0x220] sm:$0xff] %vm197_vm2, %v1748_v48  ;;  %v1685_v58 = vadd.f32 %v1188_v55, %v331_v43  ;;  %v1749_v59 = vadd.f32 %v1444_v56, %v395_v44 }
  0xfb   : > { %2869 = vtanh.f32 %v1940_v51  ;;  %v2007_v60 = vld [vmem:[#allocation2 + $0x218] sm:$0xff]  ;;  %1816 = vst.msk [vmem:[#allocation2 + $0x38] sm:$0xff] %vm197_vm2, %v1687_v53  ;;  %1880 = vst.msk [vmem:[#allocation2 + $0x238] sm:$0xff] %vm197_vm2, %v1751_v54  ;;  %v1941_v61 = vld [vmem:[#allocation2 + $0x8] sm:$0xff] }
  0xfc   : > { %2871 = vtanh.f32 %v2004_v52  ;;  %1814 = vst.msk [vmem:[#allocation2 + $0x28] sm:$0xff] %vm197_vm2, %v1685_v58  ;;  %1878 = vst.msk [vmem:[#allocation2 + $0x228] sm:$0xff] %vm197_vm2, %v1749_v59  ;;  %v2005_v0 = vld [vmem:[#allocation2 + $0x208] sm:$0xff]  ;;  %v404_v33 = vld [vmem:[#allocation2 + $0x270] sm:$0xff] }
  0xfd   : > { %2873 = vtanh.f32 %v1943_v57  ;;  %v402_v37 = vld [vmem:[#allocation2 + $0x260] sm:$0xff]  ;;  %v405_v42 = vld [vmem:[#allocation2 + $0x278] sm:$0xff]  ;;  %v339_v48 = vld [vmem:[#allocation2 + $0x68] sm:$0xff] }
  0xfe   : > { %2875 = vtanh.f32 %v2007_v60  ;;  %v2641_v3 = vpop.f32.mrb[8].mxu0  ;;  %v2705_v4 = vpop.f32.mrb[8].mxu1  ;;  %v403_v49 = vld [vmem:[#allocation2 + $0x268] sm:$0xff] }
  0xff   : > { %2877 = vtanh.f32 %v1941_v61  ;;  %v1690_v7 = vadd.f32 %v2641_v3, %v336_v62  ;;  %v1754_v8 = vadd.f32 %v2705_v4, %v400_v63  ;;  %v1201_v9 = vpop.f32.mrb[9].mxu0  ;;  %v1457_v10 = vpop.f32.mrb[9].mxu1 }
 0x100   : > { %2879 = vtanh.f32 %v2005_v0  ;;  %v1946_v13 = vld [vmem:[#allocation2 + $0x30] sm:$0xff]  ;;  %v1688_v15 = vadd.f32 %v1201_v9, %v334_v1  ;;  %v1752_v16 = vadd.f32 %v1457_v10, %v398_v2  ;;  %v2642_v17 = vpop.f32.mrb[10].mxu0  ;;  %v2706_v18 = vpop.f32.mrb[10].mxu1 }
 0x101   : > { %v2010_v14 = vld [vmem:[#allocation2 + $0x230] sm:$0xff]  ;;  %2881 = vtanh.f32 %v1946_v13  ;;  %v1944_v19 = vld [vmem:[#allocation2 + $0x20] sm:$0xff]  ;;  %1819 = vst.msk [vmem:[#allocation2 + $0x50] sm:$0xff] %vm197_vm2, %v1690_v7  ;;  %1883 = vst.msk [vmem:[#allocation2 + $0x250] sm:$0xff] %vm197_vm2, %v1754_v8  ;;  %v1691_v21 = vadd.f32 %v2642_v17, %v337_v5  ;;  %v1755_v22 = vadd.f32 %v2706_v18, %v401_v6  ;;  %v1204_v23 = vpop.f32.mrb[11].mxu0  ;;  %v1460_v24 = vpop.f32.mrb[11].mxu1 }
 0x102   : > { %v2008_v20 = vld [vmem:[#allocation2 + $0x220] sm:$0xff]  ;;  %2883 = vtanh.f32 %v2010_v14  ;;  %v1947_v25 = vld [vmem:[#allocation2 + $0x38] sm:$0xff]  ;;  %1817 = vst.msk [vmem:[#allocation2 + $0x40] sm:$0xff] %vm197_vm2, %v1688_v15  ;;  %1881 = vst.msk [vmem:[#allocation2 + $0x240] sm:$0xff] %vm197_vm2, %v1752_v16  ;;  %v1689_v26 = vadd.f32 %v1204_v23, %v335_v11  ;;  %v1753_v27 = vadd.f32 %v1460_v24, %v399_v12 }
 0x103   : > { %v2866_v28 = vpop.eup %2865  ;;  %2885 = vtanh.f32 %v1944_v19  ;;  %v2011_v29 = vld [vmem:[#allocation2 + $0x238] sm:$0xff]  ;;  %1820 = vst.msk [vmem:[#allocation2 + $0x58] sm:$0xff] %vm197_vm2, %v1691_v21  ;;  %1884 = vst.msk [vmem:[#allocation2 + $0x258] sm:$0xff] %vm197_vm2, %v1755_v22  ;;  %v1945_v31 = vld [vmem:[#allocation2 + $0x28] sm:$0xff] }
 0x104   : > { %v2868_v30 = vpop.eup %2867  ;;  %2198 = vst.msk [vmem:[%s3613_s3 + $0x10] sm:$0xff] %vm197_vm2, %v2866_v28  ;;  %2887 = vtanh.f32 %v2008_v20  ;;  %1818 = vst.msk [vmem:[#allocation2 + $0x48] sm:$0xff] %vm197_vm2, %v1689_v26  ;;  %v2009_v35 = vld [vmem:[#allocation2 + $0x228] sm:$0xff]  ;;  %v344_v8 = vld [vmem:[#allocation2 + $0x90] sm:$0xff] }
 0x105   : > { %1882 = vst.msk [vmem:[#allocation2 + $0x248] sm:$0xff] %vm197_vm2, %v1753_v27  ;;  %v2870_v34 = vpop.eup %2869  ;;  %2262 = vst.msk [vmem:[%s3613_s3 + $0x210] sm:$0xff] %vm197_vm2, %v2868_v30  ;;  %2889 = vtanh.f32 %v1947_v25  ;;  %v408_v9 = vld [vmem:[#allocation2 + $0x290] sm:$0xff]  ;;  %v342_v12 = vld [vmem:[#allocation2 + $0x80] sm:$0xff] }
 0x106   : > { %v2872_v38 = vpop.eup %2871  ;;  %2196 = vst.msk [vmem:[%s3613_s3] sm:$0xff] %vm197_vm2, %v2870_v34  ;;  %2891 = vtanh.f32 %v2011_v29  ;;  %v2645_v39 = vpop.f32.mrb[12].mxu0  ;;  %v406_v13 = vld [vmem:[#allocation2 + $0x280] sm:$0xff]  ;;  %v345_v17 = vld [vmem:[#allocation2 + $0x98] sm:$0xff]  ;;  %v343_v24 = vld [vmem:[#allocation2 + $0x88] sm:$0xff] }
 0x107   : > { %v2709_v40 = vpop.f32.mrb[12].mxu1  ;;  %v2874_v43 = vpop.eup %2873  ;;  %2260 = vst.msk [vmem:[%s3613_s3 + $0x200] sm:$0xff] %vm197_vm2, %v2872_v38  ;;  %2893 = vtanh.f32 %v1945_v31  ;;  %v1694_v44 = vadd.f32 %v2645_v39, %v340_v32  ;;  %v409_v18 = vld [vmem:[#allocation2 + $0x298] sm:$0xff]  ;;  %v407_v25 = vld [vmem:[#allocation2 + $0x288] sm:$0xff] }
 0x108   : > { %v1758_v45 = vadd.f32 %v2709_v40, %v404_v33  ;;  %v1217_v46 = vpop.f32.mrb[13].mxu0  ;;  %v1473_v47 = vpop.f32.mrb[13].mxu1  ;;  %2199 = vst.msk [vmem:[%s3613_s3 + $0x18] sm:$0xff] %vm197_vm2, %v2874_v43  ;;  %2895 = vtanh.f32 %v2009_v35  ;;  %v1950_v51 = vld [vmem:[#allocation2 + $0x50] sm:$0xff] }
 0x109   : > { %v2876_v50 = vpop.eup %2875  ;;  %v2014_v52 = vld [vmem:[#allocation2 + $0x250] sm:$0xff]  ;;  %v1692_v53 = vadd.f32 %v1217_v46, %v338_v36  ;;  %v1756_v54 = vadd.f32 %v1473_v47, %v402_v37  ;;  %v2646_v55 = vpop.f32.mrb[14].mxu0  ;;  %2897 = vtanh.f32 %v1950_v51  ;;  %v1948_v58 = vld [vmem:[#allocation2 + $0x40] sm:$0xff]  ;;  %1823 = vst.msk [vmem:[#allocation2 + $0x70] sm:$0xff] %vm197_vm2, %v1694_v44 }
 0x10a   : > { %v2710_v56 = vpop.f32.mrb[14].mxu1  ;;  %v2878_v57 = vpop.eup %2877  ;;  %2263 = vst.msk [vmem:[%s3613_s3 + $0x218] sm:$0xff] %vm197_vm2, %v2876_v50  ;;  %v2012_v59 = vld [vmem:[#allocation2 + $0x240] sm:$0xff]  ;;  %1887 = vst.msk [vmem:[#allocation2 + $0x270] sm:$0xff] %vm197_vm2, %v1758_v45  ;;  %v1695_v60 = vadd.f32 %v2646_v55, %v341_v41  ;;  %2899 = vtanh.f32 %v2014_v52  ;;  %v1951_v1 = vld [vmem:[#allocation2 + $0x58] sm:$0xff] }
 0x10b   : > { %v1759_v61 = vadd.f32 %v2710_v56, %v405_v42  ;;  %v1220_v62 = vpop.f32.mrb[15].mxu0  ;;  %v1476_v63 = vpop.f32.mrb[15].mxu1  ;;  %2197 = vst.msk [vmem:[%s3613_s3 + $0x8] sm:$0xff] %vm197_vm2, %v2878_v57  ;;  %1821 = vst.msk [vmem:[#allocation2 + $0x60] sm:$0xff] %vm197_vm2, %v1692_v53  ;;  %2901 = vtanh.f32 %v1948_v58  ;;  %v2015_v5 = vld [vmem:[#allocation2 + $0x258] sm:$0xff]  ;;  %v1949_v7 = vld [vmem:[#allocation2 + $0x48] sm:$0xff] }
 0x10c   : > { %v2880_v0 = vpop.eup %2879  ;;  %1885 = vst.msk [vmem:[#allocation2 + $0x260] sm:$0xff] %vm197_vm2, %v1756_v54  ;;  %v1693_v2 = vadd.f32 %v1220_v62, %v339_v48  ;;  %v1757_v3 = vadd.f32 %v1476_v63, %v403_v49  ;;  %1824 = vst.msk [vmem:[#allocation2 + $0x78] sm:$0xff] %vm197_vm2, %v1695_v60  ;;  %2903 = vtanh.f32 %v2012_v59  ;;  %v2013_v11 = vld [vmem:[#allocation2 + $0x248] sm:$0xff]  ;;  %v348_v48 = vld [vmem:[#allocation2 + $0xb0] sm:$0xff] }
 0x10d   : > { %v2882_v4 = vpop.eup %2881  ;;  %2261 = vst.msk [vmem:[%s3613_s3 + $0x208] sm:$0xff] %vm197_vm2, %v2880_v0  ;;  %1888 = vst.msk [vmem:[#allocation2 + $0x278] sm:$0xff] %vm197_vm2, %v1759_v61  ;;  %2905 = vtanh.f32 %v1951_v1  ;;  %v412_v49 = vld [vmem:[#allocation2 + $0x2b0] sm:$0xff]  ;;  %v346_v52 = vld [vmem:[#allocation2 + $0xa0] sm:$0xff] }
 0x10e   : > { %v2884_v6 = vpop.eup %2883  ;;  %2202 = vst.msk [vmem:[%s3613_s3 + $0x30] sm:$0xff] %vm197_vm2, %v2882_v4  ;;  %1822 = vst.msk [vmem:[#allocation2 + $0x68] sm:$0xff] %vm197_vm2, %v1693_v2  ;;  %2907 = vtanh.f32 %v2015_v5  ;;  %v2649_v15 = vpop.f32.mrb[16].mxu0  ;;  %v410_v53 = vld [vmem:[#allocation2 + $0x2a0] sm:$0xff]  ;;  %v349_v57 = vld [vmem:[#allocation2 + $0xb8] sm:$0xff] }
 0x10f   : > { %1886 = vst.msk [vmem:[#allocation2 + $0x268] sm:$0xff] %vm197_vm2, %v1757_v3  ;;  %v2886_v10 = vpop.eup %2885  ;;  %2266 = vst.msk [vmem:[%s3613_s3 + $0x230] sm:$0xff] %vm197_vm2, %v2884_v6  ;;  %v2713_v16 = vpop.f32.mrb[16].mxu1  ;;  %2909 = vtanh.f32 %v1949_v7  ;;  %v1698_v20 = vadd.f32 %v2649_v15, %v344_v8  ;;  %v413_v58 = vld [vmem:[#allocation2 + $0x2b8] sm:$0xff]  ;;  %v347_v0 = vld [vmem:[#allocation2 + $0xa8] sm:$0xff] }
 0x110   : > { %v2888_v14 = vpop.eup %2887  ;;  %2200 = vst.msk [vmem:[%s3613_s3 + $0x20] sm:$0xff] %vm197_vm2, %v2886_v10  ;;  %v1762_v21 = vadd.f32 %v2713_v16, %v408_v9  ;;  %v1233_v22 = vpop.f32.mrb[17].mxu0  ;;  %2911 = vtanh.f32 %v2013_v11  ;;  %v1954_v27 = vld [vmem:[#allocation2 + $0x70] sm:$0xff]  ;;  %v411_v1 = vld [vmem:[#allocation2 + $0x2a8] sm:$0xff] }
 0x111   : > { %v2890_v19 = vpop.eup %2889  ;;  %2264 = vst.msk [vmem:[%s3613_s3 + $0x220] sm:$0xff] %vm197_vm2, %v2888_v14  ;;  %v1489_v23 = vpop.f32.mrb[17].mxu1  ;;  %v2018_v28 = vld [vmem:[#allocation2 + $0x270] sm:$0xff]  ;;  %v1696_v29 = vadd.f32 %v1233_v22, %v342_v12  ;;  %2913 = vtanh.f32 %v1954_v27  ;;  %1827 = vst.msk [vmem:[#allocation2 + $0x90] sm:$0xff] %vm197_vm2, %v1698_v20 }
 0x112   : > { %v2892_v26 = vpop.eup %2891  ;;  %2203 = vst.msk [vmem:[%s3613_s3 + $0x38] sm:$0xff] %vm197_vm2, %v2890_v19  ;;  %v1760_v30 = vadd.f32 %v1489_v23, %v406_v13  ;;  %v2650_v31 = vpop.f32.mrb[18].mxu0  ;;  %v1952_v34 = vld [vmem:[#allocation2 + $0x60] sm:$0xff]  ;;  %1891 = vst.msk [vmem:[#allocation2 + $0x290] sm:$0xff] %vm197_vm2, %v1762_v21  ;;  %2915 = vtanh.f32 %v2018_v28 }
 0x113   : > { %v2714_v32 = vpop.f32.mrb[18].mxu1  ;;  %v2894_v33 = vpop.eup %2893  ;;  %2267 = vst.msk [vmem:[%s3613_s3 + $0x238] sm:$0xff] %vm197_vm2, %v2892_v26  ;;  %v2016_v35 = vld [vmem:[#allocation2 + $0x260] sm:$0xff]  ;;  %v1699_v36 = vadd.f32 %v2650_v31, %v345_v17  ;;  %v1955_v41 = vld [vmem:[#allocation2 + $0x78] sm:$0xff]  ;;  %1825 = vst.msk [vmem:[#allocation2 + $0x80] sm:$0xff] %vm197_vm2, %v1696_v29  ;;  %2917 = vtanh.f32 %v1952_v34 }
 0x114   : > { %v1763_v37 = vadd.f32 %v2714_v32, %v409_v18  ;;  %v1236_v38 = vpop.f32.mrb[19].mxu0  ;;  %v1492_v39 = vpop.f32.mrb[19].mxu1  ;;  %2201 = vst.msk [vmem:[%s3613_s3 + $0x28] sm:$0xff] %vm197_vm2, %v2894_v33  ;;  %1889 = vst.msk [vmem:[#allocation2 + $0x280] sm:$0xff] %vm197_vm2, %v1760_v30  ;;  %v2019_v45 = vld [vmem:[#allocation2 + $0x278] sm:$0xff]  ;;  %2919 = vtanh.f32 %v2016_v35  ;;  %v350_v28 = vld [vmem:[#allocation2 + $0xc0] sm:$0xff] }
 0x115   : > { %v2896_v40 = vpop.eup %2895  ;;  %v1697_v42 = vadd.f32 %v1236_v38, %v343_v24  ;;  %v1761_v43 = vadd.f32 %v1492_v39, %v407_v25  ;;  %1828 = vst.msk [vmem:[#allocation2 + $0x98] sm:$0xff] %vm197_vm2, %v1699_v36  ;;  %v1953_v47 = vld [vmem:[#allocation2 + $0x68] sm:$0xff]  ;;  %2921 = vtanh.f32 %v1955_v41  ;;  %v352_v24 = vld [vmem:[#allocation2 + $0xd0] sm:$0xff]  ;;  %v414_v29 = vld [vmem:[#allocation2 + $0x2c0] sm:$0xff] }
 0x116   : > { %v2898_v44 = vpop.eup %2897  ;;  %2265 = vst.msk [vmem:[%s3613_s3 + $0x228] sm:$0xff] %vm197_vm2, %v2896_v40  ;;  %1892 = vst.msk [vmem:[#allocation2 + $0x298] sm:$0xff] %vm197_vm2, %v1763_v37  ;;  %v2017_v51 = vld [vmem:[#allocation2 + $0x268] sm:$0xff]  ;;  %2923 = vtanh.f32 %v2019_v45  ;;  %v2653_v55 = vpop.f32.mrb[20].mxu0  ;;  %v416_v25 = vld [vmem:[#allocation2 + $0x2d0] sm:$0xff] }
 0x117   : > { %v2900_v46 = vpop.eup %2899  ;;  %2206 = vst.msk [vmem:[%s3613_s3 + $0x50] sm:$0xff] %vm197_vm2, %v2898_v44  ;;  %1826 = vst.msk [vmem:[#allocation2 + $0x88] sm:$0xff] %vm197_vm2, %v1697_v42  ;;  %v2717_v56 = vpop.f32.mrb[20].mxu1  ;;  %2925 = vtanh.f32 %v1953_v47  ;;  %v1702_v60 = vadd.f32 %v2653_v55, %v348_v48  ;;  %v353_v33 = vld [vmem:[#allocation2 + $0xd8] sm:$0xff]  ;;  %v351_v40 = vld [vmem:[#allocation2 + $0xc8] sm:$0xff] }
 0x118   : > { %1890 = vst.msk [vmem:[#allocation2 + $0x288] sm:$0xff] %vm197_vm2, %v1761_v43  ;;  %v2902_v50 = vpop.eup %2901  ;;  %2270 = vst.msk [vmem:[%s3613_s3 + $0x250] sm:$0xff] %vm197_vm2, %v2900_v46  ;;  %v1766_v61 = vadd.f32 %v2717_v56, %v412_v49  ;;  %v1249_v62 = vpop.f32.mrb[21].mxu0  ;;  %2927 = vtanh.f32 %v2017_v51  ;;  %v1958_v3 = vld [vmem:[#allocation2 + $0x90] sm:$0xff]  ;;  %v417_v34 = vld [vmem:[#allocation2 + $0x2d8] sm:$0xff] }
 0x119   : > { %v2904_v54 = vpop.eup %2903  ;;  %2204 = vst.msk [vmem:[%s3613_s3 + $0x40] sm:$0xff] %vm197_vm2, %v2902_v50  ;;  %v1505_v63 = vpop.f32.mrb[21].mxu1  ;;  %v2022_v4 = vld [vmem:[#allocation2 + $0x290] sm:$0xff]  ;;  %v1700_v5 = vadd.f32 %v1249_v62, %v346_v52  ;;  %2929 = vtanh.f32 %v1958_v3  ;;  %1831 = vst.msk [vmem:[#allocation2 + $0xb0] sm:$0xff] %vm197_vm2, %v1702_v60  ;;  %v415_v41 = vld [vmem:[#allocation2 + $0x2c8] sm:$0xff] }
 0x11a   : > { %v2906_v59 = vpop.eup %2905  ;;  %2268 = vst.msk [vmem:[%s3613_s3 + $0x240] sm:$0xff] %vm197_vm2, %v2904_v54  ;;  %v1764_v6 = vadd.f32 %v1505_v63, %v410_v53  ;;  %v2654_v7 = vpop.f32.mrb[22].mxu0  ;;  %v1956_v10 = vld [vmem:[#allocation2 + $0x80] sm:$0xff]  ;;  %1895 = vst.msk [vmem:[#allocation2 + $0x2b0] sm:$0xff] %vm197_vm2, %v1766_v61  ;;  %2931 = vtanh.f32 %v2022_v4 }
 0x11b   : > { %v2908_v2 = vpop.eup %2907  ;;  %2207 = vst.msk [vmem:[%s3613_s3 + $0x58] sm:$0xff] %vm197_vm2, %v2906_v59  ;;  %v2718_v8 = vpop.f32.mrb[22].mxu1  ;;  %v2020_v11 = vld [vmem:[#allocation2 + $0x280] sm:$0xff]  ;;  %v1703_v12 = vadd.f32 %v2654_v7, %v349_v57  ;;  %1829 = vst.msk [vmem:[#allocation2 + $0xa0] sm:$0xff] %vm197_vm2, %v1700_v5  ;;  %2933 = vtanh.f32 %v1956_v10  ;;  %v421_v10 = vld [vmem:[#allocation2 + $0x2f8] sm:$0xff] }
 0x11c   : > { %v2910_v9 = vpop.eup %2909  ;;  %2271 = vst.msk [vmem:[%s3613_s3 + $0x258] sm:$0xff] %vm197_vm2, %v2908_v2  ;;  %v1767_v13 = vadd.f32 %v2718_v8, %v413_v58  ;;  %v1252_v14 = vpop.f32.mrb[23].mxu0  ;;  %v1959_v17 = vld [vmem:[#allocation2 + $0x98] sm:$0xff]  ;;  %1893 = vst.msk [vmem:[#allocation2 + $0x2a0] sm:$0xff] %vm197_vm2, %v1764_v6  ;;  %2935 = vtanh.f32 %v2020_v11  ;;  %v354_v4 = vld [vmem:[#allocation2 + $0xe0] sm:$0xff] }
 0x11d   : > { %v1508_v15 = vpop.f32.mrb[23].mxu1  ;;  %v2912_v16 = vpop.eup %2911  ;;  %2205 = vst.msk [vmem:[%s3613_s3 + $0x48] sm:$0xff] %vm197_vm2, %v2910_v9  ;;  %v1701_v18 = vadd.f32 %v1252_v14, %v347_v0  ;;  %v2023_v21 = vld [vmem:[#allocation2 + $0x298] sm:$0xff]  ;;  %1832 = vst.msk [vmem:[#allocation2 + $0xb8] sm:$0xff] %vm197_vm2, %v1703_v12  ;;  %2937 = vtanh.f32 %v1959_v17  ;;  %v356_v0 = vld [vmem:[#allocation2 + $0xf0] sm:$0xff] }
 0x11e   : > { %v1765_v19 = vadd.f32 %v1508_v15, %v411_v1  ;;  %v2914_v20 = vpop.eup %2913  ;;  %2269 = vst.msk [vmem:[%s3613_s3 + $0x248] sm:$0xff] %vm197_vm2, %v2912_v16  ;;  %1896 = vst.msk [vmem:[#allocation2 + $0x2b8] sm:$0xff] %vm197_vm2, %v1767_v13  ;;  %v1957_v23 = vld [vmem:[#allocation2 + $0x88] sm:$0xff]  ;;  %2939 = vtanh.f32 %v2023_v21  ;;  %v2657_v31 = vpop.f32.mrb[24].mxu0  ;;  %v420_v1 = vld [vmem:[#allocation2 + $0x2f0] sm:$0xff] }
 0x11f   : > { %v2916_v22 = vpop.eup %2915  ;;  %2210 = vst.msk [vmem:[%s3613_s3 + $0x70] sm:$0xff] %vm197_vm2, %v2914_v20  ;;  %1830 = vst.msk [vmem:[#allocation2 + $0xa8] sm:$0xff] %vm197_vm2, %v1701_v18  ;;  %v2021_v27 = vld [vmem:[#allocation2 + $0x288] sm:$0xff]  ;;  %v2721_v32 = vpop.f32.mrb[24].mxu1  ;;  %2941 = vtanh.f32 %v1957_v23  ;;  %v1706_v36 = vadd.f32 %v2657_v31, %v352_v24  ;;  %v418_v5 = vld [vmem:[#allocation2 + $0x2e0] sm:$0xff] }
 0x120   : > { %1894 = vst.msk [vmem:[#allocation2 + $0x2a8] sm:$0xff] %vm197_vm2, %v1765_v19  ;;  %v2918_v26 = vpop.eup %2917  ;;  %2274 = vst.msk [vmem:[%s3613_s3 + $0x270] sm:$0xff] %vm197_vm2, %v2916_v22  ;;  %v1770_v37 = vadd.f32 %v2721_v32, %v416_v25  ;;  %v1265_v38 = vpop.f32.mrb[25].mxu0  ;;  %2943 = vtanh.f32 %v2021_v27  ;;  %v1962_v43 = vld [vmem:[#allocation2 + $0xb0] sm:$0xff]  ;;  %v357_v9 = vld [vmem:[#allocation2 + $0xf8] sm:$0xff] }
 0x121   : > { %v2920_v30 = vpop.eup %2919  ;;  %2208 = vst.msk [vmem:[%s3613_s3 + $0x60] sm:$0xff] %vm197_vm2, %v2918_v26  ;;  %v1521_v39 = vpop.f32.mrb[25].mxu1  ;;  %v2026_v44 = vld [vmem:[#allocation2 + $0x2b0] sm:$0xff]  ;;  %v1704_v45 = vadd.f32 %v1265_v38, %v350_v28  ;;  %2945 = vtanh.f32 %v1962_v43  ;;  %1835 = vst.msk [vmem:[#allocation2 + $0xd0] sm:$0xff] %vm197_vm2, %v1706_v36  ;;  %v355_v16 = vld [vmem:[#allocation2 + $0xe8] sm:$0xff] }
 0x122   : > { %v2922_v35 = vpop.eup %2921  ;;  %2272 = vst.msk [vmem:[%s3613_s3 + $0x260] sm:$0xff] %vm197_vm2, %v2920_v30  ;;  %v1768_v46 = vadd.f32 %v1521_v39, %v414_v29  ;;  %v2658_v47 = vpop.f32.mrb[26].mxu0  ;;  %v1960_v50 = vld [vmem:[#allocation2 + $0xa0] sm:$0xff]  ;;  %1899 = vst.msk [vmem:[#allocation2 + $0x2d0] sm:$0xff] %vm197_vm2, %v1770_v37  ;;  %2947 = vtanh.f32 %v2026_v44  ;;  %v419_v17 = vld [vmem:[#allocation2 + $0x2e8] sm:$0xff] }
 0x123   : > { %v2924_v42 = vpop.eup %2923  ;;  %2211 = vst.msk [vmem:[%s3613_s3 + $0x78] sm:$0xff] %vm197_vm2, %v2922_v35  ;;  %v2722_v48 = vpop.f32.mrb[26].mxu1  ;;  %v2024_v51 = vld [vmem:[#allocation2 + $0x2a0] sm:$0xff]  ;;  %v1707_v52 = vadd.f32 %v2658_v47, %v353_v33  ;;  %1833 = vst.msk [vmem:[#allocation2 + $0xc0] sm:$0xff] %vm197_vm2, %v1704_v45  ;;  %2949 = vtanh.f32 %v1960_v50  ;;  %v425_v50 = vld [vmem:[#allocation2 + $0x318] sm:$0xff] }
 0x124   : > { %v2926_v49 = vpop.eup %2925  ;;  %2275 = vst.msk [vmem:[%s3613_s3 + $0x278] sm:$0xff] %vm197_vm2, %v2924_v42  ;;  %v1771_v53 = vadd.f32 %v2722_v48, %v417_v34  ;;  %v1268_v54 = vpop.f32.mrb[27].mxu0  ;;  %v1963_v57 = vld [vmem:[#allocation2 + $0xb8] sm:$0xff]  ;;  %1897 = vst.msk [vmem:[#allocation2 + $0x2c0] sm:$0xff] %vm197_vm2, %v1768_v46  ;;  %2951 = vtanh.f32 %v2024_v51  ;;  %v358_v44 = vld [vmem:[#allocation2 + $0x100] sm:$0xff] }
 0x125   : > { %v1524_v55 = vpop.f32.mrb[27].mxu1  ;;  %v2928_v56 = vpop.eup %2927  ;;  %2209 = vst.msk [vmem:[%s3613_s3 + $0x68] sm:$0xff] %vm197_vm2, %v2926_v49  ;;  %v1705_v58 = vadd.f32 %v1268_v54, %v351_v40  ;;  %v2027_v61 = vld [vmem:[#allocation2 + $0x2b8] sm:$0xff]  ;;  %1836 = vst.msk [vmem:[#allocation2 + $0xd8] sm:$0xff] %vm197_vm2, %v1707_v52  ;;  %2953 = vtanh.f32 %v1963_v57  ;;  %v360_v40 = vld [vmem:[#allocation2 + $0x110] sm:$0xff] }
 0x126   : > { %v1769_v59 = vadd.f32 %v1524_v55, %v415_v41  ;;  %v2930_v60 = vpop.eup %2929  ;;  %2273 = vst.msk [vmem:[%s3613_s3 + $0x268] sm:$0xff] %vm197_vm2, %v2928_v56  ;;  %1900 = vst.msk [vmem:[#allocation2 + $0x2d8] sm:$0xff] %vm197_vm2, %v1771_v53  ;;  %v1961_v63 = vld [vmem:[#allocation2 + $0xa8] sm:$0xff]  ;;  %2955 = vtanh.f32 %v2027_v61  ;;  %v2661_v7 = vpop.f32.mrb[28].mxu0  ;;  %v424_v41 = vld [vmem:[#allocation2 + $0x310] sm:$0xff] }
 0x127   : > { %v2932_v62 = vpop.eup %2931  ;;  %2214 = vst.msk [vmem:[%s3613_s3 + $0x90] sm:$0xff] %vm197_vm2, %v2930_v60  ;;  %1834 = vst.msk [vmem:[#allocation2 + $0xc8] sm:$0xff] %vm197_vm2, %v1705_v58  ;;  %v2025_v3 = vld [vmem:[#allocation2 + $0x2a8] sm:$0xff]  ;;  %v2725_v8 = vpop.f32.mrb[28].mxu1  ;;  %2957 = vtanh.f32 %v1961_v63  ;;  %v1710_v12 = vadd.f32 %v2661_v7, %v356_v0  ;;  %v422_v45 = vld [vmem:[#allocation2 + $0x300] sm:$0xff] }
 0x128   : > { %1898 = vst.msk [vmem:[#allocation2 + $0x2c8] sm:$0xff] %vm197_vm2, %v1769_v59  ;;  %v2934_v2 = vpop.eup %2933  ;;  %2278 = vst.msk [vmem:[%s3613_s3 + $0x290] sm:$0xff] %vm197_vm2, %v2932_v62  ;;  %v1774_v13 = vadd.f32 %v2725_v8, %v420_v1  ;;  %v1281_v14 = vpop.f32.mrb[29].mxu0  ;;  %2959 = vtanh.f32 %v2025_v3  ;;  %v1966_v19 = vld [vmem:[#allocation2 + $0xd0] sm:$0xff]  ;;  %v361_v49 = vld [vmem:[#allocation2 + $0x118] sm:$0xff] }
 0x129   : > { %v2936_v6 = vpop.eup %2935  ;;  %2212 = vst.msk [vmem:[%s3613_s3 + $0x80] sm:$0xff] %vm197_vm2, %v2934_v2  ;;  %v1537_v15 = vpop.f32.mrb[29].mxu1  ;;  %v2030_v20 = vld [vmem:[#allocation2 + $0x2d0] sm:$0xff]  ;;  %v1708_v21 = vadd.f32 %v1281_v14, %v354_v4  ;;  %2961 = vtanh.f32 %v1966_v19  ;;  %1839 = vst.msk [vmem:[#allocation2 + $0xf0] sm:$0xff] %vm197_vm2, %v1710_v12  ;;  %v359_v56 = vld [vmem:[#allocation2 + $0x108] sm:$0xff] }
 0x12a   : > { %v2938_v11 = vpop.eup %2937  ;;  %2276 = vst.msk [vmem:[%s3613_s3 + $0x280] sm:$0xff] %vm197_vm2, %v2936_v6  ;;  %v1772_v22 = vadd.f32 %v1537_v15, %v418_v5  ;;  %v2662_v23 = vpop.f32.mrb[30].mxu0  ;;  %v1964_v26 = vld [vmem:[#allocation2 + $0xc0] sm:$0xff]  ;;  %1903 = vst.msk [vmem:[#allocation2 + $0x2f0] sm:$0xff] %vm197_vm2, %v1774_v13  ;;  %2963 = vtanh.f32 %v2030_v20  ;;  %v423_v57 = vld [vmem:[#allocation2 + $0x308] sm:$0xff] }
 0x12b   : > { %v2940_v18 = vpop.eup %2939  ;;  %2215 = vst.msk [vmem:[%s3613_s3 + $0x98] sm:$0xff] %vm197_vm2, %v2938_v11  ;;  %v2726_v24 = vpop.f32.mrb[30].mxu1  ;;  %v2028_v27 = vld [vmem:[#allocation2 + $0x2c0] sm:$0xff]  ;;  %v1711_v28 = vadd.f32 %v2662_v23, %v357_v9  ;;  %1837 = vst.msk [vmem:[#allocation2 + $0xe0] sm:$0xff] %vm197_vm2, %v1708_v21  ;;  %2965 = vtanh.f32 %v1964_v26  ;;  %v429_v26 = vld [vmem:[#allocation2 + $0x338] sm:$0xff] }
 0x12c   : > { %v2942_v25 = vpop.eup %2941  ;;  %2279 = vst.msk [vmem:[%s3613_s3 + $0x298] sm:$0xff] %vm197_vm2, %v2940_v18  ;;  %v1775_v29 = vadd.f32 %v2726_v24, %v421_v10  ;;  %v1284_v30 = vpop.f32.mrb[31].mxu0  ;;  %v1967_v33 = vld [vmem:[#allocation2 + $0xd8] sm:$0xff]  ;;  %1901 = vst.msk [vmem:[#allocation2 + $0x2e0] sm:$0xff] %vm197_vm2, %v1772_v22  ;;  %2967 = vtanh.f32 %v2028_v27  ;;  %v362_v20 = vld [vmem:[#allocation2 + $0x120] sm:$0xff] }
 0x12d   : > { %v1540_v31 = vpop.f32.mrb[31].mxu1  ;;  %v2944_v32 = vpop.eup %2943  ;;  %2213 = vst.msk [vmem:[%s3613_s3 + $0x88] sm:$0xff] %vm197_vm2, %v2942_v25  ;;  %v1709_v34 = vadd.f32 %v1284_v30, %v355_v16  ;;  %v2031_v37 = vld [vmem:[#allocation2 + $0x2d8] sm:$0xff]  ;;  %1840 = vst.msk [vmem:[#allocation2 + $0xf8] sm:$0xff] %vm197_vm2, %v1711_v28  ;;  %2969 = vtanh.f32 %v1967_v33  ;;  %v364_v16 = vld [vmem:[#allocation2 + $0x130] sm:$0xff] }
 0x12e   : > { %v1773_v35 = vadd.f32 %v1540_v31, %v419_v17  ;;  %v2946_v36 = vpop.eup %2945  ;;  %2277 = vst.msk [vmem:[%s3613_s3 + $0x288] sm:$0xff] %vm197_vm2, %v2944_v32  ;;  %1904 = vst.msk [vmem:[#allocation2 + $0x2f8] sm:$0xff] %vm197_vm2, %v1775_v29  ;;  %v1965_v39 = vld [vmem:[#allocation2 + $0xc8] sm:$0xff]  ;;  %2971 = vtanh.f32 %v2031_v37  ;;  %v2665_v47 = vpop.f32.mrb[32].mxu0  ;;  %v428_v17 = vld [vmem:[#allocation2 + $0x330] sm:$0xff] }
 0x12f   : > { %v2948_v38 = vpop.eup %2947  ;;  %2218 = vst.msk [vmem:[%s3613_s3 + $0xb0] sm:$0xff] %vm197_vm2, %v2946_v36  ;;  %1838 = vst.msk [vmem:[#allocation2 + $0xe8] sm:$0xff] %vm197_vm2, %v1709_v34  ;;  %v2029_v43 = vld [vmem:[#allocation2 + $0x2c8] sm:$0xff]  ;;  %v2729_v48 = vpop.f32.mrb[32].mxu1  ;;  %2973 = vtanh.f32 %v1965_v39  ;;  %v1714_v52 = vadd.f32 %v2665_v47, %v360_v40  ;;  %v426_v21 = vld [vmem:[#allocation2 + $0x320] sm:$0xff] }
 0x130   : > { %1902 = vst.msk [vmem:[#allocation2 + $0x2e8] sm:$0xff] %vm197_vm2, %v1773_v35  ;;  %v2950_v42 = vpop.eup %2949  ;;  %2282 = vst.msk [vmem:[%s3613_s3 + $0x2b0] sm:$0xff] %vm197_vm2, %v2948_v38  ;;  %v1778_v53 = vadd.f32 %v2729_v48, %v424_v41  ;;  %v1297_v54 = vpop.f32.mrb[33].mxu0  ;;  %2975 = vtanh.f32 %v2029_v43  ;;  %v1970_v59 = vld [vmem:[#allocation2 + $0xf0] sm:$0xff]  ;;  %v365_v25 = vld [vmem:[#allocation2 + $0x138] sm:$0xff] }
 0x131   : > { %v2952_v46 = vpop.eup %2951  ;;  %2216 = vst.msk [vmem:[%s3613_s3 + $0xa0] sm:$0xff] %vm197_vm2, %v2950_v42  ;;  %v1553_v55 = vpop.f32.mrb[33].mxu1  ;;  %v2034_v60 = vld [vmem:[#allocation2 + $0x2f0] sm:$0xff]  ;;  %v1712_v61 = vadd.f32 %v1297_v54, %v358_v44  ;;  %2977 = vtanh.f32 %v1970_v59  ;;  %1843 = vst.msk [vmem:[#allocation2 + $0x110] sm:$0xff] %vm197_vm2, %v1714_v52  ;;  %v363_v32 = vld [vmem:[#allocation2 + $0x128] sm:$0xff] }
 0x132   : > { %v2954_v51 = vpop.eup %2953  ;;  %2280 = vst.msk [vmem:[%s3613_s3 + $0x2a0] sm:$0xff] %vm197_vm2, %v2952_v46  ;;  %v1776_v62 = vadd.f32 %v1553_v55, %v422_v45  ;;  %v2666_v63 = vpop.f32.mrb[34].mxu0  ;;  %v1968_v2 = vld [vmem:[#allocation2 + $0xe0] sm:$0xff]  ;;  %1907 = vst.msk [vmem:[#allocation2 + $0x310] sm:$0xff] %vm197_vm2, %v1778_v53  ;;  %2979 = vtanh.f32 %v2034_v60  ;;  %v427_v33 = vld [vmem:[#allocation2 + $0x328] sm:$0xff] }
 0x133   : > { %v2956_v58 = vpop.eup %2955  ;;  %2219 = vst.msk [vmem:[%s3613_s3 + $0xb8] sm:$0xff] %vm197_vm2, %v2954_v51  ;;  %v2730_v0 = vpop.f32.mrb[34].mxu1  ;;  %v2032_v3 = vld [vmem:[#allocation2 + $0x2e0] sm:$0xff]  ;;  %v1715_v4 = vadd.f32 %v2666_v63, %v361_v49  ;;  %1841 = vst.msk [vmem:[#allocation2 + $0x100] sm:$0xff] %vm197_vm2, %v1712_v61  ;;  %2981 = vtanh.f32 %v1968_v2  ;;  %v433_v2 = vld [vmem:[#allocation2 + $0x358] sm:$0xff] }
 0x134   : > { %v2958_v1 = vpop.eup %2957  ;;  %2283 = vst.msk [vmem:[%s3613_s3 + $0x2b8] sm:$0xff] %vm197_vm2, %v2956_v58  ;;  %v1779_v5 = vadd.f32 %v2730_v0, %v425_v50  ;;  %v1300_v6 = vpop.f32.mrb[35].mxu0  ;;  %v1971_v9 = vld [vmem:[#allocation2 + $0xf8] sm:$0xff]  ;;  %1905 = vst.msk [vmem:[#allocation2 + $0x300] sm:$0xff] %vm197_vm2, %v1776_v62  ;;  %2983 = vtanh.f32 %v2032_v3  ;;  %v366_v60 = vld [vmem:[#allocation2 + $0x140] sm:$0xff] }
 0x135   : > { %v1556_v7 = vpop.f32.mrb[35].mxu1  ;;  %v2960_v8 = vpop.eup %2959  ;;  %2217 = vst.msk [vmem:[%s3613_s3 + $0xa8] sm:$0xff] %vm197_vm2, %v2958_v1  ;;  %v1713_v10 = vadd.f32 %v1300_v6, %v359_v56  ;;  %v2035_v13 = vld [vmem:[#allocation2 + $0x2f8] sm:$0xff]  ;;  %1844 = vst.msk [vmem:[#allocation2 + $0x118] sm:$0xff] %vm197_vm2, %v1715_v4  ;;  %2985 = vtanh.f32 %v1971_v9  ;;  %v368_v56 = vld [vmem:[#allocation2 + $0x150] sm:$0xff] }
 0x136   : > { %v1777_v11 = vadd.f32 %v1556_v7, %v423_v57  ;;  %v2962_v12 = vpop.eup %2961  ;;  %2281 = vst.msk [vmem:[%s3613_s3 + $0x2a8] sm:$0xff] %vm197_vm2, %v2960_v8  ;;  %1908 = vst.msk [vmem:[#allocation2 + $0x318] sm:$0xff] %vm197_vm2, %v1779_v5  ;;  %v1969_v15 = vld [vmem:[#allocation2 + $0xe8] sm:$0xff]  ;;  %2987 = vtanh.f32 %v2035_v13  ;;  %v2669_v23 = vpop.f32.mrb[36].mxu0  ;;  %v432_v57 = vld [vmem:[#allocation2 + $0x350] sm:$0xff] }
 0x137   : > { %v2964_v14 = vpop.eup %2963  ;;  %2222 = vst.msk [vmem:[%s3613_s3 + $0xd0] sm:$0xff] %vm197_vm2, %v2962_v12  ;;  %1842 = vst.msk [vmem:[#allocation2 + $0x108] sm:$0xff] %vm197_vm2, %v1713_v10  ;;  %v2033_v19 = vld [vmem:[#allocation2 + $0x2e8] sm:$0xff]  ;;  %v2733_v24 = vpop.f32.mrb[36].mxu1  ;;  %2989 = vtanh.f32 %v1969_v15  ;;  %v1718_v28 = vadd.f32 %v2669_v23, %v364_v16  ;;  %v430_v61 = vld [vmem:[#allocation2 + $0x340] sm:$0xff] }
 0x138   : > { %1906 = vst.msk [vmem:[#allocation2 + $0x308] sm:$0xff] %vm197_vm2, %v1777_v11  ;;  %v2966_v18 = vpop.eup %2965  ;;  %2286 = vst.msk [vmem:[%s3613_s3 + $0x2d0] sm:$0xff] %vm197_vm2, %v2964_v14  ;;  %v1782_v29 = vadd.f32 %v2733_v24, %v428_v17  ;;  %v1313_v30 = vpop.f32.mrb[37].mxu0  ;;  %2991 = vtanh.f32 %v2033_v19  ;;  %v1974_v35 = vld [vmem:[#allocation2 + $0x110] sm:$0xff]  ;;  %v369_v1 = vld [vmem:[#allocation2 + $0x158] sm:$0xff] }
 0x139   : > { %v2968_v22 = vpop.eup %2967  ;;  %2220 = vst.msk [vmem:[%s3613_s3 + $0xc0] sm:$0xff] %vm197_vm2, %v2966_v18  ;;  %v1569_v31 = vpop.f32.mrb[37].mxu1  ;;  %v2038_v36 = vld [vmem:[#allocation2 + $0x310] sm:$0xff]  ;;  %v1716_v37 = vadd.f32 %v1313_v30, %v362_v20  ;;  %2993 = vtanh.f32 %v1974_v35  ;;  %1847 = vst.msk [vmem:[#allocation2 + $0x130] sm:$0xff] %vm197_vm2, %v1718_v28  ;;  %v367_v8 = vld [vmem:[#allocation2 + $0x148] sm:$0xff] }
 0x13a   : > { %v2970_v27 = vpop.eup %2969  ;;  %2284 = vst.msk [vmem:[%s3613_s3 + $0x2c0] sm:$0xff] %vm197_vm2, %v2968_v22  ;;  %v1780_v38 = vadd.f32 %v1569_v31, %v426_v21  ;;  %v2670_v39 = vpop.f32.mrb[38].mxu0  ;;  %v1972_v42 = vld [vmem:[#allocation2 + $0x100] sm:$0xff]  ;;  %1911 = vst.msk [vmem:[#allocation2 + $0x330] sm:$0xff] %vm197_vm2, %v1782_v29  ;;  %2995 = vtanh.f32 %v2038_v36  ;;  %v431_v9 = vld [vmem:[#allocation2 + $0x348] sm:$0xff] }
 0x13b   : > { %v2972_v34 = vpop.eup %2971  ;;  %2223 = vst.msk [vmem:[%s3613_s3 + $0xd8] sm:$0xff] %vm197_vm2, %v2970_v27  ;;  %v2734_v40 = vpop.f32.mrb[38].mxu1  ;;  %v2036_v43 = vld [vmem:[#allocation2 + $0x300] sm:$0xff]  ;;  %v1719_v44 = vadd.f32 %v2670_v39, %v365_v25  ;;  %1845 = vst.msk [vmem:[#allocation2 + $0x120] sm:$0xff] %vm197_vm2, %v1716_v37  ;;  %2997 = vtanh.f32 %v1972_v42  ;;  %v437_v42 = vld [vmem:[#allocation2 + $0x378] sm:$0xff] }
 0x13c   : > { %v2974_v41 = vpop.eup %2973  ;;  %2287 = vst.msk [vmem:[%s3613_s3 + $0x2d8] sm:$0xff] %vm197_vm2, %v2972_v34  ;;  %v1783_v45 = vadd.f32 %v2734_v40, %v429_v26  ;;  %v1316_v46 = vpop.f32.mrb[39].mxu0  ;;  %v1975_v49 = vld [vmem:[#allocation2 + $0x118] sm:$0xff]  ;;  %1909 = vst.msk [vmem:[#allocation2 + $0x320] sm:$0xff] %vm197_vm2, %v1780_v38  ;;  %2999 = vtanh.f32 %v2036_v43  ;;  %v370_v36 = vld [vmem:[#allocation2 + $0x160] sm:$0xff] }
 0x13d   : > { %v1572_v47 = vpop.f32.mrb[39].mxu1  ;;  %v2976_v48 = vpop.eup %2975  ;;  %2221 = vst.msk [vmem:[%s3613_s3 + $0xc8] sm:$0xff] %vm197_vm2, %v2974_v41  ;;  %v1717_v50 = vadd.f32 %v1316_v46, %v363_v32  ;;  %v2039_v53 = vld [vmem:[#allocation2 + $0x318] sm:$0xff]  ;;  %1848 = vst.msk [vmem:[#allocation2 + $0x138] sm:$0xff] %vm197_vm2, %v1719_v44  ;;  %3001 = vtanh.f32 %v1975_v49  ;;  %v372_v32 = vld [vmem:[#allocation2 + $0x170] sm:$0xff] }
 0x13e   : > { %v1781_v51 = vadd.f32 %v1572_v47, %v427_v33  ;;  %v2978_v52 = vpop.eup %2977  ;;  %2285 = vst.msk [vmem:[%s3613_s3 + $0x2c8] sm:$0xff] %vm197_vm2, %v2976_v48  ;;  %1912 = vst.msk [vmem:[#allocation2 + $0x338] sm:$0xff] %vm197_vm2, %v1783_v45  ;;  %v1973_v55 = vld [vmem:[#allocation2 + $0x108] sm:$0xff]  ;;  %3003 = vtanh.f32 %v2039_v53  ;;  %v2673_v63 = vpop.f32.mrb[40].mxu0  ;;  %v436_v33 = vld [vmem:[#allocation2 + $0x370] sm:$0xff] }
 0x13f   : > { %v2980_v54 = vpop.eup %2979  ;;  %2226 = vst.msk [vmem:[%s3613_s3 + $0xf0] sm:$0xff] %vm197_vm2, %v2978_v52  ;;  %1846 = vst.msk [vmem:[#allocation2 + $0x128] sm:$0xff] %vm197_vm2, %v1717_v50  ;;  %v2037_v59 = vld [vmem:[#allocation2 + $0x308] sm:$0xff]  ;;  %v2737_v0 = vpop.f32.mrb[40].mxu1  ;;  %3005 = vtanh.f32 %v1973_v55  ;;  %v1722_v4 = vadd.f32 %v2673_v63, %v368_v56  ;;  %v434_v37 = vld [vmem:[#allocation2 + $0x360] sm:$0xff] }
 0x140   : > { %1910 = vst.msk [vmem:[#allocation2 + $0x328] sm:$0xff] %vm197_vm2, %v1781_v51  ;;  %v2982_v58 = vpop.eup %2981  ;;  %2290 = vst.msk [vmem:[%s3613_s3 + $0x2f0] sm:$0xff] %vm197_vm2, %v2980_v54  ;;  %v1786_v5 = vadd.f32 %v2737_v0, %v432_v57  ;;  %v1329_v6 = vpop.f32.mrb[41].mxu0  ;;  %3007 = vtanh.f32 %v2037_v59  ;;  %v1978_v11 = vld [vmem:[#allocation2 + $0x130] sm:$0xff]  ;;  %v373_v41 = vld [vmem:[#allocation2 + $0x178] sm:$0xff] }
 0x141   : > { %v2984_v62 = vpop.eup %2983  ;;  %2224 = vst.msk [vmem:[%s3613_s3 + $0xe0] sm:$0xff] %vm197_vm2, %v2982_v58  ;;  %v1585_v7 = vpop.f32.mrb[41].mxu1  ;;  %v2042_v12 = vld [vmem:[#allocation2 + $0x330] sm:$0xff]  ;;  %v1720_v13 = vadd.f32 %v1329_v6, %v366_v60  ;;  %3009 = vtanh.f32 %v1978_v11  ;;  %1851 = vst.msk [vmem:[#allocation2 + $0x150] sm:$0xff] %vm197_vm2, %v1722_v4  ;;  %v371_v48 = vld [vmem:[#allocation2 + $0x168] sm:$0xff] }
 0x142   : > { %v2986_v3 = vpop.eup %2985  ;;  %2288 = vst.msk [vmem:[%s3613_s3 + $0x2e0] sm:$0xff] %vm197_vm2, %v2984_v62  ;;  %v1784_v14 = vadd.f32 %v1585_v7, %v430_v61  ;;  %v2674_v15 = vpop.f32.mrb[42].mxu0  ;;  %v1976_v18 = vld [vmem:[#allocation2 + $0x120] sm:$0xff]  ;;  %1915 = vst.msk [vmem:[#allocation2 + $0x350] sm:$0xff] %vm197_vm2, %v1786_v5  ;;  %3011 = vtanh.f32 %v2042_v12  ;;  %v435_v49 = vld [vmem:[#allocation2 + $0x368] sm:$0xff] }
 0x143   : > { %v2988_v10 = vpop.eup %2987  ;;  %2227 = vst.msk [vmem:[%s3613_s3 + $0xf8] sm:$0xff] %vm197_vm2, %v2986_v3  ;;  %v2738_v16 = vpop.f32.mrb[42].mxu1  ;;  %v2040_v19 = vld [vmem:[#allocation2 + $0x320] sm:$0xff]  ;;  %v1723_v20 = vadd.f32 %v2674_v15, %v369_v1  ;;  %1849 = vst.msk [vmem:[#allocation2 + $0x140] sm:$0xff] %vm197_vm2, %v1720_v13  ;;  %3013 = vtanh.f32 %v1976_v18  ;;  %v441_v18 = vld [vmem:[#allocation2 + $0x398] sm:$0xff] }
 0x144   : > { %v2990_v17 = vpop.eup %2989  ;;  %2291 = vst.msk [vmem:[%s3613_s3 + $0x2f8] sm:$0xff] %vm197_vm2, %v2988_v10  ;;  %v1787_v21 = vadd.f32 %v2738_v16, %v433_v2  ;;  %v1332_v22 = vpop.f32.mrb[43].mxu0  ;;  %v1979_v25 = vld [vmem:[#allocation2 + $0x138] sm:$0xff]  ;;  %1913 = vst.msk [vmem:[#allocation2 + $0x340] sm:$0xff] %vm197_vm2, %v1784_v14  ;;  %3015 = vtanh.f32 %v2040_v19  ;;  %v374_v12 = vld [vmem:[#allocation2 + $0x180] sm:$0xff] }
 0x145   : > { %v1588_v23 = vpop.f32.mrb[43].mxu1  ;;  %v2992_v24 = vpop.eup %2991  ;;  %2225 = vst.msk [vmem:[%s3613_s3 + $0xe8] sm:$0xff] %vm197_vm2, %v2990_v17  ;;  %v1721_v26 = vadd.f32 %v1332_v22, %v367_v8  ;;  %v2043_v29 = vld [vmem:[#allocation2 + $0x338] sm:$0xff]  ;;  %1852 = vst.msk [vmem:[#allocation2 + $0x158] sm:$0xff] %vm197_vm2, %v1723_v20  ;;  %3017 = vtanh.f32 %v1979_v25  ;;  %v376_v8 = vld [vmem:[#allocation2 + $0x190] sm:$0xff] }
 0x146   : > { %v1785_v27 = vadd.f32 %v1588_v23, %v431_v9  ;;  %v2994_v28 = vpop.eup %2993  ;;  %2289 = vst.msk [vmem:[%s3613_s3 + $0x2e8] sm:$0xff] %vm197_vm2, %v2992_v24  ;;  %1916 = vst.msk [vmem:[#allocation2 + $0x358] sm:$0xff] %vm197_vm2, %v1787_v21  ;;  %v1977_v31 = vld [vmem:[#allocation2 + $0x128] sm:$0xff]  ;;  %3019 = vtanh.f32 %v2043_v29  ;;  %v2677_v39 = vpop.f32.mrb[44].mxu0  ;;  %v440_v9 = vld [vmem:[#allocation2 + $0x390] sm:$0xff] }
 0x147   : > { %v2996_v30 = vpop.eup %2995  ;;  %2230 = vst.msk [vmem:[%s3613_s3 + $0x110] sm:$0xff] %vm197_vm2, %v2994_v28  ;;  %1850 = vst.msk [vmem:[#allocation2 + $0x148] sm:$0xff] %vm197_vm2, %v1721_v26  ;;  %v2041_v35 = vld [vmem:[#allocation2 + $0x328] sm:$0xff]  ;;  %v2741_v40 = vpop.f32.mrb[44].mxu1  ;;  %3021 = vtanh.f32 %v1977_v31  ;;  %v1726_v44 = vadd.f32 %v2677_v39, %v372_v32  ;;  %v438_v13 = vld [vmem:[#allocation2 + $0x380] sm:$0xff] }
 0x148   : > { %1914 = vst.msk [vmem:[#allocation2 + $0x348] sm:$0xff] %vm197_vm2, %v1785_v27  ;;  %v2998_v34 = vpop.eup %2997  ;;  %2294 = vst.msk [vmem:[%s3613_s3 + $0x310] sm:$0xff] %vm197_vm2, %v2996_v30  ;;  %v1790_v45 = vadd.f32 %v2741_v40, %v436_v33  ;;  %v1345_v46 = vpop.f32.mrb[45].mxu0  ;;  %3023 = vtanh.f32 %v2041_v35  ;;  %v1982_v51 = vld [vmem:[#allocation2 + $0x150] sm:$0xff]  ;;  %v377_v17 = vld [vmem:[#allocation2 + $0x198] sm:$0xff] }
 0x149   : > { %v3000_v38 = vpop.eup %2999  ;;  %2228 = vst.msk [vmem:[%s3613_s3 + $0x100] sm:$0xff] %vm197_vm2, %v2998_v34  ;;  %v1601_v47 = vpop.f32.mrb[45].mxu1  ;;  %v2046_v52 = vld [vmem:[#allocation2 + $0x350] sm:$0xff]  ;;  %v1724_v53 = vadd.f32 %v1345_v46, %v370_v36  ;;  %3025 = vtanh.f32 %v1982_v51  ;;  %1855 = vst.msk [vmem:[#allocation2 + $0x170] sm:$0xff] %vm197_vm2, %v1726_v44  ;;  %v375_v24 = vld [vmem:[#allocation2 + $0x188] sm:$0xff] }
 0x14a   : > { %v3002_v43 = vpop.eup %3001  ;;  %2292 = vst.msk [vmem:[%s3613_s3 + $0x300] sm:$0xff] %vm197_vm2, %v3000_v38  ;;  %v1788_v54 = vadd.f32 %v1601_v47, %v434_v37  ;;  %v2678_v55 = vpop.f32.mrb[46].mxu0  ;;  %v1980_v58 = vld [vmem:[#allocation2 + $0x140] sm:$0xff]  ;;  %1919 = vst.msk [vmem:[#allocation2 + $0x370] sm:$0xff] %vm197_vm2, %v1790_v45  ;;  %3027 = vtanh.f32 %v2046_v52  ;;  %v439_v25 = vld [vmem:[#allocation2 + $0x388] sm:$0xff] }
 0x14b   : > { %v3004_v50 = vpop.eup %3003  ;;  %2231 = vst.msk [vmem:[%s3613_s3 + $0x118] sm:$0xff] %vm197_vm2, %v3002_v43  ;;  %v2742_v56 = vpop.f32.mrb[46].mxu1  ;;  %v2044_v59 = vld [vmem:[#allocation2 + $0x340] sm:$0xff]  ;;  %v1727_v60 = vadd.f32 %v2678_v55, %v373_v41  ;;  %1853 = vst.msk [vmem:[#allocation2 + $0x160] sm:$0xff] %vm197_vm2, %v1724_v53  ;;  %3029 = vtanh.f32 %v1980_v58  ;;  %v445_v58 = vld [vmem:[#allocation2 + $0x3b8] sm:$0xff] }
 0x14c   : > { %v3006_v57 = vpop.eup %3005  ;;  %2295 = vst.msk [vmem:[%s3613_s3 + $0x318] sm:$0xff] %vm197_vm2, %v3004_v50  ;;  %v1791_v61 = vadd.f32 %v2742_v56, %v437_v42  ;;  %v1348_v62 = vpop.f32.mrb[47].mxu0  ;;  %v1983_v1 = vld [vmem:[#allocation2 + $0x158] sm:$0xff]  ;;  %1917 = vst.msk [vmem:[#allocation2 + $0x360] sm:$0xff] %vm197_vm2, %v1788_v54  ;;  %3031 = vtanh.f32 %v2044_v59  ;;  %v378_v52 = vld [vmem:[#allocation2 + $0x1a0] sm:$0xff] }
 0x14d   : > { %v1604_v63 = vpop.f32.mrb[47].mxu1  ;;  %v3008_v0 = vpop.eup %3007  ;;  %2229 = vst.msk [vmem:[%s3613_s3 + $0x108] sm:$0xff] %vm197_vm2, %v3006_v57  ;;  %v1725_v2 = vadd.f32 %v1348_v62, %v371_v48  ;;  %v2047_v5 = vld [vmem:[#allocation2 + $0x358] sm:$0xff]  ;;  %1856 = vst.msk [vmem:[#allocation2 + $0x178] sm:$0xff] %vm197_vm2, %v1727_v60  ;;  %3033 = vtanh.f32 %v1983_v1  ;;  %v380_v48 = vld [vmem:[#allocation2 + $0x1b0] sm:$0xff] }
 0x14e   : > { %v1789_v3 = vadd.f32 %v1604_v63, %v435_v49  ;;  %v3010_v4 = vpop.eup %3009  ;;  %2293 = vst.msk [vmem:[%s3613_s3 + $0x308] sm:$0xff] %vm197_vm2, %v3008_v0  ;;  %1920 = vst.msk [vmem:[#allocation2 + $0x378] sm:$0xff] %vm197_vm2, %v1791_v61  ;;  %v1981_v7 = vld [vmem:[#allocation2 + $0x148] sm:$0xff]  ;;  %3035 = vtanh.f32 %v2047_v5  ;;  %v2681_v15 = vpop.f32.mrb[48].mxu0  ;;  %v444_v49 = vld [vmem:[#allocation2 + $0x3b0] sm:$0xff] }
 0x14f   : > { %v3012_v6 = vpop.eup %3011  ;;  %2234 = vst.msk [vmem:[%s3613_s3 + $0x130] sm:$0xff] %vm197_vm2, %v3010_v4  ;;  %1854 = vst.msk [vmem:[#allocation2 + $0x168] sm:$0xff] %vm197_vm2, %v1725_v2  ;;  %v2045_v11 = vld [vmem:[#allocation2 + $0x348] sm:$0xff]  ;;  %v2745_v16 = vpop.f32.mrb[48].mxu1  ;;  %3037 = vtanh.f32 %v1981_v7  ;;  %v1730_v20 = vadd.f32 %v2681_v15, %v376_v8  ;;  %v442_v53 = vld [vmem:[#allocation2 + $0x3a0] sm:$0xff] }
 0x150   : > { %1918 = vst.msk [vmem:[#allocation2 + $0x368] sm:$0xff] %vm197_vm2, %v1789_v3  ;;  %v3014_v10 = vpop.eup %3013  ;;  %2298 = vst.msk [vmem:[%s3613_s3 + $0x330] sm:$0xff] %vm197_vm2, %v3012_v6  ;;  %v1794_v21 = vadd.f32 %v2745_v16, %v440_v9  ;;  %v1361_v22 = vpop.f32.mrb[49].mxu0  ;;  %3039 = vtanh.f32 %v2045_v11  ;;  %v1986_v27 = vld [vmem:[#allocation2 + $0x170] sm:$0xff]  ;;  %v381_v57 = vld [vmem:[#allocation2 + $0x1b8] sm:$0xff] }
 0x151   : > { %v3016_v14 = vpop.eup %3015  ;;  %2232 = vst.msk [vmem:[%s3613_s3 + $0x120] sm:$0xff] %vm197_vm2, %v3014_v10  ;;  %v1617_v23 = vpop.f32.mrb[49].mxu1  ;;  %v2050_v28 = vld [vmem:[#allocation2 + $0x370] sm:$0xff]  ;;  %v1728_v29 = vadd.f32 %v1361_v22, %v374_v12  ;;  %3041 = vtanh.f32 %v1986_v27  ;;  %1859 = vst.msk [vmem:[#allocation2 + $0x190] sm:$0xff] %vm197_vm2, %v1730_v20  ;;  %v379_v0 = vld [vmem:[#allocation2 + $0x1a8] sm:$0xff] }
 0x152   : > { %v3018_v19 = vpop.eup %3017  ;;  %2296 = vst.msk [vmem:[%s3613_s3 + $0x320] sm:$0xff] %vm197_vm2, %v3016_v14  ;;  %v1792_v30 = vadd.f32 %v1617_v23, %v438_v13  ;;  %v2682_v31 = vpop.f32.mrb[50].mxu0  ;;  %v1984_v34 = vld [vmem:[#allocation2 + $0x160] sm:$0xff]  ;;  %1923 = vst.msk [vmem:[#allocation2 + $0x390] sm:$0xff] %vm197_vm2, %v1794_v21  ;;  %3043 = vtanh.f32 %v2050_v28  ;;  %v443_v1 = vld [vmem:[#allocation2 + $0x3a8] sm:$0xff] }
 0x153   : > { %v3020_v26 = vpop.eup %3019  ;;  %2235 = vst.msk [vmem:[%s3613_s3 + $0x138] sm:$0xff] %vm197_vm2, %v3018_v19  ;;  %v2746_v32 = vpop.f32.mrb[50].mxu1  ;;  %v2048_v35 = vld [vmem:[#allocation2 + $0x360] sm:$0xff]  ;;  %v1731_v36 = vadd.f32 %v2682_v31, %v377_v17  ;;  %1857 = vst.msk [vmem:[#allocation2 + $0x180] sm:$0xff] %vm197_vm2, %v1728_v29  ;;  %3045 = vtanh.f32 %v1984_v34  ;;  %v449_v34 = vld [vmem:[#allocation2 + $0x3d8] sm:$0xff] }
 0x154   : > { %v3022_v33 = vpop.eup %3021  ;;  %2299 = vst.msk [vmem:[%s3613_s3 + $0x338] sm:$0xff] %vm197_vm2, %v3020_v26  ;;  %v1795_v37 = vadd.f32 %v2746_v32, %v441_v18  ;;  %v1364_v38 = vpop.f32.mrb[51].mxu0  ;;  %v1987_v41 = vld [vmem:[#allocation2 + $0x178] sm:$0xff]  ;;  %1921 = vst.msk [vmem:[#allocation2 + $0x380] sm:$0xff] %vm197_vm2, %v1792_v30  ;;  %3047 = vtanh.f32 %v2048_v35  ;;  %v382_v28 = vld [vmem:[#allocation2 + $0x1c0] sm:$0xff] }
 0x155   : > { %v1620_v39 = vpop.f32.mrb[51].mxu1  ;;  %v3024_v40 = vpop.eup %3023  ;;  %2233 = vst.msk [vmem:[%s3613_s3 + $0x128] sm:$0xff] %vm197_vm2, %v3022_v33  ;;  %v1729_v42 = vadd.f32 %v1364_v38, %v375_v24  ;;  %v2051_v45 = vld [vmem:[#allocation2 + $0x378] sm:$0xff]  ;;  %1860 = vst.msk [vmem:[#allocation2 + $0x198] sm:$0xff] %vm197_vm2, %v1731_v36  ;;  %3049 = vtanh.f32 %v1987_v41  ;;  %v384_v24 = vld [vmem:[#allocation2 + $0x1d0] sm:$0xff] }
 0x156   : > { %v1793_v43 = vadd.f32 %v1620_v39, %v439_v25  ;;  %v3026_v44 = vpop.eup %3025  ;;  %2297 = vst.msk [vmem:[%s3613_s3 + $0x328] sm:$0xff] %vm197_vm2, %v3024_v40  ;;  %1924 = vst.msk [vmem:[#allocation2 + $0x398] sm:$0xff] %vm197_vm2, %v1795_v37  ;;  %v1985_v47 = vld [vmem:[#allocation2 + $0x168] sm:$0xff]  ;;  %3051 = vtanh.f32 %v2051_v45  ;;  %v2685_v55 = vpop.f32.mrb[52].mxu0  ;;  %v448_v25 = vld [vmem:[#allocation2 + $0x3d0] sm:$0xff] }
 0x157   : > { %v3028_v46 = vpop.eup %3027  ;;  %2238 = vst.msk [vmem:[%s3613_s3 + $0x150] sm:$0xff] %vm197_vm2, %v3026_v44  ;;  %1858 = vst.msk [vmem:[#allocation2 + $0x188] sm:$0xff] %vm197_vm2, %v1729_v42  ;;  %v2049_v51 = vld [vmem:[#allocation2 + $0x368] sm:$0xff]  ;;  %v2749_v56 = vpop.f32.mrb[52].mxu1  ;;  %3053 = vtanh.f32 %v1985_v47  ;;  %v1734_v60 = vadd.f32 %v2685_v55, %v380_v48  ;;  %v446_v29 = vld [vmem:[#allocation2 + $0x3c0] sm:$0xff] }
 0x158   : > { %1922 = vst.msk [vmem:[#allocation2 + $0x388] sm:$0xff] %vm197_vm2, %v1793_v43  ;;  %v3030_v50 = vpop.eup %3029  ;;  %2302 = vst.msk [vmem:[%s3613_s3 + $0x350] sm:$0xff] %vm197_vm2, %v3028_v46  ;;  %v1798_v61 = vadd.f32 %v2749_v56, %v444_v49  ;;  %v1377_v62 = vpop.f32.mrb[53].mxu0  ;;  %3055 = vtanh.f32 %v2049_v51  ;;  %v1990_v3 = vld [vmem:[#allocation2 + $0x190] sm:$0xff]  ;;  %v385_v33 = vld [vmem:[#allocation2 + $0x1d8] sm:$0xff] }
 0x159   : > { %v3032_v54 = vpop.eup %3031  ;;  %2236 = vst.msk [vmem:[%s3613_s3 + $0x140] sm:$0xff] %vm197_vm2, %v3030_v50  ;;  %v1633_v63 = vpop.f32.mrb[53].mxu1  ;;  %v2054_v4 = vld [vmem:[#allocation2 + $0x390] sm:$0xff]  ;;  %v1732_v5 = vadd.f32 %v1377_v62, %v378_v52  ;;  %3057 = vtanh.f32 %v1990_v3  ;;  %1863 = vst.msk [vmem:[#allocation2 + $0x1b0] sm:$0xff] %vm197_vm2, %v1734_v60  ;;  %v383_v40 = vld [vmem:[#allocation2 + $0x1c8] sm:$0xff] }
 0x15a   : > { %v3034_v59 = vpop.eup %3033  ;;  %2300 = vst.msk [vmem:[%s3613_s3 + $0x340] sm:$0xff] %vm197_vm2, %v3032_v54  ;;  %v1796_v6 = vadd.f32 %v1633_v63, %v442_v53  ;;  %v2686_v7 = vpop.f32.mrb[54].mxu0  ;;  %v1988_v10 = vld [vmem:[#allocation2 + $0x180] sm:$0xff]  ;;  %1927 = vst.msk [vmem:[#allocation2 + $0x3b0] sm:$0xff] %vm197_vm2, %v1798_v61  ;;  %3059 = vtanh.f32 %v2054_v4  ;;  %v447_v41 = vld [vmem:[#allocation2 + $0x3c8] sm:$0xff] }
 0x15b   : > { %v3036_v2 = vpop.eup %3035  ;;  %2239 = vst.msk [vmem:[%s3613_s3 + $0x158] sm:$0xff] %vm197_vm2, %v3034_v59  ;;  %v2750_v8 = vpop.f32.mrb[54].mxu1  ;;  %v2052_v11 = vld [vmem:[#allocation2 + $0x380] sm:$0xff]  ;;  %v1735_v12 = vadd.f32 %v2686_v7, %v381_v57  ;;  %1861 = vst.msk [vmem:[#allocation2 + $0x1a0] sm:$0xff] %vm197_vm2, %v1732_v5  ;;  %3061 = vtanh.f32 %v1988_v10  ;;  %v453_v10 = vld [vmem:[#allocation2 + $0x3f8] sm:$0xff] }
 0x15c   : > { %v3038_v9 = vpop.eup %3037  ;;  %2303 = vst.msk [vmem:[%s3613_s3 + $0x358] sm:$0xff] %vm197_vm2, %v3036_v2  ;;  %v1799_v13 = vadd.f32 %v2750_v8, %v445_v58  ;;  %v1380_v14 = vpop.f32.mrb[55].mxu0  ;;  %v1991_v17 = vld [vmem:[#allocation2 + $0x198] sm:$0xff]  ;;  %1925 = vst.msk [vmem:[#allocation2 + $0x3a0] sm:$0xff] %vm197_vm2, %v1796_v6  ;;  %3063 = vtanh.f32 %v2052_v11  ;;  %v386_v4 = vld [vmem:[#allocation2 + $0x1e0] sm:$0xff] }
 0x15d   : > { %v1636_v15 = vpop.f32.mrb[55].mxu1  ;;  %v3040_v16 = vpop.eup %3039  ;;  %2237 = vst.msk [vmem:[%s3613_s3 + $0x148] sm:$0xff] %vm197_vm2, %v3038_v9  ;;  %v1733_v18 = vadd.f32 %v1380_v14, %v379_v0  ;;  %v2055_v21 = vld [vmem:[#allocation2 + $0x398] sm:$0xff]  ;;  %1864 = vst.msk [vmem:[#allocation2 + $0x1b8] sm:$0xff] %vm197_vm2, %v1735_v12  ;;  %3065 = vtanh.f32 %v1991_v17  ;;  %v388_v0 = vld [vmem:[#allocation2 + $0x1f0] sm:$0xff] }
 0x15e   : > { %v1797_v19 = vadd.f32 %v1636_v15, %v443_v1  ;;  %v3042_v20 = vpop.eup %3041  ;;  %2301 = vst.msk [vmem:[%s3613_s3 + $0x348] sm:$0xff] %vm197_vm2, %v3040_v16  ;;  %1928 = vst.msk [vmem:[#allocation2 + $0x3b8] sm:$0xff] %vm197_vm2, %v1799_v13  ;;  %v1989_v23 = vld [vmem:[#allocation2 + $0x188] sm:$0xff]  ;;  %3067 = vtanh.f32 %v2055_v21  ;;  %v2689_v31 = vpop.f32.mrb[56].mxu0  ;;  %v452_v1 = vld [vmem:[#allocation2 + $0x3f0] sm:$0xff] }
 0x15f   : > { %v3044_v22 = vpop.eup %3043  ;;  %2242 = vst.msk [vmem:[%s3613_s3 + $0x170] sm:$0xff] %vm197_vm2, %v3042_v20  ;;  %1862 = vst.msk [vmem:[#allocation2 + $0x1a8] sm:$0xff] %vm197_vm2, %v1733_v18  ;;  %v2053_v27 = vld [vmem:[#allocation2 + $0x388] sm:$0xff]  ;;  %v2753_v32 = vpop.f32.mrb[56].mxu1  ;;  %3069 = vtanh.f32 %v1989_v23  ;;  %v1738_v36 = vadd.f32 %v2689_v31, %v384_v24  ;;  %v450_v5 = vld [vmem:[#allocation2 + $0x3e0] sm:$0xff] }
 0x160   : > { %1926 = vst.msk [vmem:[#allocation2 + $0x3a8] sm:$0xff] %vm197_vm2, %v1797_v19  ;;  %v3046_v26 = vpop.eup %3045  ;;  %2306 = vst.msk [vmem:[%s3613_s3 + $0x370] sm:$0xff] %vm197_vm2, %v3044_v22  ;;  %v1802_v37 = vadd.f32 %v2753_v32, %v448_v25  ;;  %v1393_v38 = vpop.f32.mrb[57].mxu0  ;;  %3071 = vtanh.f32 %v2053_v27  ;;  %v1994_v43 = vld [vmem:[#allocation2 + $0x1b0] sm:$0xff]  ;;  %v389_v9 = vld [vmem:[#allocation2 + $0x1f8] sm:$0xff] }
 0x161   : > { %v3048_v30 = vpop.eup %3047  ;;  %2240 = vst.msk [vmem:[%s3613_s3 + $0x160] sm:$0xff] %vm197_vm2, %v3046_v26  ;;  %v1649_v39 = vpop.f32.mrb[57].mxu1  ;;  %v2058_v44 = vld [vmem:[#allocation2 + $0x3b0] sm:$0xff]  ;;  %v1736_v45 = vadd.f32 %v1393_v38, %v382_v28  ;;  %3073 = vtanh.f32 %v1994_v43  ;;  %1867 = vst.msk [vmem:[#allocation2 + $0x1d0] sm:$0xff] %vm197_vm2, %v1738_v36  ;;  %v387_v16 = vld [vmem:[#allocation2 + $0x1e8] sm:$0xff] }
 0x162   : > { %v3050_v35 = vpop.eup %3049  ;;  %2304 = vst.msk [vmem:[%s3613_s3 + $0x360] sm:$0xff] %vm197_vm2, %v3048_v30  ;;  %v1800_v46 = vadd.f32 %v1649_v39, %v446_v29  ;;  %v2690_v47 = vpop.f32.mrb[58].mxu0  ;;  %v1992_v50 = vld [vmem:[#allocation2 + $0x1a0] sm:$0xff]  ;;  %1931 = vst.msk [vmem:[#allocation2 + $0x3d0] sm:$0xff] %vm197_vm2, %v1802_v37  ;;  %3075 = vtanh.f32 %v2058_v44  ;;  %v451_v17 = vld [vmem:[#allocation2 + $0x3e8] sm:$0xff] }
 0x163   : > { %v3052_v42 = vpop.eup %3051  ;;  %2243 = vst.msk [vmem:[%s3613_s3 + $0x178] sm:$0xff] %vm197_vm2, %v3050_v35  ;;  %v2754_v48 = vpop.f32.mrb[58].mxu1  ;;  %v2056_v51 = vld [vmem:[#allocation2 + $0x3a0] sm:$0xff]  ;;  %v1739_v52 = vadd.f32 %v2690_v47, %v385_v33  ;;  %1865 = vst.msk [vmem:[#allocation2 + $0x1c0] sm:$0xff] %vm197_vm2, %v1736_v45  ;;  %3077 = vtanh.f32 %v1992_v50 }
 0x164   : > { %v3054_v49 = vpop.eup %3053  ;;  %2307 = vst.msk [vmem:[%s3613_s3 + $0x378] sm:$0xff] %vm197_vm2, %v3052_v42  ;;  %v1803_v53 = vadd.f32 %v2754_v48, %v449_v34  ;;  %v1396_v54 = vpop.f32.mrb[59].mxu0  ;;  %v1995_v57 = vld [vmem:[#allocation2 + $0x1b8] sm:$0xff]  ;;  %1929 = vst.msk [vmem:[#allocation2 + $0x3c0] sm:$0xff] %vm197_vm2, %v1800_v46  ;;  %3079 = vtanh.f32 %v2056_v51 }
 0x165   : > { %v1652_v55 = vpop.f32.mrb[59].mxu1  ;;  %v3056_v56 = vpop.eup %3055  ;;  %2241 = vst.msk [vmem:[%s3613_s3 + $0x168] sm:$0xff] %vm197_vm2, %v3054_v49  ;;  %v1737_v58 = vadd.f32 %v1396_v54, %v383_v40  ;;  %v2059_v61 = vld [vmem:[#allocation2 + $0x3b8] sm:$0xff]  ;;  %1868 = vst.msk [vmem:[#allocation2 + $0x1d8] sm:$0xff] %vm197_vm2, %v1739_v52  ;;  %3081 = vtanh.f32 %v1995_v57 }
 0x166   : > { %v1801_v59 = vadd.f32 %v1652_v55, %v447_v41  ;;  %v3058_v60 = vpop.eup %3057  ;;  %2305 = vst.msk [vmem:[%s3613_s3 + $0x368] sm:$0xff] %vm197_vm2, %v3056_v56  ;;  %1932 = vst.msk [vmem:[#allocation2 + $0x3d8] sm:$0xff] %vm197_vm2, %v1803_v53  ;;  %v1993_v63 = vld [vmem:[#allocation2 + $0x1a8] sm:$0xff]  ;;  %3083 = vtanh.f32 %v2059_v61  ;;  %v2693_v7 = vpop.f32.mrb[60].mxu0 }
 0x167   : > { %v3060_v62 = vpop.eup %3059  ;;  %2246 = vst.msk [vmem:[%s3613_s3 + $0x190] sm:$0xff] %vm197_vm2, %v3058_v60  ;;  %1866 = vst.msk [vmem:[#allocation2 + $0x1c8] sm:$0xff] %vm197_vm2, %v1737_v58  ;;  %v2057_v3 = vld [vmem:[#allocation2 + $0x3a8] sm:$0xff]  ;;  %v2757_v8 = vpop.f32.mrb[60].mxu1  ;;  %3085 = vtanh.f32 %v1993_v63  ;;  %v1742_v12 = vadd.f32 %v2693_v7, %v388_v0 }
 0x168   : > { %1930 = vst.msk [vmem:[#allocation2 + $0x3c8] sm:$0xff] %vm197_vm2, %v1801_v59  ;;  %v3062_v2 = vpop.eup %3061  ;;  %2310 = vst.msk [vmem:[%s3613_s3 + $0x390] sm:$0xff] %vm197_vm2, %v3060_v62  ;;  %v1806_v13 = vadd.f32 %v2757_v8, %v452_v1  ;;  %v1409_v14 = vpop.f32.mrb[61].mxu0  ;;  %3087 = vtanh.f32 %v2057_v3  ;;  %v1998_v19 = vld [vmem:[#allocation2 + $0x1d0] sm:$0xff] }
 0x169   : > { %v3064_v6 = vpop.eup %3063  ;;  %2244 = vst.msk [vmem:[%s3613_s3 + $0x180] sm:$0xff] %vm197_vm2, %v3062_v2  ;;  %v1665_v15 = vpop.f32.mrb[61].mxu1  ;;  %v2062_v20 = vld [vmem:[#allocation2 + $0x3d0] sm:$0xff]  ;;  %v1740_v21 = vadd.f32 %v1409_v14, %v386_v4  ;;  %3089 = vtanh.f32 %v1998_v19  ;;  %1871 = vst.msk [vmem:[#allocation2 + $0x1f0] sm:$0xff] %vm197_vm2, %v1742_v12 }
 0x16a   : > { %v3066_v11 = vpop.eup %3065  ;;  %2308 = vst.msk [vmem:[%s3613_s3 + $0x380] sm:$0xff] %vm197_vm2, %v3064_v6  ;;  %v1804_v22 = vadd.f32 %v1665_v15, %v450_v5  ;;  %v2694_v23 = vpop.f32.mrb[62].mxu0  ;;  %v1996_v26 = vld [vmem:[#allocation2 + $0x1c0] sm:$0xff]  ;;  %1935 = vst.msk [vmem:[#allocation2 + $0x3f0] sm:$0xff] %vm197_vm2, %v1806_v13  ;;  %3091 = vtanh.f32 %v2062_v20 }
 0x16b   : > { %v3068_v18 = vpop.eup %3067  ;;  %2247 = vst.msk [vmem:[%s3613_s3 + $0x198] sm:$0xff] %vm197_vm2, %v3066_v11  ;;  %v2758_v24 = vpop.f32.mrb[62].mxu1  ;;  %v2060_v27 = vld [vmem:[#allocation2 + $0x3c0] sm:$0xff]  ;;  %v1743_v28 = vadd.f32 %v2694_v23, %v389_v9  ;;  %1869 = vst.msk [vmem:[#allocation2 + $0x1e0] sm:$0xff] %vm197_vm2, %v1740_v21  ;;  %3093 = vtanh.f32 %v1996_v26 }
 0x16c   : > { %v3070_v25 = vpop.eup %3069  ;;  %2311 = vst.msk [vmem:[%s3613_s3 + $0x398] sm:$0xff] %vm197_vm2, %v3068_v18  ;;  %v1807_v29 = vadd.f32 %v2758_v24, %v453_v10  ;;  %v1412_v30 = vpop.f32.mrb[63].mxu0  ;;  %v1999_v33 = vld [vmem:[#allocation2 + $0x1d8] sm:$0xff]  ;;  %1933 = vst.msk [vmem:[#allocation2 + $0x3e0] sm:$0xff] %vm197_vm2, %v1804_v22  ;;  %3095 = vtanh.f32 %v2060_v27 }
 0x16d   : > { %v1668_v31 = vpop.f32.mrb[63].mxu1  ;;  %v3072_v32 = vpop.eup %3071  ;;  %2245 = vst.msk [vmem:[%s3613_s3 + $0x188] sm:$0xff] %vm197_vm2, %v3070_v25  ;;  %v1741_v34 = vadd.f32 %v1412_v30, %v387_v16  ;;  %v2063_v37 = vld [vmem:[#allocation2 + $0x3d8] sm:$0xff]  ;;  %1872 = vst.msk [vmem:[#allocation2 + $0x1f8] sm:$0xff] %vm197_vm2, %v1743_v28  ;;  %3097 = vtanh.f32 %v1999_v33 }
 0x16e   : > { %v1805_v35 = vadd.f32 %v1668_v31, %v451_v17  ;;  %v3074_v36 = vpop.eup %3073  ;;  %2309 = vst.msk [vmem:[%s3613_s3 + $0x388] sm:$0xff] %vm197_vm2, %v3072_v32  ;;  %1936 = vst.msk [vmem:[#allocation2 + $0x3f8] sm:$0xff] %vm197_vm2, %v1807_v29  ;;  %v1997_v39 = vld [vmem:[#allocation2 + $0x1c8] sm:$0xff]  ;;  %3099 = vtanh.f32 %v2063_v37 }
 0x16f   : > { %v3076_v38 = vpop.eup %3075  ;;  %2250 = vst.msk [vmem:[%s3613_s3 + $0x1b0] sm:$0xff] %vm197_vm2, %v3074_v36  ;;  %1870 = vst.msk [vmem:[#allocation2 + $0x1e8] sm:$0xff] %vm197_vm2, %v1741_v34  ;;  %v2061_v41 = vld [vmem:[#allocation2 + $0x3c8] sm:$0xff]  ;;  %3101 = vtanh.f32 %v1997_v39 }
 0x170   : > { %1934 = vst.msk [vmem:[#allocation2 + $0x3e8] sm:$0xff] %vm197_vm2, %v1805_v35  ;;  %v3078_v40 = vpop.eup %3077  ;;  %2314 = vst.msk [vmem:[%s3613_s3 + $0x3b0] sm:$0xff] %vm197_vm2, %v3076_v38  ;;  %3103 = vtanh.f32 %v2061_v41  ;;  %v2002_v45 = vld [vmem:[#allocation2 + $0x1f0] sm:$0xff] }
 0x171   : > { %v3080_v42 = vpop.eup %3079  ;;  %2248 = vst.msk [vmem:[%s3613_s3 + $0x1a0] sm:$0xff] %vm197_vm2, %v3078_v40  ;;  %v2066_v46 = vld [vmem:[#allocation2 + $0x3f0] sm:$0xff]  ;;  %3105 = vtanh.f32 %v2002_v45 }
 0x172   : > { %v3082_v43 = vpop.eup %3081  ;;  %2312 = vst.msk [vmem:[%s3613_s3 + $0x3a0] sm:$0xff] %vm197_vm2, %v3080_v42  ;;  %v2000_v48 = vld [vmem:[#allocation2 + $0x1e0] sm:$0xff]  ;;  %3107 = vtanh.f32 %v2066_v46 }
 0x173   : > { %v3084_v44 = vpop.eup %3083  ;;  %2251 = vst.msk [vmem:[%s3613_s3 + $0x1b8] sm:$0xff] %vm197_vm2, %v3082_v43  ;;  %v2064_v49 = vld [vmem:[#allocation2 + $0x3e0] sm:$0xff]  ;;  %3109 = vtanh.f32 %v2000_v48 }
 0x174   : > { %v3086_v47 = vpop.eup %3085  ;;  %2315 = vst.msk [vmem:[%s3613_s3 + $0x3b8] sm:$0xff] %vm197_vm2, %v3084_v44  ;;  %v2003_v51 = vld [vmem:[#allocation2 + $0x1f8] sm:$0xff]  ;;  %3111 = vtanh.f32 %v2064_v49 }
 0x175   : > { %v3088_v50 = vpop.eup %3087  ;;  %2249 = vst.msk [vmem:[%s3613_s3 + $0x1a8] sm:$0xff] %vm197_vm2, %v3086_v47  ;;  %v2067_v53 = vld [vmem:[#allocation2 + $0x3f8] sm:$0xff]  ;;  %3113 = vtanh.f32 %v2003_v51 }
 0x176   : > { %v3090_v52 = vpop.eup %3089  ;;  %2313 = vst.msk [vmem:[%s3613_s3 + $0x3a8] sm:$0xff] %vm197_vm2, %v3088_v50  ;;  %v2001_v55 = vld [vmem:[#allocation2 + $0x1e8] sm:$0xff]  ;;  %3115 = vtanh.f32 %v2067_v53 }
 0x177   : > { %v3092_v54 = vpop.eup %3091  ;;  %2254 = vst.msk [vmem:[%s3613_s3 + $0x1d0] sm:$0xff] %vm197_vm2, %v3090_v52  ;;  %v2065_v57 = vld [vmem:[#allocation2 + $0x3e8] sm:$0xff]  ;;  %3117 = vtanh.f32 %v2001_v55 }
 0x178   : > { %v3094_v56 = vpop.eup %3093  ;;  %2318 = vst.msk [vmem:[%s3613_s3 + $0x3d0] sm:$0xff] %vm197_vm2, %v3092_v54  ;;  %3119 = vtanh.f32 %v2065_v57 }
 0x179   : > { %v3096_v58 = vpop.eup %3095  ;;  %2252 = vst.msk [vmem:[%s3613_s3 + $0x1c0] sm:$0xff] %vm197_vm2, %v3094_v56 }
 0x17a   : > { %v3098_v59 = vpop.eup %3097  ;;  %2316 = vst.msk [vmem:[%s3613_s3 + $0x3c0] sm:$0xff] %vm197_vm2, %v3096_v58 }
 0x17b   : > { %v3100_v60 = vpop.eup %3099  ;;  %2255 = vst.msk [vmem:[%s3613_s3 + $0x1d8] sm:$0xff] %vm197_vm2, %v3098_v59 }
 0x17c   : > { %v3102_v61 = vpop.eup %3101  ;;  %2319 = vst.msk [vmem:[%s3613_s3 + $0x3d8] sm:$0xff] %vm197_vm2, %v3100_v60 }
 0x17d   : > { %v3104_v62 = vpop.eup %3103  ;;  %2253 = vst.msk [vmem:[%s3613_s3 + $0x1c8] sm:$0xff] %vm197_vm2, %v3102_v61 }
 0x17e   : > { %v3106_v63 = vpop.eup %3105  ;;  %2317 = vst.msk [vmem:[%s3613_s3 + $0x3c8] sm:$0xff] %vm197_vm2, %v3104_v62 }
 0x17f   : > { %v3108_v0 = vpop.eup %3107  ;;  %2258 = vst.msk [vmem:[%s3613_s3 + $0x1f0] sm:$0xff] %vm197_vm2, %v3106_v63 }
 0x180   : > { %v3110_v1 = vpop.eup %3109  ;;  %2322 = vst.msk [vmem:[%s3613_s3 + $0x3f0] sm:$0xff] %vm197_vm2, %v3108_v0 }
 0x181   : > { %v3112_v2 = vpop.eup %3111  ;;  %2256 = vst.msk [vmem:[%s3613_s3 + $0x1e0] sm:$0xff] %vm197_vm2, %v3110_v1 }
 0x182   : > { %v3114_v3 = vpop.eup %3113  ;;  %2320 = vst.msk [vmem:[%s3613_s3 + $0x3e0] sm:$0xff] %vm197_vm2, %v3112_v2 }
 0x183   : > { %v3116_v4 = vpop.eup %3115  ;;  %2259 = vst.msk [vmem:[%s3613_s3 + $0x1f8] sm:$0xff] %vm197_vm2, %v3114_v3 }
 0x184   : > { %v3118_v5 = vpop.eup %3117  ;;  %2323 = vst.msk [vmem:[%s3613_s3 + $0x3f8] sm:$0xff] %vm197_vm2, %v3116_v4 }
 0x185   : > { %v3120_v6 = vpop.eup %3119  ;;  %2257 = vst.msk [vmem:[%s3613_s3 + $0x1e8] sm:$0xff] %vm197_vm2, %v3118_v5 }
 0x186   : > { %2321 = vst.msk [vmem:[%s3613_s3 + $0x3e8] sm:$0xff] %vm197_vm2, %v3120_v6 }
 0x187 PF: > { %s12_s11 = sadd.s32 1, %s3143_s11   ;;  %s3995_s9 = smov %s3139_s10 }
 0x188   : > { %p9_p5 = scmp.ge.s32.totalorder %s12_s11, 4   ;;  %s3996_s10 = smov %s3998_s12 }
 0x18a   :  { %11 = sbr.rel (!%p9_p5) target bundleno = 2 (0x2), region = 69 }

</bundles_post_ra>
